<compile_context>
chip_gen: v6e
topology: v6e:2x2x1
jax: 0.10.0
libtpu: 0.0.40
codegen_flags: <defaults>
</compile_context>

<pallas_src>
import numpy as np
import jax
import jax.numpy as jnp
from jax.experimental import pallas as pl
from jax.experimental.pallas import tpu as pltpu


def _round_up(x, m):
    return ((x + m - 1) // m) * m


# ----------------------------------------------------------------------------
# Pallas tiled matmul (+bias) kernel, used for the im2col convolutions
# ----------------------------------------------------------------------------
def _matmul_bias_kernel(x_ref, w_ref, b_ref, o_ref):
    o_ref[...] = (
        jnp.dot(x_ref[...], w_ref[...], preferred_element_type=jnp.float32)
        + b_ref[...]
    )


def pallas_matmul_bias(x, w, b, tm=1024):
    """(M, K) @ (K, N) + b, row-tiled; big tiles, >=2 steps when possible."""
    M, K = x.shape
    N = w.shape[1]
    tm_eff = min(tm, _round_up(M, 8))
    if M >= 16:
        # keep at least 2 grid steps so both v7x TensorCores get work
        tm_eff = min(tm_eff, _round_up(max(M // 2, 8), 8))
    tm_eff = max(tm_eff, 8)
    Mp = _round_up(M, tm_eff)
    if Mp != M:
        x = jnp.pad(x, ((0, Mp - M), (0, 0)))
    out = pl.pallas_call(
        _matmul_bias_kernel,
        out_shape=jax.ShapeDtypeStruct((Mp, N), jnp.float32),
        grid=(Mp // tm_eff,),
        in_specs=[
            pl.BlockSpec((tm_eff, K), lambda i: (i, 0)),
            pl.BlockSpec((K, N), lambda i: (0, 0)),
            pl.BlockSpec((1, N), lambda i: (0, 0)),
        ],
        out_specs=pl.BlockSpec((tm_eff, N), lambda i: (i, 0)),
        compiler_params=pltpu.CompilerParams(
            dimension_semantics=("parallel",),
            vmem_limit_bytes=48 * 1024 * 1024),
    )(x, w, b.reshape(1, N))
    return out[:M]


def conv3x3_same(x_nhwc, w_kkio, b):
    """3x3 conv, stride 1, padding 1 (same as nn.Conv2d(..., 3, padding=1))."""
    # TODO(synk): replace the 9x im2col materialization with a direct Pallas
    # conv kernel (padded NHWC row tiles + 9 shifted in-VMEM dots) to cut the
    # conv-head HBM traffic ~9x; the bf16 interim step was skipped to keep the
    # reference f32 semantics.
    N, H, W, Cin = x_nhwc.shape
    Cout = w_kkio.shape[-1]
    xp = jnp.pad(x_nhwc, ((0, 0), (1, 1), (1, 1), (0, 0)))
    patches = jnp.concatenate(
        [xp[:, dy:dy + H, dx:dx + W, :] for dy in range(3) for dx in range(3)],
        axis=-1,
    )  # (N, H, W, 9*Cin), ordering (dy, dx, cin) matches the weight reshape
    cols = patches.reshape(N * H * W, 9 * Cin)
    wm = w_kkio.reshape(9 * Cin, Cout)
    out = pallas_matmul_bias(cols, wm, b)
    return out.reshape(N, H, W, Cout)


# ----------------------------------------------------------------------------
# Query kernel: lane-vectorized spline basis + block-diag imnet + blending
# ----------------------------------------------------------------------------
def _spline3(x):
    # 3rd-order B-spline, symmetric 2-branch Horner form.  Equivalent to
    # SplineBasis_3rd.forward on the clamped range (-2+eps, 2-eps).
    a = jnp.abs(x)
    inner = 2.0 / 3.0 + a * a * (0.5 * a - 1.0)     # |x| <= 1
    d = 2.0 - a
    outer = d * d * d * (1.0 / 6.0)                 # 1 < |x| < 2
    return jnp.where(a <= 1.0, inner, outer)


def make_query_kernel(QH, CELL, AREA0, OUTP):
    def kernel(slab_ref, mexp_ref, wdil_ref,
               w1_ref, b1_ref, w2_ref, b2_ref, w3_ref, b3_ref, out_ref):
        slab = slab_ref[...]                               # (TQ, UW)

        # (rel - knot) for all 4 shifts: y-half in lanes [0:QH), x-half in
        # [QH:2QH).  One MXU pass with a constant +-1 expansion matrix (no
        # lane shuffles; summing exact zeros keeps the subtraction exact).
        d_all = jnp.dot(slab, mexp_ref[...],
                        preferred_element_type=jnp.float32)  # (TQ, UW)
        dil = slab[:, CELL:CELL + 1] * wdil_ref[...]         # (TQ, UW)
        u = jnp.clip(d_all * dil, -2.0 + 1e-6, 2.0 - 1e-6)
        basis = _spline3(u)                                  # one full-lane pass

        # outer product B(uy)*B(ux): x-half rolled onto the y-half lanes (XLU)
        prod = basis * pltpu.roll(basis, shift=QH, axis=1)
        # gate with the coefficients (slab lanes [0:QH)); the junk produced in
        # lanes >= QH is annihilated by the zero rows of w1 below.
        z = slab * prod                                      # (TQ, UW)

        # imnet: 4 shifts stay in the lane dimension via block-diag weights
        h = jnp.maximum(
            jnp.dot(z, w1_ref[...], preferred_element_type=jnp.float32)
            + b1_ref[...], 0.0)                              # (TQ, 4*H1)
        h = jnp.maximum(
            jnp.dot(h, w2_ref[...], preferred_element_type=jnp.float32)
            + b2_ref[...], 0.0)                              # (TQ, 4*H2)
        pred = jnp.dot(h, w3_ref[...],
                       preferred_element_type=jnp.float32) + b3_ref[...]
        # TODO(synk): optional bf16 cast of the MLP operands (MXU-pass win) was
        # not applied to preserve the f32 semantics of the reference module.

        a0 = slab[:, AREA0 + 0:AREA0 + 1]
        a1 = slab[:, AREA0 + 1:AREA0 + 2]
        a2 = slab[:, AREA0 + 2:AREA0 + 3]
        a3 = slab[:, AREA0 + 3:AREA0 + 4]
        inv_tot = pl.reciprocal(a0 + a1 + a2 + a3, approx=True)  # EUP slot
        # the reference swaps areas 0<->3 and 1<->2 before blending
        ret = pred[:, 0 * OUTP:1 * OUTP] * (a3 * inv_tot)
        ret = ret + pred[:, 1 * OUTP:2 * OUTP] * (a2 * inv_tot)
        ret = ret + pred[:, 2 * OUTP:3 * OUTP] * (a1 * inv_tot)
        ret = ret + pred[:, 3 * OUTP:4 * OUTP] * (a0 * inv_tot)
        out_ref[...] = ret                                   # (TQ, OUTP)

    return kernel


def _block_diag4(m):
    r, c = m.shape
    out = jnp.zeros((4 * r, 4 * c), jnp.float32)
    for j in range(4):
        out = out.at[j * r:(j + 1) * r, j * c:(j + 1) * c].set(m)
    return out


def _make_expand_matrix(S, UW, QH, REL_Y0, REL_X0, KNOT0):
    """Constant matrix: slab @ M -> (rel - knot) for uy lanes then ux lanes."""
    SS = S * S
    M = np.zeros((UW, UW), np.float32)
    for j in range(4):
        for sy in range(S):
            for sx in range(S):
                p = j * SS + sy * S + sx
                # uy lane p: rel_y_j - ky_j[sy]
                M[REL_Y0 + j, p] += 1.0
                M[KNOT0 + j * 2 * S + sy, p] -= 1.0
                # ux lane QH+p: rel_x_j - kx_j[sx]
                M[REL_X0 + j, QH + p] += 1.0
                M[KNOT0 + j * 2 * S + S + sx, QH + p] -= 1.0
    return jnp.asarray(M)


def btc_query_pallas(slab, wdil, imnet_params, S, layout, TQ, OUT):
    QH, REL_Y0, REL_X0, KNOT0, CELL, AREA0, SLABW = layout
    UW = 2 * QH                              # = 8 * S^2, multiple of 128
    assert UW % 128 == 0 and UW >= SLABW
    BQ = slab.shape[0]
    w1, b1, w2, b2, w3, b3 = imnet_params
    H1, H2 = w1.shape[1], w2.shape[1]
    OUTP = _round_up(OUT, 8)                 # narrow (masked) output store

    # query-row tile: large blocks amortize per-step overhead; keep >= 2 grid
    # steps when possible so both v7x TensorCores get work.
    TQe = min(TQ, _round_up(BQ, 8))
    if BQ >= 16:
        TQe = min(TQe, _round_up(max(BQ // 2, 8), 8))
    TQe = max(TQe, 8)
    BQp = _round_up(BQ, TQe)

    slab_p = jnp.pad(slab, ((0, BQp - BQ), (0, UW - SLABW)))
    if BQp > BQ:
        # keep padded rows finite (their area sum would otherwise be 0)
        slab_p = slab_p.at[BQ:, AREA0:AREA0 + 4].set(1.0)

    mexp = _make_expand_matrix(S, UW, QH, REL_Y0, REL_X0, KNOT0)

    # dilation weight expanded once (length-S vector -> outer-product layout)
    wdil_v = wdil.reshape(S).astype(jnp.float32)
    wdil_pat = jnp.concatenate(
        [jnp.tile(jnp.repeat(wdil_v, S), 4),      # uy half: index sy = p // S
         jnp.tile(jnp.tile(wdil_v, S), 4)]        # ux half: index sx = p %  S
    ).reshape(1, UW)

    # block-diagonal imnet weights: the 4 shifts share one matmul per layer
    # and stay in the lane dimension (no row concat / relayout).
    w1bd = jnp.pad(_block_diag4(w1), ((0, UW - 4 * w1.shape[0]), (0, 0)))
    b1bd = jnp.tile(b1.reshape(1, -1), (1, 4))
    w2bd = _block_diag4(w2)
    b2bd = jnp.tile(b2.reshape(1, -1), (1, 4))
    w3p = jnp.pad(w3, ((0, 0), (0, OUTP - OUT)))
    w3bd = _block_diag4(w3p)
    b3bd = jnp.tile(jnp.pad(b3.reshape(1, -1), ((0, 0), (0, OUTP - OUT))),
                    (1, 4))

    kernel = make_query_kernel(QH, CELL, AREA0, OUTP)
    out = pl.pallas_call(
        kernel,
        out_shape=jax.ShapeDtypeStruct((BQp, OUTP), jnp.float32),
        grid=(BQp // TQe,),
        in_specs=[
            pl.BlockSpec((TQe, UW), lambda i: (i, 0)),
            pl.BlockSpec((UW, UW), lambda i: (0, 0)),
            pl.BlockSpec((1, UW), lambda i: (0, 0)),
            pl.BlockSpec((UW, 4 * H1), lambda i: (0, 0)),
            pl.BlockSpec((1, 4 * H1), lambda i: (0, 0)),
            pl.BlockSpec((4 * H1, 4 * H2), lambda i: (0, 0)),
            pl.BlockSpec((1, 4 * H2), lambda i: (0, 0)),
            pl.BlockSpec((4 * H2, 4 * OUTP), lambda i: (0, 0)),
            pl.BlockSpec((1, 4 * OUTP), lambda i: (0, 0)),
        ],
        out_specs=pl.BlockSpec((TQe, OUTP), lambda i: (i, 0)),
        compiler_params=pltpu.CompilerParams(
            dimension_semantics=("parallel",),
            vmem_limit_bytes=48 * 1024 * 1024),
    )(slab_p, mexp, wdil_pat, w1bd, b1bd, w2bd, b2bd, w3bd, b3bd)
    return out[:BQ, :OUT]


# ----------------------------------------------------------------------------
# JAX glue: gathers (grid_sample nearest / bilinear) and top-level forward
# ----------------------------------------------------------------------------
def bilinear_border_sample(img, coord):
    """F.grid_sample(img, coord.flip(-1), bilinear, border, align_corners=False)."""
    bs, H, W, C = img.shape
    py = ((coord[:, :, 0] + 1.0) * H - 1.0) / 2.0
    px = ((coord[:, :, 1] + 1.0) * W - 1.0) / 2.0
    py = jnp.clip(py, 0.0, H - 1.0)
    px = jnp.clip(px, 0.0, W - 1.0)
    y0 = jnp.floor(py)
    x0 = jnp.floor(px)
    wy1 = py - y0
    wx1 = px - x0
    wy0 = 1.0 - wy1
    wx0 = 1.0 - wx1
    y0i = jnp.clip(y0.astype(jnp.int32), 0, H - 1)
    x0i = jnp.clip(x0.astype(jnp.int32), 0, W - 1)
    y1i = jnp.clip(y0i + 1, 0, H - 1)
    x1i = jnp.clip(x0i + 1, 0, W - 1)
    b = jnp.arange(bs)[:, None]
    v00 = img[b, y0i, x0i]
    v01 = img[b, y0i, x1i]
    v10 = img[b, y1i, x0i]
    v11 = img[b, y1i, x1i]
    return (v00 * (wy0 * wx0)[..., None] + v01 * (wy0 * wx1)[..., None]
            + v10 * (wy1 * wx0)[..., None] + v11 * (wy1 * wx1)[..., None])


def btc_forward(inp_nhwc, coord, cell, params, hidden_dim=16, TQ=2048):
    S = int(round(hidden_dim ** 0.5))
    SS = S * S
    assert SS == hidden_dim and S % 4 == 0, \
        "lane packing assumes sqrt(hidden_dim) is a multiple of 4"

    # permute knot-head channels once so y-knots land in [0:S) and x-knots in
    # [S:2S) (replaces the strided 0::2 / 1::2 split of the reference).
    perm = jnp.concatenate([jnp.arange(0, 2 * S, 2), jnp.arange(1, 2 * S, 2)])
    knot_w = params["knot_w"][..., perm]
    knot_b = params["knot_b"][perm]

    # encoder conv, then the coef and knot heads FUSED into one matmul so
    # `feat` is only read once (they share the same im2col input).
    feat = conv3x3_same(inp_nhwc, params["enc_w"], params["enc_b"])
    head_w = jnp.concatenate([params["coef_w"], knot_w], axis=-1)
    head_b = jnp.concatenate([params["coef_b"], knot_b], axis=0)
    heads = conv3x3_same(feat, head_w, head_b)      # (..., hidden_dim + 2S)

    bs, H, W, _ = feat.shape
    q = coord.shape[1]
    BQ = bs * q
    rx = 1.0 / H          # 2 / H / 2
    ry = 1.0 / W
    eps = 1e-6
    shifts = [(-1, -1), (-1, 1), (1, -1), (1, 1)]   # (vx, vy) loop order
    bidx = jnp.arange(bs)[:, None]

    coord_y = coord[:, :, 0].astype(jnp.float32)
    coord_x = coord[:, :, 1].astype(jnp.float32)

    qc_parts, knot_parts, rely_parts, relx_parts, area_parts = [], [], [], [], []
    for vx, vy in shifts:
        cy = jnp.clip(coord_y + (vx * rx + eps), -1.0 + 1e-6, 1.0 - 1e-6)
        cx = jnp.clip(coord_x + (vy * ry + eps), -1.0 + 1e-6, 1.0 - 1e-6)
        # nearest grid_sample, align_corners=False (data-dependent gather: glue)
        py = ((cy + 1.0) * H - 1.0) / 2.0
        px = ((cx + 1.0) * W - 1.0) / 2.0
        iy = jnp.clip(jnp.round(py), 0, H - 1).astype(jnp.int32)
        ix = jnp.clip(jnp.round(px), 0, W - 1).astype(jnp.int32)
        hq = heads[bidx, iy, ix]                    # (bs, q, hidden_dim + 2S)
        qc_parts.append(hq[..., :SS].reshape(BQ, SS))
        knot_parts.append(hq[..., SS:SS + 2 * S].reshape(BQ, 2 * S))
        ycen = -1.0 + (2.0 * iy.astype(jnp.float32) + 1.0) / H
        xcen = -1.0 + (2.0 * ix.astype(jnp.float32) + 1.0) / W
        rel_y = ((coord_y - ycen) * H).reshape(BQ, 1)
        rel_x = ((coord_x - xcen) * W).reshape(BQ, 1)
        rely_parts.append(rel_y)
        relx_parts.append(rel_x)
        area_parts.append(jnp.abs(rel_y * rel_x) + 1e-9)

    # the reference dilation Linear is driven by rel_cell_y (= cell_y * H)
    cellH = (cell[:, :, 0].astype(jnp.float32) * H).reshape(BQ, 1)

    # packed, lane-dense slab: qc(4*SS) | rel_y(4) | rel_x(4) | knots(8S) |
    # cellH(1) | areas(4)  -> width 4*SS + 8S + 13, padded to UW = 8*SS lanes.
    slab = jnp.concatenate(
        qc_parts
        + [jnp.concatenate(rely_parts, axis=1),
           jnp.concatenate(relx_parts, axis=1)]
        + knot_parts
        + [cellH, jnp.concatenate(area_parts, axis=1)],
        axis=1)

    QH = 4 * SS
    layout = (QH,                 # QH
              QH,                 # REL_Y0
              QH + 4,             # REL_X0
              QH + 8,             # KNOT0
              QH + 8 + 8 * S,     # CELL
              QH + 9 + 8 * S,     # AREA0
              QH + 13 + 8 * S)    # SLABW

    imnet_params = (params["w1"], params["b1"], params["w2"], params["b2"],
                    params["w3"], params["b3"])
    OUT = params["w3"].shape[1]
    ret = btc_query_pallas(slab, params["wdil"], imnet_params, S, layout, TQ, OUT)
    ret = ret.reshape(bs, q, OUT)

    # final skip: bilinear sample of the input image (glue)
    ret = ret + bilinear_border_sample(inp_nhwc, coord)
    return ret


# ----------------------------------------------------------------------------
# main
# ----------------------------------------------------------------------------
if __name__ == "__main__":
    key = jax.random.PRNGKey(0)
    bs, Hin, Win, Cin = 2, 16, 16, 3
    enc_dim = 8
    hidden_dim = 16                # -> S = 4, knot channels = 8
    S = 4
    H1 = H2 = 32
    OUT = 3

    keys = jax.random.split(key, 12)
    params = {
        "enc_w": 0.1 * jax.random.normal(keys[0], (3, 3, Cin, enc_dim), jnp.float32),
        "enc_b": 0.01 * jax.random.normal(keys[1], (enc_dim,), jnp.float32),
        "coef_w": 0.1 * jax.random.normal(keys[2], (3, 3, enc_dim, hidden_dim), jnp.float32),
        "coef_b": 0.01 * jax.random.normal(keys[3], (hidden_dim,), jnp.float32),
        "knot_w": 0.1 * jax.random.normal(keys[4], (3, 3, enc_dim, 2 * S), jnp.float32),
        "knot_b": 0.01 * jax.random.normal(keys[5], (2 * S,), jnp.float32),
        "wdil": 0.5 + 0.1 * jax.random.normal(keys[6], (1, S), jnp.float32),
        "w1": 0.1 * jax.random.normal(keys[7], (hidden_dim, H1), jnp.float32),
        "b1": jnp.zeros((H1,), jnp.float32),
        "w2": 0.1 * jax.random.normal(keys[8], (H1, H2), jnp.float32),
        "b2": jnp.zeros((H2,), jnp.float32),
        "w3": 0.1 * jax.random.normal(keys[9], (H2, OUT), jnp.float32),
        "b3": jnp.zeros((OUT,), jnp.float32),
    }

    inp = jax.random.uniform(keys[10], (bs, Hin, Win, Cin), jnp.float32)  # NHWC

    # query coordinates: centers of a 16x16 target grid, cell = (2/16, 2/16)
    Ht, Wt = 16, 16
    ys = -1.0 + (2.0 * jnp.arange(Ht, dtype=jnp.float32) + 1.0) / Ht
    xs = -1.0 + (2.0 * jnp.arange(Wt, dtype=jnp.float32) + 1.0) / Wt
    grid = jnp.stack(jnp.meshgrid(ys, xs, indexing="ij"), axis=-1)
    coord = jnp.broadcast_to(grid.reshape(1, Ht * Wt, 2), (bs, Ht * Wt, 2))
    cell = jnp.broadcast_to(
        jnp.array([2.0 / Ht, 2.0 / Wt], jnp.float32), (bs, Ht * Wt, 2))

    # TQ=2048 is the real-workload default (sweep 1024-4096); at this tiny
    # demo size the tile is auto-capped so the grid still has 2 steps and
    # both v7x TensorCores get work.
    fwd = jax.jit(lambda i, c, cl: btc_forward(i, c, cl, params,
                                               hidden_dim=hidden_dim, TQ=2048))
    out = fwd(inp, coord, cell)
    out = jax.block_until_ready(out)
    assert out.shape == (bs, Ht * Wt, OUT)
    assert bool(jnp.all(jnp.isfinite(out)))
    print("KERNEL_OK")
</pallas_src>

<mosaic_0001>
module attributes {stable_mosaic.version = 11 : i64} {
  func.func @_matmul_bias_kernel(%arg0: i32, %arg1: memref<256x27xf32, #tpu.memory_space<vmem>>, %arg2: memref<27x8xf32, #tpu.memory_space<vmem>>, %arg3: memref<1x8xf32, #tpu.memory_space<vmem>>, %arg4: memref<256x8xf32, #tpu.memory_space<vmem>>) attributes {dimension_semantics = [#tpu.dimension_semantics<parallel>], iteration_bounds = array<i64: 2>, scalar_prefetch = 0 : i64, scratch_operands = 0 : i64, tpu.core_type = #tpu.core_type<tc>, window_params = [{transform_indices = @transform_0, window_bounds = array<i64: 256, 27>}, {pipeline_mode = #tpu.pipeline_mode<synchronous>, transform_indices = @transform_1, window_bounds = array<i64: 27, 8>}, {pipeline_mode = #tpu.pipeline_mode<synchronous>, transform_indices = @transform_2, window_bounds = array<i64: 1, 8>}, {transform_indices = @transform_3, window_bounds = array<i64: 256, 8>}]} {
    %c0 = arith.constant 0 : index
    %c0_0 = arith.constant 0 : index
    %0 = vector.load %arg1[%c0, %c0_0] : memref<256x27xf32, #tpu.memory_space<vmem>>, vector<256x27xf32>
    %c0_1 = arith.constant 0 : index
    %c0_2 = arith.constant 0 : index
    %1 = vector.load %arg2[%c0_1, %c0_2] : memref<27x8xf32, #tpu.memory_space<vmem>>, vector<27x8xf32>
    %cst = arith.constant dense<0.000000e+00> : vector<256x8xf32>
    %2 = tpu.matmul %0, %1, %cst {dimension_numbers = #tpu.dot_dimension_numbers<[1], [0], [0], [1], [0, 0, 1, 1], [], []>} : vector<256x27xf32>, vector<27x8xf32>, vector<256x8xf32> -> vector<256x8xf32>
    %c0_3 = arith.constant 0 : index
    %c0_4 = arith.constant 0 : index
    %3 = vector.load %arg3[%c0_3, %c0_4] : memref<1x8xf32, #tpu.memory_space<vmem>>, vector<1x8xf32>
    %4 = vector.broadcast %3 : vector<1x8xf32> to vector<256x8xf32>
    %5 = arith.addf %2, %4 : vector<256x8xf32>
    %c0_5 = arith.constant 0 : index
    %c0_6 = arith.constant 0 : index
    %6 = vector.load %arg4[%c0_5, %c0_6] : memref<256x8xf32, #tpu.memory_space<vmem>>, vector<256x8xf32>
    tpu.vector_store %arg4[%c0_5, %c0_6], %5 {strides = array<i32>} : memref<256x8xf32, #tpu.memory_space<vmem>>, vector<256x8xf32>,
    return
  }
  func.func @transform_0(%arg0: i32) -> (i32, i32) {
    %c0_i32 = arith.constant 0 : i32
    %c0_i32_0 = arith.constant 0 : i32
    return %arg0, %c0_i32 : i32, i32
  }
  func.func @transform_1(%arg0: i32) -> (i32, i32) {
    %c0_i32 = arith.constant 0 : i32
    %c0_i32_0 = arith.constant 0 : i32
    %c0_i32_1 = arith.constant 0 : i32
    return %c0_i32, %c0_i32_0 : i32, i32
  }
  func.func @transform_2(%arg0: i32) -> (i32, i32) {
    %c0_i32 = arith.constant 0 : i32
    %c0_i32_0 = arith.constant 0 : i32
    %c0_i32_1 = arith.constant 0 : i32
    return %c0_i32, %c0_i32_0 : i32, i32
  }
  func.func @transform_3(%arg0: i32) -> (i32, i32) {
    %c0_i32 = arith.constant 0 : i32
    %c0_i32_0 = arith.constant 0 : i32
    return %arg0, %c0_i32 : i32, i32
  }
}

module attributes {stable_mosaic.version = 11 : i64} {
  func.func @_matmul_bias_kernel(%arg0: i32, %arg1: memref<256x72xf32, #tpu.memory_space<vmem>>, %arg2: memref<72x24xf32, #tpu.memory_space<vmem>>, %arg3: memref<1x24xf32, #tpu.memory_space<vmem>>, %arg4: memref<256x24xf32, #tpu.memory_space<vmem>>) attributes {dimension_semantics = [#tpu.dimension_semantics<parallel>], iteration_bounds = array<i64: 2>, scalar_prefetch = 0 : i64, scratch_operands = 0 : i64, tpu.core_type = #tpu.core_type<tc>, window_params = [{transform_indices = @transform_0, window_bounds = array<i64: 256, 72>}, {pipeline_mode = #tpu.pipeline_mode<synchronous>, transform_indices = @transform_1, window_bounds = array<i64: 72, 24>}, {pipeline_mode = #tpu.pipeline_mode<synchronous>, transform_indices = @transform_2, window_bounds = array<i64: 1, 24>}, {transform_indices = @transform_3, window_bounds = array<i64: 256, 24>}]} {
    %c0 = arith.constant 0 : index
    %c0_0 = arith.constant 0 : index
    %0 = vector.load %arg1[%c0, %c0_0] : memref<256x72xf32, #tpu.memory_space<vmem>>, vector<256x72xf32>
    %c0_1 = arith.constant 0 : index
    %c0_2 = arith.constant 0 : index
    %1 = vector.load %arg2[%c0_1, %c0_2] : memref<72x24xf32, #tpu.memory_space<vmem>>, vector<72x24xf32>
    %cst = arith.constant dense<0.000000e+00> : vector<256x24xf32>
    %2 = tpu.matmul %0, %1, %cst {dimension_numbers = #tpu.dot_dimension_numbers<[1], [0], [0], [1], [0, 0, 1, 1], [], []>} : vector<256x72xf32>, vector<72x24xf32>, vector<256x24xf32> -> vector<256x24xf32>
    %c0_3 = arith.constant 0 : index
    %c0_4 = arith.constant 0 : index
    %3 = vector.load %arg3[%c0_3, %c0_4] : memref<1x24xf32, #tpu.memory_space<vmem>>, vector<1x24xf32>
    %4 = vector.broadcast %3 : vector<1x24xf32> to vector<256x24xf32>
    %5 = arith.addf %2, %4 : vector<256x24xf32>
    %c0_5 = arith.constant 0 : index
    %c0_6 = arith.constant 0 : index
    %6 = vector.load %arg4[%c0_5, %c0_6] : memref<256x24xf32, #tpu.memory_space<vmem>>, vector<256x24xf32>
    tpu.vector_store %arg4[%c0_5, %c0_6], %5 {strides = array<i32>} : memref<256x24xf32, #tpu.memory_space<vmem>>, vector<256x24xf32>,
    return
  }
  func.func @transform_0(%arg0: i32) -> (i32, i32) {
    %c0_i32 = arith.constant 0 : i32
    %c0_i32_0 = arith.constant 0 : i32
    return %arg0, %c0_i32 : i32, i32
  }
  func.func @transform_1(%arg0: i32) -> (i32, i32) {
    %c0_i32 = arith.constant 0 : i32
    %c0_i32_0 = arith.constant 0 : i32
    %c0_i32_1 = arith.constant 0 : i32
    return %c0_i32, %c0_i32_0 : i32, i32
  }
  func.func @transform_2(%arg0: i32) -> (i32, i32) {
    %c0_i32 = arith.constant 0 : i32
    %c0_i32_0 = arith.constant 0 : i32
    %c0_i32_1 = arith.constant 0 : i32
    return %c0_i32, %c0_i32_0 : i32, i32
  }
  func.func @transform_3(%arg0: i32) -> (i32, i32) {
    %c0_i32 = arith.constant 0 : i32
    %c0_i32_0 = arith.constant 0 : i32
    return %arg0, %c0_i32 : i32, i32
  }
}

module attributes {stable_mosaic.version = 11 : i64} {
  func.func @kernel(%arg0: i32, %arg1: memref<256x128xf32, #tpu.memory_space<vmem>>, %arg2: memref<128x128xf32, #tpu.memory_space<vmem>>, %arg3: memref<1x128xf32, #tpu.memory_space<vmem>>, %arg4: memref<128x128xf32, #tpu.memory_space<vmem>>, %arg5: memref<1x128xf32, #tpu.memory_space<vmem>>, %arg6: memref<128x128xf32, #tpu.memory_space<vmem>>, %arg7: memref<1x128xf32, #tpu.memory_space<vmem>>, %arg8: memref<128x32xf32, #tpu.memory_space<vmem>>, %arg9: memref<1x32xf32, #tpu.memory_space<vmem>>, %arg10: memref<256x8xf32, #tpu.memory_space<vmem>>) attributes {dimension_semantics = [#tpu.dimension_semantics<parallel>], iteration_bounds = array<i64: 2>, scalar_prefetch = 0 : i64, scratch_operands = 0 : i64, tpu.core_type = #tpu.core_type<tc>, window_params = [{transform_indices = @transform_0, window_bounds = array<i64: 256, 128>}, {pipeline_mode = #tpu.pipeline_mode<synchronous>, transform_indices = @transform_1, window_bounds = array<i64: 128, 128>}, {pipeline_mode = #tpu.pipeline_mode<synchronous>, transform_indices = @transform_2, window_bounds = array<i64: 1, 128>}, {pipeline_mode = #tpu.pipeline_mode<synchronous>, transform_indices = @transform_3, window_bounds = array<i64: 128, 128>}, {pipeline_mode = #tpu.pipeline_mode<synchronous>, transform_indices = @transform_4, window_bounds = array<i64: 1, 128>}, {pipeline_mode = #tpu.pipeline_mode<synchronous>, transform_indices = @transform_5, window_bounds = array<i64: 128, 128>}, {pipeline_mode = #tpu.pipeline_mode<synchronous>, transform_indices = @transform_6, window_bounds = array<i64: 1, 128>}, {pipeline_mode = #tpu.pipeline_mode<synchronous>, transform_indices = @transform_7, window_bounds = array<i64: 128, 32>}, {pipeline_mode = #tpu.pipeline_mode<synchronous>, transform_indices = @transform_8, window_bounds = array<i64: 1, 32>}, {transform_indices = @transform_9, window_bounds = array<i64: 256, 8>}]} {
    %c0 = arith.constant 0 : index
    %c0_0 = arith.constant 0 : index
    %0 = vector.load %arg1[%c0, %c0_0] : memref<256x128xf32, #tpu.memory_space<vmem>>, vector<256x128xf32>
    %c0_1 = arith.constant 0 : index
    %c0_2 = arith.constant 0 : index
    %1 = vector.load %arg2[%c0_1, %c0_2] : memref<128x128xf32, #tpu.memory_space<vmem>>, vector<128x128xf32>
    %cst = arith.constant dense<0.000000e+00> : vector<256x128xf32>
    %2 = tpu.matmul %0, %1, %cst {dimension_numbers = #tpu.dot_dimension_numbers<[1], [0], [0], [1], [0, 0, 1, 1], [], []>} : vector<256x128xf32>, vector<128x128xf32>, vector<256x128xf32> -> vector<256x128xf32>
    %3 = vector.extract_strided_slice %0 {offsets = [0, 104], sizes = [256, 1], strides = [1, 1]} : vector<256x128xf32> to vector<256x1xf32>
    %c0_3 = arith.constant 0 : index
    %c0_4 = arith.constant 0 : index
    %4 = vector.load %arg3[%c0_3, %c0_4] : memref<1x128xf32, #tpu.memory_space<vmem>>, vector<1x128xf32>
    %5 = vector.broadcast %3 : vector<256x1xf32> to vector<256x128xf32>
    %6 = vector.broadcast %4 : vector<1x128xf32> to vector<256x128xf32>
    %7 = arith.mulf %5, %6 : vector<256x128xf32>
    %8 = arith.mulf %2, %7 : vector<256x128xf32>
    %cst_5 = arith.constant -1.99999905 : f32
    %cst_6 = arith.constant 1.99999905 : f32
    %9 = vector.broadcast %cst_5 : f32 to vector<256x128xf32>
    %10 = arith.maximumf %9, %8 : vector<256x128xf32>
    %11 = vector.broadcast %cst_6 : f32 to vector<256x128xf32>
    %12 = arith.minimumf %11, %10 : vector<256x128xf32>
    %13 = math.absf %12 : vector<256x128xf32>
    %14 = arith.mulf %13, %13 : vector<256x128xf32>
    %cst_7 = arith.constant 5.000000e-01 : f32
    %15 = vector.broadcast %cst_7 : f32 to vector<256x128xf32>
    %16 = arith.mulf %15, %13 : vector<256x128xf32>
    %cst_8 = arith.constant 1.000000e+00 : f32
    %17 = vector.broadcast %cst_8 : f32 to vector<256x128xf32>
    %18 = arith.subf %16, %17 : vector<256x128xf32>
    %19 = arith.mulf %14, %18 : vector<256x128xf32>
    %cst_9 = arith.constant 0.666666686 : f32
    %20 = vector.broadcast %cst_9 : f32 to vector<256x128xf32>
    %21 = arith.addf %20, %19 : vector<256x128xf32>
    %cst_10 = arith.constant 2.000000e+00 : f32
    %22 = vector.broadcast %cst_10 : f32 to vector<256x128xf32>
    %23 = arith.subf %22, %13 : vector<256x128xf32>
    %24 = arith.mulf %23, %23 : vector<256x128xf32>
    %25 = arith.mulf %24, %23 : vector<256x128xf32>
    %cst_11 = arith.constant 0.166666672 : f32
    %26 = vector.broadcast %cst_11 : f32 to vector<256x128xf32>
    %27 = arith.mulf %25, %26 : vector<256x128xf32>
    %cst_12 = arith.constant 1.000000e+00 : f32
    %28 = vector.broadcast %cst_12 : f32 to vector<256x128xf32>
    %29 = arith.cmpf ole, %13, %28 : vector<256x128xf32>
    %30 = arith.select %29, %21, %27 : vector<256x128xi1>, vector<256x128xf32>
    %c64_i32 = arith.constant 64 : i32
    %31 = tpu.dynamic_rotate %30 by %c64_i32 dim 1 : vector<256x128xf32>, i32 -> vector<256x128xf32>
    %32 = arith.mulf %30, %31 : vector<256x128xf32>
    %33 = arith.mulf %0, %32 : vector<256x128xf32>
    %c0_13 = arith.constant 0 : index
    %c0_14 = arith.constant 0 : index
    %34 = vector.load %arg4[%c0_13, %c0_14] : memref<128x128xf32, #tpu.memory_space<vmem>>, vector<128x128xf32>
    %cst_15 = arith.constant dense<0.000000e+00> : vector<256x128xf32>
    %35 = tpu.matmul %33, %34, %cst_15 {dimension_numbers = #tpu.dot_dimension_numbers<[1], [0], [0], [1], [0, 0, 1, 1], [], []>} : vector<256x128xf32>, vector<128x128xf32>, vector<256x128xf32> -> vector<256x128xf32>
    %c0_16 = arith.constant 0 : index
    %c0_17 = arith.constant 0 : index
    %36 = vector.load %arg5[%c0_16, %c0_17] : memref<1x128xf32, #tpu.memory_space<vmem>>, vector<1x128xf32>
    %37 = vector.broadcast %36 : vector<1x128xf32> to vector<256x128xf32>
    %38 = arith.addf %35, %37 : vector<256x128xf32>
    %cst_18 = arith.constant 0.000000e+00 : f32
    %39 = vector.broadcast %cst_18 : f32 to vector<256x128xf32>
    %40 = arith.maximumf %38, %39 : vector<256x128xf32>
    %c0_19 = arith.constant 0 : index
    %c0_20 = arith.constant 0 : index
    %41 = vector.load %arg6[%c0_19, %c0_20] : memref<128x128xf32, #tpu.memory_space<vmem>>, vector<128x128xf32>
    %cst_21 = arith.constant dense<0.000000e+00> : vector<256x128xf32>
    %42 = tpu.matmul %40, %41, %cst_21 {dimension_numbers = #tpu.dot_dimension_numbers<[1], [0], [0], [1], [0, 0, 1, 1], [], []>} : vector<256x128xf32>, vector<128x128xf32>, vector<256x128xf32> -> vector<256x128xf32>
    %c0_22 = arith.constant 0 : index
    %c0_23 = arith.constant 0 : index
    %43 = vector.load %arg7[%c0_22, %c0_23] : memref<1x128xf32, #tpu.memory_space<vmem>>, vector<1x128xf32>
    %44 = vector.broadcast %43 : vector<1x128xf32> to vector<256x128xf32>
    %45 = arith.addf %42, %44 : vector<256x128xf32>
    %cst_24 = arith.constant 0.000000e+00 : f32
    %46 = vector.broadcast %cst_24 : f32 to vector<256x128xf32>
    %47 = arith.maximumf %45, %46 : vector<256x128xf32>
    %c0_25 = arith.constant 0 : index
    %c0_26 = arith.constant 0 : index
    %48 = vector.load %arg8[%c0_25, %c0_26] : memref<128x32xf32, #tpu.memory_space<vmem>>, vector<128x32xf32>
    %cst_27 = arith.constant dense<0.000000e+00> : vector<256x32xf32>
    %49 = tpu.matmul %47, %48, %cst_27 {dimension_numbers = #tpu.dot_dimension_numbers<[1], [0], [0], [1], [0, 0, 1, 1], [], []>} : vector<256x128xf32>, vector<128x32xf32>, vector<256x32xf32> -> vector<256x32xf32>
    %c0_28 = arith.constant 0 : index
    %c0_29 = arith.constant 0 : index
    %50 = vector.load %arg9[%c0_28, %c0_29] : memref<1x32xf32, #tpu.memory_space<vmem>>, vector<1x32xf32>
    %51 = vector.broadcast %50 : vector<1x32xf32> to vector<256x32xf32>
    %52 = arith.addf %49, %51 : vector<256x32xf32>
    %53 = vector.extract_strided_slice %0 {offsets = [0, 105], sizes = [256, 1], strides = [1, 1]} : vector<256x128xf32> to vector<256x1xf32>
    %54 = vector.extract_strided_slice %0 {offsets = [0, 106], sizes = [256, 1], strides = [1, 1]} : vector<256x128xf32> to vector<256x1xf32>
    %55 = vector.extract_strided_slice %0 {offsets = [0, 107], sizes = [256, 1], strides = [1, 1]} : vector<256x128xf32> to vector<256x1xf32>
    %56 = vector.extract_strided_slice %0 {offsets = [0, 108], sizes = [256, 1], strides = [1, 1]} : vector<256x128xf32> to vector<256x1xf32>
    %57 = arith.addf %53, %54 : vector<256x1xf32>
    %58 = arith.addf %57, %55 : vector<256x1xf32>
    %59 = arith.addf %58, %56 : vector<256x1xf32>
    %60 = tpu.reciprocal %59 {approx = true} : vector<256x1xf32> -> vector<256x1xf32>
    %61 = vector.extract_strided_slice %52 {offsets = [0, 0], sizes = [256, 8], strides = [1, 1]} : vector<256x32xf32> to vector<256x8xf32>
    %62 = arith.mulf %56, %60 : vector<256x1xf32>
    %63 = vector.broadcast %62 : vector<256x1xf32> to vector<256x8xf32>
    %64 = arith.mulf %61, %63 : vector<256x8xf32>
    %65 = vector.extract_strided_slice %52 {offsets = [0, 8], sizes = [256, 8], strides = [1, 1]} : vector<256x32xf32> to vector<256x8xf32>
    %66 = arith.mulf %55, %60 : vector<256x1xf32>
    %67 = vector.broadcast %66 : vector<256x1xf32> to vector<256x8xf32>
    %68 = arith.mulf %65, %67 : vector<256x8xf32>
    %69 = arith.addf %64, %68 : vector<256x8xf32>
    %70 = vector.extract_strided_slice %52 {offsets = [0, 16], sizes = [256, 8], strides = [1, 1]} : vector<256x32xf32> to vector<256x8xf32>
    %71 = arith.mulf %54, %60 : vector<256x1xf32>
    %72 = vector.broadcast %71 : vector<256x1xf32> to vector<256x8xf32>
    %73 = arith.mulf %70, %72 : vector<256x8xf32>
    %74 = arith.addf %69, %73 : vector<256x8xf32>
    %75 = vector.extract_strided_slice %52 {offsets = [0, 24], sizes = [256, 8], strides = [1, 1]} : vector<256x32xf32> to vector<256x8xf32>
    %76 = arith.mulf %53, %60 : vector<256x1xf32>
    %77 = vector.broadcast %76 : vector<256x1xf32> to vector<256x8xf32>
    %78 = arith.mulf %75, %77 : vector<256x8xf32>
    %79 = arith.addf %74, %78 : vector<256x8xf32>
    %c0_30 = arith.constant 0 : index
    %c0_31 = arith.constant 0 : index
    %80 = vector.load %arg10[%c0_30, %c0_31] : memref<256x8xf32, #tpu.memory_space<vmem>>, vector<256x8xf32>
    tpu.vector_store %arg10[%c0_30, %c0_31], %79 {strides = array<i32>} : memref<256x8xf32, #tpu.memory_space<vmem>>, vector<256x8xf32>,
    return
  }
  func.func @transform_0(%arg0: i32) -> (i32, i32) {
    %c0_i32 = arith.constant 0 : i32
    %c0_i32_0 = arith.constant 0 : i32
    return %arg0, %c0_i32 : i32, i32
  }
  func.func @transform_1(%arg0: i32) -> (i32, i32) {
    %c0_i32 = arith.constant 0 : i32
    %c0_i32_0 = arith.constant 0 : i32
    %c0_i32_1 = arith.constant 0 : i32
    return %c0_i32, %c0_i32_0 : i32, i32
  }
  func.func @transform_2(%arg0: i32) -> (i32, i32) {
    %c0_i32 = arith.constant 0 : i32
    %c0_i32_0 = arith.constant 0 : i32
    %c0_i32_1 = arith.constant 0 : i32
    return %c0_i32, %c0_i32_0 : i32, i32
  }
  func.func @transform_3(%arg0: i32) -> (i32, i32) {
    %c0_i32 = arith.constant 0 : i32
    %c0_i32_0 = arith.constant 0 : i32
    %c0_i32_1 = arith.constant 0 : i32
    return %c0_i32, %c0_i32_0 : i32, i32
  }
  func.func @transform_4(%arg0: i32) -> (i32, i32) {
    %c0_i32 = arith.constant 0 : i32
    %c0_i32_0 = arith.constant 0 : i32
    %c0_i32_1 = arith.constant 0 : i32
    return %c0_i32, %c0_i32_0 : i32, i32
  }
  func.func @transform_5(%arg0: i32) -> (i32, i32) {
    %c0_i32 = arith.constant 0 : i32
    %c0_i32_0 = arith.constant 0 : i32
    %c0_i32_1 = arith.constant 0 : i32
    return %c0_i32, %c0_i32_0 : i32, i32
  }
  func.func @transform_6(%arg0: i32) -> (i32, i32) {
    %c0_i32 = arith.constant 0 : i32
    %c0_i32_0 = arith.constant 0 : i32
    %c0_i32_1 = arith.constant 0 : i32
    return %c0_i32, %c0_i32_0 : i32, i32
  }
  func.func @transform_7(%arg0: i32) -> (i32, i32) {
    %c0_i32 = arith.constant 0 : i32
    %c0_i32_0 = arith.constant 0 : i32
    %c0_i32_1 = arith.constant 0 : i32
    return %c0_i32, %c0_i32_0 : i32, i32
  }
  func.func @transform_8(%arg0: i32) -> (i32, i32) {
    %c0_i32 = arith.constant 0 : i32
    %c0_i32_0 = arith.constant 0 : i32
    %c0_i32_1 = arith.constant 0 : i32
    return %c0_i32, %c0_i32_0 : i32, i32
  }
  func.func @transform_9(%arg0: i32) -> (i32, i32) {
    %c0_i32 = arith.constant 0 : i32
    %c0_i32_0 = arith.constant 0 : i32
    return %arg0, %c0_i32 : i32, i32
  }
}

</mosaic_0001>

<bundles_post_ra>
// kernel: _lambda_.3
= control target key start
LH: loop header
LB: loop body
LE: loop exit
PB: predicated region body
PF: predicated region fallthrough
CT: control target
= control target key end

     0   :  { %s813_s12 = smov 0   ;;  %s1018_s0 = inlined_call_operand.vmem [shape: f32[512,27], index: 0, kind: input, shape index: {}]   ;;  %s1019_s1 = inlined_call_operand.vmem [shape: f32[27,8], index: 1, kind: input, shape index: {}]   ;;  %s1020_s2 = inlined_call_operand.vmem [shape: f32[1,8], index: 2, kind: input, shape index: {}]   ;;  %s1021_s3 = inlined_call_operand.vmem [shape: f32[512,8], index: 3, kind: output, shape index: {}]  }
   0x1 LB: > { %s632_s13 = sadd.s32 4294967295, %s791_s12   ;;  %p636_p0 = scmp.ge.s32.totalorder %s791_s12, 1  ;;  %s791_s12 = sphi %s813_s12, %s13_s12  }
   0x2   : > { %p138_p1 = scmp.lt.s32.totalorder %s791_s12, 3 }
   0x4   : > { %p139_p2 = pnand %p636_p0, %p138_p1 }
   0x5   : > { %s637_s18 = sshll.u32 (!%p139_p2), %s632_s13, 5 }
   0x6   : > { %142 = sbr.rel (%p139_p2) target bundleno = 247 (0xf7), region = 32  ;;  %p163_p3 = scmp.lt.s32.totalorder (!%p139_p2), %s637_s18, 63 }
   0xb   : > { %v209_v0 = vld [vmem:[%s1019_s1 + $0x18] sm:$0x7]  ;;  %vm314_vm0 = vcmask 1042432   ;;  %v208_v1 = vld [vmem:[%s1019_s1 + $0x10] sm:$0xff]  ;;  %v207_v2 = vld [vmem:[%s1019_s1 + $0x8] sm:$0xff]  ;;  %s1023_s18 = smov (!%p163_p3, %s637_s18), 63 }
   0xc   : > { %713 = vmatprep.subr.msk.mxu0 %vm314_vm0, %v209_v0  ;;  %769 = vmatprep.subr.msk.mxu1 %vm314_vm0, %v209_v0  ;;  %v206_v3 = vld [vmem:[%s1019_s1] sm:$0xff]  ;;  %s638_s23 = sshll.u32 %s1023_s18, 3  ;;  %vm217_vm1 = vcmask 220160   ;;  %vm543_vm2 = vcmask 64512  }
   0xd   : > { %714 = vmatpush3.msk.msra.mxu0 %vm314_vm0, %v209_v0  ;;  %773 = vmatpush3.msk.msra.mxu1 %vm314_vm0, %v209_v0  ;;  %s841_s26 = scalar_lea.vmem %s1018_s0, %s638_s23  ;;  %v910_v36 = vld [vmem:[%s1020_s2] ss:$0 sm:$0xff]  ;;  %s917_s4 = scalar_lea.vmem %s1021_s3, %s638_s23 }
   0xe   : > { %715 = vmatprep.subr.mxu0 %v208_v1  ;;  %770 = vmatprep.subr.mxu1 %v208_v1  ;;  %v174_v4 = vld [vmem:[%s841_s26] sm:$0xff]  ;;  %v175_v6 = vld [vmem:[%s841_s26 + $0x8] sm:$0xff]  ;;  %v176_v8 = vld [vmem:[%s841_s26 + $0x10] sm:$0xff] }
   0xf   : > { %716 = vmatpush3.msra.mxu0 %v208_v1  ;;  %774 = vmatpush3.msra.mxu1 %v208_v1  ;;  %v190_v5 = vld [vmem:[%s841_s26 + $0x80] sm:$0xff]  ;;  %v191_v7 = vld [vmem:[%s841_s26 + $0x88] sm:$0xff]  ;;  %v192_v9 = vld [vmem:[%s841_s26 + $0x90] sm:$0xff] }
  0x10   : > { %717 = vmatprep.subr.mxu0 %v207_v2  ;;  %771 = vmatprep.subr.mxu1 %v207_v2  ;;  %v177_v10 = vld [vmem:[%s841_s26 + $0x18] sm:$0xff]  ;;  %v178_v12 = vld [vmem:[%s841_s26 + $0x20] sm:$0xff]  ;;  %v179_v14 = vld [vmem:[%s841_s26 + $0x28] sm:$0xff] }
  0x11   : > { %718 = vmatpush3.msra.mxu0 %v207_v2  ;;  %775 = vmatpush3.msra.mxu1 %v207_v2  ;;  %v193_v11 = vld [vmem:[%s841_s26 + $0x98] sm:$0xff]  ;;  %v194_v13 = vld [vmem:[%s841_s26 + $0xa0] sm:$0xff]  ;;  %v195_v15 = vld [vmem:[%s841_s26 + $0xa8] sm:$0xff] }
  0x12   : > { %719 = vmatprep.subr.mxu0 %v206_v3  ;;  %772 = vmatprep.subr.mxu1 %v206_v3  ;;  %v180_v16 = vld [vmem:[%s841_s26 + $0x30] sm:$0xff]  ;;  %v181_v18 = vld [vmem:[%s841_s26 + $0x38] sm:$0xff]  ;;  %v182_v20 = vld [vmem:[%s841_s26 + $0x40] sm:$0xff] }
  0x13   : > { %720 = vmatpush3.msra.mxu0 %v206_v3  ;;  %776 = vmatpush3.msra.mxu1 %v206_v3  ;;  %v196_v17 = vld [vmem:[%s841_s26 + $0xb0] sm:$0xff]  ;;  %v197_v19 = vld [vmem:[%s841_s26 + $0xb8] sm:$0xff]  ;;  %v198_v21 = vld [vmem:[%s841_s26 + $0xc0] sm:$0xff] }
  0x14   : > { %721 = vmatprep.mubr.msk.f32.mxu0 %vm217_vm1, %v174_v4  ;;  %745 = vmatprep.mubr.msk.f32.mxu1 %vm217_vm1, %v190_v5  ;;  %v183_v22 = vld [vmem:[%s841_s26 + $0x48] sm:$0xff]  ;;  %v184_v24 = vld [vmem:[%s841_s26 + $0x50] sm:$0xff]  ;;  %v185_v26 = vld [vmem:[%s841_s26 + $0x58] sm:$0xff] }
  0x15   : > { %722 = vmatmul.mubr.msk.f32.vlgmr.msra.gmra.mxu0 %vm217_vm1, %v175_v6  ;;  %746 = vmatmul.mubr.msk.f32.vlgmr.msra.gmra.mxu1 %vm217_vm1, %v191_v7  ;;  %v199_v23 = vld [vmem:[%s841_s26 + $0xc8] sm:$0xff]  ;;  %v200_v25 = vld [vmem:[%s841_s26 + $0xd0] sm:$0xff]  ;;  %v201_v27 = vld [vmem:[%s841_s26 + $0xd8] sm:$0xff] }
  0x16   : > { %724 = vmatprep.mubr.msk.f32.mxu0 %vm217_vm1, %v176_v8  ;;  %748 = vmatprep.mubr.msk.f32.mxu1 %vm217_vm1, %v192_v9  ;;  %v186_v28 = vld [vmem:[%s841_s26 + $0x60] sm:$0xff]  ;;  %v187_v30 = vld [vmem:[%s841_s26 + $0x68] sm:$0xff]  ;;  %v188_v32 = vld [vmem:[%s841_s26 + $0x70] sm:$0xff] }
  0x17   : > { %v202_v29 = vld [vmem:[%s841_s26 + $0xe0] sm:$0xff]  ;;  %v203_v31 = vld [vmem:[%s841_s26 + $0xe8] sm:$0xff]  ;;  %v204_v33 = vld [vmem:[%s841_s26 + $0xf0] sm:$0xff] }
  0x18   : > { %v189_v34 = vld [vmem:[%s841_s26 + $0x78] sm:$0xff] }
  0x19   : > { %725 = vmatmul.mubr.msk.f32.gmra.mxu0 %vm217_vm1, %v177_v10  ;;  %749 = vmatmul.mubr.msk.f32.gmra.mxu1 %vm217_vm1, %v193_v11  ;;  %v205_v35 = vld [vmem:[%s841_s26 + $0xf8] sm:$0xff] }
  0x1a   : > { %727 = vmatprep.mubr.msk.f32.mxu0 %vm217_vm1, %v178_v12  ;;  %751 = vmatprep.mubr.msk.f32.mxu1 %vm217_vm1, %v194_v13 }
  0x1d   : > { %728 = vmatmul.mubr.msk.f32.gmra.mxu0 %vm217_vm1, %v179_v14  ;;  %752 = vmatmul.mubr.msk.f32.gmra.mxu1 %vm217_vm1, %v195_v15 }
  0x1e   : > { %730 = vmatprep.mubr.msk.f32.mxu0 %vm217_vm1, %v180_v16  ;;  %754 = vmatprep.mubr.msk.f32.mxu1 %vm217_vm1, %v196_v17 }
  0x21   : > { %731 = vmatmul.mubr.msk.f32.gmra.mxu0 %vm217_vm1, %v181_v18  ;;  %755 = vmatmul.mubr.msk.f32.gmra.mxu1 %vm217_vm1, %v197_v19 }
  0x22   : > { %733 = vmatprep.mubr.msk.f32.mxu0 %vm217_vm1, %v182_v20  ;;  %757 = vmatprep.mubr.msk.f32.mxu1 %vm217_vm1, %v198_v21 }
  0x25   : > { %734 = vmatmul.mubr.msk.f32.gmra.mxu0 %vm217_vm1, %v183_v22  ;;  %758 = vmatmul.mubr.msk.f32.gmra.mxu1 %vm217_vm1, %v199_v23 }
  0x26   : > { %736 = vmatprep.mubr.msk.f32.mxu0 %vm217_vm1, %v184_v24  ;;  %760 = vmatprep.mubr.msk.f32.mxu1 %vm217_vm1, %v200_v25 }
  0x29   : > { %737 = vmatmul.mubr.msk.f32.gmra.mxu0 %vm217_vm1, %v185_v26  ;;  %761 = vmatmul.mubr.msk.f32.gmra.mxu1 %vm217_vm1, %v201_v27 }
  0x2a   : > { %739 = vmatprep.mubr.msk.f32.mxu0 %vm217_vm1, %v186_v28  ;;  %763 = vmatprep.mubr.msk.f32.mxu1 %vm217_vm1, %v202_v29 }
  0x2d   : > { %740 = vmatmul.mubr.msk.f32.gmra.mxu0 %vm217_vm1, %v187_v30  ;;  %764 = vmatmul.mubr.msk.f32.gmra.mxu1 %vm217_vm1, %v203_v31 }
  0x2e   : > { %742 = vmatprep.mubr.msk.f32.mxu0 %vm217_vm1, %v188_v32  ;;  %766 = vmatprep.mubr.msk.f32.mxu1 %vm217_vm1, %v204_v33 }
  0x31   : > { %743 = vmatmul.mubr.msk.f32.gmra.mxu0 %vm217_vm1, %v189_v34  ;;  %767 = vmatmul.mubr.msk.f32.gmra.mxu1 %vm217_vm1, %v205_v35 }
  0xd5   : > { %v723_v37 = vpop.f32.mrf.mxu0  ;;  %v747_v38 = vpop.f32.mrf.mxu1 }
  0xd6   : > { %v390_v39 = vadd.f32 %v723_v37, %v910_v36  ;;  %v470_v40 = vadd.f32 %v747_v38, %v910_v36 }
  0xd7   : > { %v384_v41 = vpop.f32.mrf.mxu0  ;;  %v464_v42 = vpop.f32.mrf.mxu1 }
  0xd8   : > { %545 = vst.msk [vmem:[%s917_s4 + $0x8] sm:$0xff] %vm543_vm2, %v390_v39  ;;  %561 = vst.msk [vmem:[%s917_s4 + $0x88] sm:$0xff] %vm543_vm2, %v470_v40  ;;  %v385_v43 = vadd.f32 %v910_v36, %v384_v41  ;;  %v465_v44 = vadd.f32 %v910_v36, %v464_v42 }
  0xd9   : > { %v726_v45 = vpop.f32.mrf.mxu0  ;;  %v750_v46 = vpop.f32.mrf.mxu1 }
  0xda   : > { %544 = vst.msk [vmem:[%s917_s4] sm:$0xff] %vm543_vm2, %v385_v43  ;;  %560 = vst.msk [vmem:[%s917_s4 + $0x80] sm:$0xff] %vm543_vm2, %v465_v44  ;;  %v400_v47 = vadd.f32 %v726_v45, %v910_v36  ;;  %v480_v48 = vadd.f32 %v750_v46, %v910_v36 }
  0xdb   : > { %v394_v49 = vpop.f32.mrf.mxu0  ;;  %v474_v50 = vpop.f32.mrf.mxu1 }
  0xdc   : > { %547 = vst.msk [vmem:[%s917_s4 + $0x18] sm:$0xff] %vm543_vm2, %v400_v47  ;;  %563 = vst.msk [vmem:[%s917_s4 + $0x98] sm:$0xff] %vm543_vm2, %v480_v48  ;;  %v395_v51 = vadd.f32 %v910_v36, %v394_v49  ;;  %v475_v52 = vadd.f32 %v910_v36, %v474_v50 }
  0xdd   : > { %v729_v53 = vpop.f32.mrf.mxu0  ;;  %v753_v54 = vpop.f32.mrf.mxu1 }
  0xde   : > { %546 = vst.msk [vmem:[%s917_s4 + $0x10] sm:$0xff] %vm543_vm2, %v395_v51  ;;  %562 = vst.msk [vmem:[%s917_s4 + $0x90] sm:$0xff] %vm543_vm2, %v475_v52  ;;  %v410_v55 = vadd.f32 %v729_v53, %v910_v36  ;;  %v490_v56 = vadd.f32 %v753_v54, %v910_v36 }
  0xdf   : > { %v404_v57 = vpop.f32.mrf.mxu0  ;;  %v484_v58 = vpop.f32.mrf.mxu1 }
  0xe0   : > { %549 = vst.msk [vmem:[%s917_s4 + $0x28] sm:$0xff] %vm543_vm2, %v410_v55  ;;  %565 = vst.msk [vmem:[%s917_s4 + $0xa8] sm:$0xff] %vm543_vm2, %v490_v56  ;;  %v405_v59 = vadd.f32 %v910_v36, %v404_v57  ;;  %v485_v60 = vadd.f32 %v910_v36, %v484_v58 }
  0xe1   : > { %v732_v61 = vpop.f32.mrf.mxu0  ;;  %v756_v62 = vpop.f32.mrf.mxu1 }
  0xe2   : > { %548 = vst.msk [vmem:[%s917_s4 + $0x20] sm:$0xff] %vm543_vm2, %v405_v59  ;;  %564 = vst.msk [vmem:[%s917_s4 + $0xa0] sm:$0xff] %vm543_vm2, %v485_v60  ;;  %v420_v63 = vadd.f32 %v732_v61, %v910_v36  ;;  %v500_v0 = vadd.f32 %v756_v62, %v910_v36 }
  0xe3   : > { %v414_v1 = vpop.f32.mrf.mxu0  ;;  %v494_v2 = vpop.f32.mrf.mxu1 }
  0xe4   : > { %551 = vst.msk [vmem:[%s917_s4 + $0x38] sm:$0xff] %vm543_vm2, %v420_v63  ;;  %567 = vst.msk [vmem:[%s917_s4 + $0xb8] sm:$0xff] %vm543_vm2, %v500_v0  ;;  %v415_v3 = vadd.f32 %v910_v36, %v414_v1  ;;  %v495_v4 = vadd.f32 %v910_v36, %v494_v2 }
  0xe5   : > { %v735_v5 = vpop.f32.mrf.mxu0  ;;  %v759_v6 = vpop.f32.mrf.mxu1 }
  0xe6   : > { %550 = vst.msk [vmem:[%s917_s4 + $0x30] sm:$0xff] %vm543_vm2, %v415_v3  ;;  %566 = vst.msk [vmem:[%s917_s4 + $0xb0] sm:$0xff] %vm543_vm2, %v495_v4  ;;  %v430_v7 = vadd.f32 %v735_v5, %v910_v36  ;;  %v510_v8 = vadd.f32 %v759_v6, %v910_v36 }
  0xe7   : > { %v424_v9 = vpop.f32.mrf.mxu0  ;;  %v504_v10 = vpop.f32.mrf.mxu1 }
  0xe8   : > { %553 = vst.msk [vmem:[%s917_s4 + $0x48] sm:$0xff] %vm543_vm2, %v430_v7  ;;  %569 = vst.msk [vmem:[%s917_s4 + $0xc8] sm:$0xff] %vm543_vm2, %v510_v8  ;;  %v425_v11 = vadd.f32 %v910_v36, %v424_v9  ;;  %v505_v12 = vadd.f32 %v910_v36, %v504_v10 }
  0xe9   : > { %v738_v13 = vpop.f32.mrf.mxu0  ;;  %v762_v14 = vpop.f32.mrf.mxu1 }
  0xea   : > { %552 = vst.msk [vmem:[%s917_s4 + $0x40] sm:$0xff] %vm543_vm2, %v425_v11  ;;  %568 = vst.msk [vmem:[%s917_s4 + $0xc0] sm:$0xff] %vm543_vm2, %v505_v12  ;;  %v440_v15 = vadd.f32 %v738_v13, %v910_v36  ;;  %v520_v16 = vadd.f32 %v762_v14, %v910_v36 }
  0xeb   : > { %v434_v17 = vpop.f32.mrf.mxu0  ;;  %v514_v18 = vpop.f32.mrf.mxu1 }
  0xec   : > { %555 = vst.msk [vmem:[%s917_s4 + $0x58] sm:$0xff] %vm543_vm2, %v440_v15  ;;  %571 = vst.msk [vmem:[%s917_s4 + $0xd8] sm:$0xff] %vm543_vm2, %v520_v16  ;;  %v435_v19 = vadd.f32 %v910_v36, %v434_v17  ;;  %v515_v20 = vadd.f32 %v910_v36, %v514_v18 }
  0xed   : > { %v741_v21 = vpop.f32.mrf.mxu0  ;;  %v765_v22 = vpop.f32.mrf.mxu1 }
  0xee   : > { %554 = vst.msk [vmem:[%s917_s4 + $0x50] sm:$0xff] %vm543_vm2, %v435_v19  ;;  %570 = vst.msk [vmem:[%s917_s4 + $0xd0] sm:$0xff] %vm543_vm2, %v515_v20  ;;  %v450_v23 = vadd.f32 %v741_v21, %v910_v36  ;;  %v530_v24 = vadd.f32 %v765_v22, %v910_v36 }
  0xef   : > { %v444_v25 = vpop.f32.mrf.mxu0  ;;  %v524_v26 = vpop.f32.mrf.mxu1 }
  0xf0   : > { %557 = vst.msk [vmem:[%s917_s4 + $0x68] sm:$0xff] %vm543_vm2, %v450_v23  ;;  %573 = vst.msk [vmem:[%s917_s4 + $0xe8] sm:$0xff] %vm543_vm2, %v530_v24  ;;  %v445_v27 = vadd.f32 %v910_v36, %v444_v25  ;;  %v525_v28 = vadd.f32 %v910_v36, %v524_v26 }
  0xf1   : > { %v744_v29 = vpop.f32.mrf.mxu0  ;;  %v768_v30 = vpop.f32.mrf.mxu1 }
  0xf2   : > { %556 = vst.msk [vmem:[%s917_s4 + $0x60] sm:$0xff] %vm543_vm2, %v445_v27  ;;  %572 = vst.msk [vmem:[%s917_s4 + $0xe0] sm:$0xff] %vm543_vm2, %v525_v28  ;;  %v460_v31 = vadd.f32 %v744_v29, %v910_v36  ;;  %v540_v32 = vadd.f32 %v768_v30, %v910_v36 }
  0xf3   : > { %v454_v33 = vpop.f32.mrf.mxu0  ;;  %v534_v34 = vpop.f32.mrf.mxu1 }
  0xf4   : > { %559 = vst.msk [vmem:[%s917_s4 + $0x78] sm:$0xff] %vm543_vm2, %v460_v31  ;;  %575 = vst.msk [vmem:[%s917_s4 + $0xf8] sm:$0xff] %vm543_vm2, %v540_v32  ;;  %v455_v35 = vadd.f32 %v910_v36, %v454_v33  ;;  %v535_v37 = vadd.f32 %v910_v36, %v534_v34 }
  0xf6   : > { %558 = vst.msk [vmem:[%s917_s4 + $0x70] sm:$0xff] %vm543_vm2, %v455_v35  ;;  %574 = vst.msk [vmem:[%s917_s4 + $0xf0] sm:$0xff] %vm543_vm2, %v535_v37 }
  0xf7 PF: > { %s13_s12 = sadd.s32 1, %s791_s12  }
  0xf8   : > { %p10_p4 = scmp.ge.s32.totalorder %s13_s12, 4  }
  0xfa   :  { %12 = sbr.rel (!%p10_p4) target bundleno = 1 (0x1), region = 62 }

// kernel: _lambda_.4
= control target key start
LH: loop header
LB: loop body
LE: loop exit
PB: predicated region body
PF: predicated region fallthrough
CT: control target
= control target key end

     0   :  { %s838_s12 = smov 0   ;;  %s1058_s0 = inlined_call_operand.vmem [shape: f32[512,72], index: 0, kind: input, shape index: {}]   ;;  %s1059_s1 = inlined_call_operand.vmem [shape: f32[72,24], index: 1, kind: input, shape index: {}]   ;;  %s1060_s2 = inlined_call_operand.vmem [shape: f32[1,24], index: 2, kind: input, shape index: {}]   ;;  %s1061_s3 = inlined_call_operand.vmem [shape: f32[512,24], index: 3, kind: output, shape index: {}]  }
   0x1 LB: > { %s633_s13 = sadd.s32 4294967295, %s816_s12   ;;  %p637_p0 = scmp.ge.s32.totalorder %s816_s12, 1  ;;  %s816_s12 = sphi %s838_s12, %s13_s12  }
   0x2   : > { %p138_p1 = scmp.lt.s32.totalorder %s816_s12, 3 }
   0x4   : > { %p139_p2 = pnand %p637_p0, %p138_p1 }
   0x5   : > { %s638_s18 = sshll.u32 (!%p139_p2), %s633_s13, 5 }
   0x6   : > { %142 = sbr.rel (%p139_p2) target bundleno = 257 (0x101), region = 32  ;;  %p163_p3 = scmp.lt.s32.totalorder (!%p139_p2), %s638_s18, 63 }
   0xb   : > { %v214_v0 = vld [vmem:[%s1059_s1 + $0x40] sm:$0xff]  ;;  %v213_v1 = vld [vmem:[%s1059_s1 + $0x38] sm:$0xff]  ;;  %v212_v2 = vld [vmem:[%s1059_s1 + $0x30] sm:$0xff]  ;;  %s1063_s18 = smov (!%p163_p3, %s638_s18), 63  ;;  %vm222_vm0 = vcmask 588800   ;;  %vm544_vm1 = vcmask 195584  }
   0xc   : > { %718 = vmatprep.subr.mxu0 %v214_v0  ;;  %784 = vmatprep.subr.mxu1 %v214_v0  ;;  %v211_v3 = vld [vmem:[%s1059_s1 + $0x28] sm:$0xff]  ;;  %v210_v4 = vld [vmem:[%s1059_s1 + $0x20] sm:$0xff]  ;;  %v209_v5 = vld [vmem:[%s1059_s1 + $0x18] sm:$0xff]  ;;  %s639_s29 = sshll.u32 %s1063_s18, 3 }
   0xd   : > { %719 = vmatpush3.msra.mxu0 %v214_v0  ;;  %793 = vmatpush3.msra.mxu1 %v214_v0  ;;  %v208_v6 = vld [vmem:[%s1059_s1 + $0x10] sm:$0xff]  ;;  %v207_v7 = vld [vmem:[%s1059_s1 + $0x8] sm:$0xff]  ;;  %s878_s7 = scalar_lea.vmem %s1058_s0, %s639_s29  ;;  %v206_v8 = vld [vmem:[%s1059_s1] sm:$0xff]  ;;  %s957_s15 = scalar_lea.vmem %s1061_s3, %s639_s29 }
   0xe   : > { %720 = vmatprep.subr.mxu0 %v213_v1  ;;  %785 = vmatprep.subr.mxu1 %v213_v1  ;;  %v174_v9 = vld [vmem:[%s878_s7] sm:$0xff]  ;;  %v175_v11 = vld [vmem:[%s878_s7 + $0x8] sm:$0xff]  ;;  %v176_v13 = vld [vmem:[%s878_s7 + $0x10] sm:$0xff] }
   0xf   : > { %721 = vmatpush3.msra.mxu0 %v213_v1  ;;  %794 = vmatpush3.msra.mxu1 %v213_v1  ;;  %v190_v10 = vld [vmem:[%s878_s7 + $0x80] sm:$0xff]  ;;  %v191_v12 = vld [vmem:[%s878_s7 + $0x88] sm:$0xff]  ;;  %v192_v14 = vld [vmem:[%s878_s7 + $0x90] sm:$0xff] }
  0x10   : > { %722 = vmatprep.subr.mxu0 %v212_v2  ;;  %786 = vmatprep.subr.mxu1 %v212_v2  ;;  %v177_v15 = vld [vmem:[%s878_s7 + $0x18] sm:$0xff]  ;;  %v178_v17 = vld [vmem:[%s878_s7 + $0x20] sm:$0xff]  ;;  %v179_v19 = vld [vmem:[%s878_s7 + $0x28] sm:$0xff] }
  0x11   : > { %723 = vmatpush3.msra.mxu0 %v212_v2  ;;  %795 = vmatpush3.msra.mxu1 %v212_v2  ;;  %v193_v16 = vld [vmem:[%s878_s7 + $0x98] sm:$0xff]  ;;  %v194_v18 = vld [vmem:[%s878_s7 + $0xa0] sm:$0xff]  ;;  %v195_v20 = vld [vmem:[%s878_s7 + $0xa8] sm:$0xff] }
  0x12   : > { %724 = vmatprep.subr.mxu0 %v211_v3  ;;  %787 = vmatprep.subr.mxu1 %v211_v3  ;;  %v180_v21 = vld [vmem:[%s878_s7 + $0x30] sm:$0xff]  ;;  %v181_v23 = vld [vmem:[%s878_s7 + $0x38] sm:$0xff]  ;;  %v182_v25 = vld [vmem:[%s878_s7 + $0x40] sm:$0xff] }
  0x13   : > { %725 = vmatpush3.msra.mxu0 %v211_v3  ;;  %796 = vmatpush3.msra.mxu1 %v211_v3  ;;  %v196_v22 = vld [vmem:[%s878_s7 + $0xb0] sm:$0xff]  ;;  %v197_v24 = vld [vmem:[%s878_s7 + $0xb8] sm:$0xff]  ;;  %v198_v26 = vld [vmem:[%s878_s7 + $0xc0] sm:$0xff] }
  0x14   : > { %726 = vmatprep.subr.mxu0 %v210_v4  ;;  %788 = vmatprep.subr.mxu1 %v210_v4  ;;  %v183_v27 = vld [vmem:[%s878_s7 + $0x48] sm:$0xff]  ;;  %v184_v29 = vld [vmem:[%s878_s7 + $0x50] sm:$0xff]  ;;  %v185_v31 = vld [vmem:[%s878_s7 + $0x58] sm:$0xff] }
  0x15   : > { %727 = vmatpush3.msra.mxu0 %v210_v4  ;;  %797 = vmatpush3.msra.mxu1 %v210_v4  ;;  %v199_v28 = vld [vmem:[%s878_s7 + $0xc8] sm:$0xff]  ;;  %v200_v30 = vld [vmem:[%s878_s7 + $0xd0] sm:$0xff]  ;;  %v201_v32 = vld [vmem:[%s878_s7 + $0xd8] sm:$0xff] }
  0x16   : > { %728 = vmatprep.subr.mxu0 %v209_v5  ;;  %789 = vmatprep.subr.mxu1 %v209_v5  ;;  %v186_v33 = vld [vmem:[%s878_s7 + $0x60] sm:$0xff]  ;;  %v187_v35 = vld [vmem:[%s878_s7 + $0x68] sm:$0xff]  ;;  %v188_v37 = vld [vmem:[%s878_s7 + $0x70] sm:$0xff] }
  0x17   : > { %729 = vmatpush3.msra.mxu0 %v209_v5  ;;  %798 = vmatpush3.msra.mxu1 %v209_v5  ;;  %v202_v34 = vld [vmem:[%s878_s7 + $0xe0] sm:$0xff]  ;;  %v203_v36 = vld [vmem:[%s878_s7 + $0xe8] sm:$0xff]  ;;  %v204_v38 = vld [vmem:[%s878_s7 + $0xf0] sm:$0xff] }
  0x18   : > { %730 = vmatprep.subr.mxu0 %v208_v6  ;;  %790 = vmatprep.subr.mxu1 %v208_v6  ;;  %v189_v39 = vld [vmem:[%s878_s7 + $0x78] sm:$0xff]  ;;  %v950_v41 = vld [vmem:[%s1060_s2] ss:$0 sm:$0xff] }
  0x19   : > { %731 = vmatpush3.msra.mxu0 %v208_v6  ;;  %799 = vmatpush3.msra.mxu1 %v208_v6  ;;  %v205_v40 = vld [vmem:[%s878_s7 + $0xf8] sm:$0xff] }
  0x1a   : > { %732 = vmatprep.subr.mxu0 %v207_v7  ;;  %791 = vmatprep.subr.mxu1 %v207_v7 }
  0x1b   : > { %733 = vmatpush3.msra.mxu0 %v207_v7  ;;  %800 = vmatpush3.msra.mxu1 %v207_v7 }
  0x1c   : > { %734 = vmatprep.subr.mxu0 %v206_v8  ;;  %792 = vmatprep.subr.mxu1 %v206_v8 }
  0x1d   : > { %735 = vmatpush3.msra.mxu0 %v206_v8  ;;  %801 = vmatpush3.msra.mxu1 %v206_v8 }
  0x1e   : > { %736 = vmatprep.mubr.msk.f32.mxu0 %vm222_vm0, %v174_v9  ;;  %760 = vmatprep.mubr.msk.f32.mxu1 %vm222_vm0, %v190_v10 }
  0x1f   : > { %737 = vmatmul.mubr.msk.f32.vlgmr.msra.gmra.mxu0 %vm222_vm0, %v175_v11  ;;  %761 = vmatmul.mubr.msk.f32.vlgmr.msra.gmra.mxu1 %vm222_vm0, %v191_v12 }
  0x20   : > { %739 = vmatprep.mubr.msk.f32.mxu0 %vm222_vm0, %v176_v13  ;;  %763 = vmatprep.mubr.msk.f32.mxu1 %vm222_vm0, %v192_v14 }
  0x23   : > { %740 = vmatmul.mubr.msk.f32.gmra.mxu0 %vm222_vm0, %v177_v15  ;;  %764 = vmatmul.mubr.msk.f32.gmra.mxu1 %vm222_vm0, %v193_v16 }
  0x24   : > { %742 = vmatprep.mubr.msk.f32.mxu0 %vm222_vm0, %v178_v17  ;;  %766 = vmatprep.mubr.msk.f32.mxu1 %vm222_vm0, %v194_v18 }
  0x27   : > { %743 = vmatmul.mubr.msk.f32.gmra.mxu0 %vm222_vm0, %v179_v19  ;;  %767 = vmatmul.mubr.msk.f32.gmra.mxu1 %vm222_vm0, %v195_v20 }
  0x28   : > { %745 = vmatprep.mubr.msk.f32.mxu0 %vm222_vm0, %v180_v21  ;;  %769 = vmatprep.mubr.msk.f32.mxu1 %vm222_vm0, %v196_v22 }
  0x2b   : > { %746 = vmatmul.mubr.msk.f32.gmra.mxu0 %vm222_vm0, %v181_v23  ;;  %770 = vmatmul.mubr.msk.f32.gmra.mxu1 %vm222_vm0, %v197_v24 }
  0x2c   : > { %748 = vmatprep.mubr.msk.f32.mxu0 %vm222_vm0, %v182_v25  ;;  %772 = vmatprep.mubr.msk.f32.mxu1 %vm222_vm0, %v198_v26 }
  0x2f   : > { %749 = vmatmul.mubr.msk.f32.gmra.mxu0 %vm222_vm0, %v183_v27  ;;  %773 = vmatmul.mubr.msk.f32.gmra.mxu1 %vm222_vm0, %v199_v28 }
  0x30   : > { %751 = vmatprep.mubr.msk.f32.mxu0 %vm222_vm0, %v184_v29  ;;  %775 = vmatprep.mubr.msk.f32.mxu1 %vm222_vm0, %v200_v30 }
  0x33   : > { %752 = vmatmul.mubr.msk.f32.gmra.mxu0 %vm222_vm0, %v185_v31  ;;  %776 = vmatmul.mubr.msk.f32.gmra.mxu1 %vm222_vm0, %v201_v32 }
  0x34   : > { %754 = vmatprep.mubr.msk.f32.mxu0 %vm222_vm0, %v186_v33  ;;  %778 = vmatprep.mubr.msk.f32.mxu1 %vm222_vm0, %v202_v34 }
  0x37   : > { %755 = vmatmul.mubr.msk.f32.gmra.mxu0 %vm222_vm0, %v187_v35  ;;  %779 = vmatmul.mubr.msk.f32.gmra.mxu1 %vm222_vm0, %v203_v36 }
  0x38   : > { %757 = vmatprep.mubr.msk.f32.mxu0 %vm222_vm0, %v188_v37  ;;  %781 = vmatprep.mubr.msk.f32.mxu1 %vm222_vm0, %v204_v38 }
  0x3b   : > { %758 = vmatmul.mubr.msk.f32.gmra.mxu0 %vm222_vm0, %v189_v39  ;;  %782 = vmatmul.mubr.msk.f32.gmra.mxu1 %vm222_vm0, %v205_v40 }
  0xdf   : > { %v738_v42 = vpop.f32.mrf.mxu0  ;;  %v762_v43 = vpop.f32.mrf.mxu1 }
  0xe0   : > { %v391_v44 = vadd.f32 %v738_v42, %v950_v41  ;;  %v471_v45 = vadd.f32 %v762_v43, %v950_v41 }
  0xe1   : > { %v385_v46 = vpop.f32.mrf.mxu0  ;;  %v465_v47 = vpop.f32.mrf.mxu1 }
  0xe2   : > { %546 = vst.msk [vmem:[%s957_s15 + $0x8] sm:$0xff] %vm544_vm1, %v391_v44  ;;  %562 = vst.msk [vmem:[%s957_s15 + $0x88] sm:$0xff] %vm544_vm1, %v471_v45  ;;  %v386_v48 = vadd.f32 %v950_v41, %v385_v46  ;;  %v466_v49 = vadd.f32 %v950_v41, %v465_v47 }
  0xe3   : > { %v741_v50 = vpop.f32.mrf.mxu0  ;;  %v765_v51 = vpop.f32.mrf.mxu1 }
  0xe4   : > { %545 = vst.msk [vmem:[%s957_s15] sm:$0xff] %vm544_vm1, %v386_v48  ;;  %561 = vst.msk [vmem:[%s957_s15 + $0x80] sm:$0xff] %vm544_vm1, %v466_v49  ;;  %v401_v52 = vadd.f32 %v741_v50, %v950_v41  ;;  %v481_v53 = vadd.f32 %v765_v51, %v950_v41 }
  0xe5   : > { %v395_v54 = vpop.f32.mrf.mxu0  ;;  %v475_v55 = vpop.f32.mrf.mxu1 }
  0xe6   : > { %548 = vst.msk [vmem:[%s957_s15 + $0x18] sm:$0xff] %vm544_vm1, %v401_v52  ;;  %564 = vst.msk [vmem:[%s957_s15 + $0x98] sm:$0xff] %vm544_vm1, %v481_v53  ;;  %v396_v56 = vadd.f32 %v950_v41, %v395_v54  ;;  %v476_v57 = vadd.f32 %v950_v41, %v475_v55 }
  0xe7   : > { %v744_v58 = vpop.f32.mrf.mxu0  ;;  %v768_v59 = vpop.f32.mrf.mxu1 }
  0xe8   : > { %547 = vst.msk [vmem:[%s957_s15 + $0x10] sm:$0xff] %vm544_vm1, %v396_v56  ;;  %563 = vst.msk [vmem:[%s957_s15 + $0x90] sm:$0xff] %vm544_vm1, %v476_v57  ;;  %v411_v60 = vadd.f32 %v744_v58, %v950_v41  ;;  %v491_v61 = vadd.f32 %v768_v59, %v950_v41 }
  0xe9   : > { %v405_v62 = vpop.f32.mrf.mxu0  ;;  %v485_v63 = vpop.f32.mrf.mxu1 }
  0xea   : > { %550 = vst.msk [vmem:[%s957_s15 + $0x28] sm:$0xff] %vm544_vm1, %v411_v60  ;;  %566 = vst.msk [vmem:[%s957_s15 + $0xa8] sm:$0xff] %vm544_vm1, %v491_v61  ;;  %v406_v0 = vadd.f32 %v950_v41, %v405_v62  ;;  %v486_v1 = vadd.f32 %v950_v41, %v485_v63 }
  0xeb   : > { %v747_v2 = vpop.f32.mrf.mxu0  ;;  %v771_v3 = vpop.f32.mrf.mxu1 }
  0xec   : > { %549 = vst.msk [vmem:[%s957_s15 + $0x20] sm:$0xff] %vm544_vm1, %v406_v0  ;;  %565 = vst.msk [vmem:[%s957_s15 + $0xa0] sm:$0xff] %vm544_vm1, %v486_v1  ;;  %v421_v4 = vadd.f32 %v747_v2, %v950_v41  ;;  %v501_v5 = vadd.f32 %v771_v3, %v950_v41 }
  0xed   : > { %v415_v6 = vpop.f32.mrf.mxu0  ;;  %v495_v7 = vpop.f32.mrf.mxu1 }
  0xee   : > { %552 = vst.msk [vmem:[%s957_s15 + $0x38] sm:$0xff] %vm544_vm1, %v421_v4  ;;  %568 = vst.msk [vmem:[%s957_s15 + $0xb8] sm:$0xff] %vm544_vm1, %v501_v5  ;;  %v416_v8 = vadd.f32 %v950_v41, %v415_v6  ;;  %v496_v9 = vadd.f32 %v950_v41, %v495_v7 }
  0xef   : > { %v750_v10 = vpop.f32.mrf.mxu0  ;;  %v774_v11 = vpop.f32.mrf.mxu1 }
  0xf0   : > { %551 = vst.msk [vmem:[%s957_s15 + $0x30] sm:$0xff] %vm544_vm1, %v416_v8  ;;  %567 = vst.msk [vmem:[%s957_s15 + $0xb0] sm:$0xff] %vm544_vm1, %v496_v9  ;;  %v431_v12 = vadd.f32 %v750_v10, %v950_v41  ;;  %v511_v13 = vadd.f32 %v774_v11, %v950_v41 }
  0xf1   : > { %v425_v14 = vpop.f32.mrf.mxu0  ;;  %v505_v15 = vpop.f32.mrf.mxu1 }
  0xf2   : > { %554 = vst.msk [vmem:[%s957_s15 + $0x48] sm:$0xff] %vm544_vm1, %v431_v12  ;;  %570 = vst.msk [vmem:[%s957_s15 + $0xc8] sm:$0xff] %vm544_vm1, %v511_v13  ;;  %v426_v16 = vadd.f32 %v950_v41, %v425_v14  ;;  %v506_v17 = vadd.f32 %v950_v41, %v505_v15 }
  0xf3   : > { %v753_v18 = vpop.f32.mrf.mxu0  ;;  %v777_v19 = vpop.f32.mrf.mxu1 }
  0xf4   : > { %553 = vst.msk [vmem:[%s957_s15 + $0x40] sm:$0xff] %vm544_vm1, %v426_v16  ;;  %569 = vst.msk [vmem:[%s957_s15 + $0xc0] sm:$0xff] %vm544_vm1, %v506_v17  ;;  %v441_v20 = vadd.f32 %v753_v18, %v950_v41  ;;  %v521_v21 = vadd.f32 %v777_v19, %v950_v41 }
  0xf5   : > { %v435_v22 = vpop.f32.mrf.mxu0  ;;  %v515_v23 = vpop.f32.mrf.mxu1 }
  0xf6   : > { %556 = vst.msk [vmem:[%s957_s15 + $0x58] sm:$0xff] %vm544_vm1, %v441_v20  ;;  %572 = vst.msk [vmem:[%s957_s15 + $0xd8] sm:$0xff] %vm544_vm1, %v521_v21  ;;  %v436_v24 = vadd.f32 %v950_v41, %v435_v22  ;;  %v516_v25 = vadd.f32 %v950_v41, %v515_v23 }
  0xf7   : > { %v756_v26 = vpop.f32.mrf.mxu0  ;;  %v780_v27 = vpop.f32.mrf.mxu1 }
  0xf8   : > { %555 = vst.msk [vmem:[%s957_s15 + $0x50] sm:$0xff] %vm544_vm1, %v436_v24  ;;  %571 = vst.msk [vmem:[%s957_s15 + $0xd0] sm:$0xff] %vm544_vm1, %v516_v25  ;;  %v451_v28 = vadd.f32 %v756_v26, %v950_v41  ;;  %v531_v29 = vadd.f32 %v780_v27, %v950_v41 }
  0xf9   : > { %v445_v30 = vpop.f32.mrf.mxu0  ;;  %v525_v31 = vpop.f32.mrf.mxu1 }
  0xfa   : > { %558 = vst.msk [vmem:[%s957_s15 + $0x68] sm:$0xff] %vm544_vm1, %v451_v28  ;;  %574 = vst.msk [vmem:[%s957_s15 + $0xe8] sm:$0xff] %vm544_vm1, %v531_v29  ;;  %v446_v32 = vadd.f32 %v950_v41, %v445_v30  ;;  %v526_v33 = vadd.f32 %v950_v41, %v525_v31 }
  0xfb   : > { %v759_v34 = vpop.f32.mrf.mxu0  ;;  %v783_v35 = vpop.f32.mrf.mxu1 }
  0xfc   : > { %557 = vst.msk [vmem:[%s957_s15 + $0x60] sm:$0xff] %vm544_vm1, %v446_v32  ;;  %573 = vst.msk [vmem:[%s957_s15 + $0xe0] sm:$0xff] %vm544_vm1, %v526_v33  ;;  %v461_v36 = vadd.f32 %v759_v34, %v950_v41  ;;  %v541_v37 = vadd.f32 %v783_v35, %v950_v41 }
  0xfd   : > { %v455_v38 = vpop.f32.mrf.mxu0  ;;  %v535_v39 = vpop.f32.mrf.mxu1 }
  0xfe   : > { %560 = vst.msk [vmem:[%s957_s15 + $0x78] sm:$0xff] %vm544_vm1, %v461_v36  ;;  %576 = vst.msk [vmem:[%s957_s15 + $0xf8] sm:$0xff] %vm544_vm1, %v541_v37  ;;  %v456_v40 = vadd.f32 %v950_v41, %v455_v38  ;;  %v536_v42 = vadd.f32 %v950_v41, %v535_v39 }
 0x100   : > { %559 = vst.msk [vmem:[%s957_s15 + $0x70] sm:$0xff] %vm544_vm1, %v456_v40  ;;  %575 = vst.msk [vmem:[%s957_s15 + $0xf0] sm:$0xff] %vm544_vm1, %v536_v42 }
 0x101 PF: > { %s13_s12 = sadd.s32 1, %s816_s12  }
 0x102   : > { %p10_p4 = scmp.ge.s32.totalorder %s13_s12, 4  }
 0x104   :  { %12 = sbr.rel (!%p10_p4) target bundleno = 1 (0x1), region = 62 }

// kernel: tile.18
= control target key start
LH: loop header
LB: loop body
LE: loop exit
PB: predicated region body
PF: predicated region fallthrough
CT: control target
= control target key end

     0   :  { %vm8_vm0 = vcmask 31744   ;;  %s40_s8 = smov 4   ;;  %s41_s9 = smov 8   ;;  %vm14_vm1 = vcmask 130144   ;;  %vm20_vm2 = vcmask 97344   ;;  %vm26_vm3 = vcmask 64544   ;;  %s58_s0 = inlined_call_operand.vmem [shape: f32[4,4], index: 0, kind: input, shape index: {}]   ;;  %s59_s1 = inlined_call_operand.vmem [shape: f32[16], index: 1, kind: output, shape index: {}]  }
   0x1   :  { %v5_v0 = vld [vmem:[%s58_s0] sm:$0xf]  ;;  %s39_s0 = smov 12  }
   0x2   :  { %6 = vst [vmem:[#allocation1] sm:$0xf] %v5_v0 }
   0x9   :  { %v11_v1 = vld [vmem:[#allocation1 + $0x3] sm:$0x1]   ;;  %v23_v2 = vld [vmem:[#allocation1 + $0x1] sm:$0x1]   ;;  %v7_v3 = vld [vmem:[#allocation1] sm:$0x1]  }
   0xa   :  { %12 = vrot.lane.b32.xlu0 %v11_v1, %s39_s0  ;;  %24 = vrot.lane.b32.xlu1 %v23_v2, %s40_s8  ;;  %v17_v4 = vld [vmem:[#allocation1 + $0x2] sm:$0x1]   ;;  %9 = vst.msk [vmem:[#allocation0] sm:$0x1] %vm8_vm0, %v7_v3  }
   0xe   :  { %18 = vrot.lane.b32.xlu0 %v17_v4, %s41_s9 }
  0x7c   :  { %v13_v5 = vpop.permute.xlu0 %12   ;;  %v25_v6 = vpop.permute.xlu1 %24  }
  0x7d   :  { %15 = vst.msk [vmem:[#allocation0] sm:$0x1] %vm14_vm1, %v13_v5  }
  0x80   :  { %v19_v7 = vpop.permute.xlu0 %18  }
  0x81   :  { %21 = vst.msk [vmem:[#allocation0] sm:$0x1] %vm20_vm2, %v19_v7  }
  0x82   :  { %27 = vst.msk [vmem:[#allocation0] sm:$0x1] %vm26_vm3, %v25_v6  }
  0x89   :  { %v32_v8 = vld [vmem:[#allocation0] sm:$0x1] }
  0x8a   :  { %35 = vst [vmem:[%s59_s1] sm:$0x1] %v32_v8 }

// kernel: tile.19
= control target key start
LH: loop header
LB: loop body
LE: loop exit
PB: predicated region body
PF: predicated region fallthrough
CT: control target
= control target key end

     0   :  { %s22_s0 = inlined_call_operand.vmem [shape: f32[16], index: 0, kind: input, shape index: {}]   ;;  %s23_s1 = inlined_call_operand.vmem [shape: f32[4,16], index: 1, kind: output, shape index: {}]  }
   0x1   :  { %v4_v0 = vld [vmem:[%s22_s0] ss:$0 sm:$0xff] }
   0x2   :  { %5 = vst [vmem:[%s23_s1] sm:$0xf] %v4_v0 }

// kernel: tile.20
= control target key start
LH: loop header
LB: loop body
LE: loop exit
PB: predicated region body
PF: predicated region fallthrough
CT: control target
= control target key end

     0   :  { %vm8_vm0 = vcmask 130048   ;;  %s40_s8 = smov 16   ;;  %s41_s9 = smov 32   ;;  %vm14_vm1 = vcmask 523648   ;;  %vm20_vm2 = vcmask 392448   ;;  %vm26_vm3 = vcmask 261248   ;;  %s58_s0 = inlined_call_operand.vmem [shape: f32[4,16], index: 0, kind: input, shape index: {}]   ;;  %s59_s1 = inlined_call_operand.vmem [shape: f32[64], index: 1, kind: output, shape index: {}]  }
   0x1   :  { %v5_v0 = vld [vmem:[%s58_s0] sm:$0xf]  ;;  %s39_s0 = smov 48  }
   0x2   :  { %6 = vst [vmem:[#allocation1] sm:$0xf] %v5_v0 }
   0x9   :  { %v11_v1 = vld [vmem:[#allocation1 + $0x3] sm:$0x1]   ;;  %v23_v2 = vld [vmem:[#allocation1 + $0x1] sm:$0x1]   ;;  %v7_v3 = vld [vmem:[#allocation1] sm:$0x1]  }
   0xa   :  { %12 = vrot.lane.b32.xlu0 %v11_v1, %s39_s0  ;;  %24 = vrot.lane.b32.xlu1 %v23_v2, %s40_s8  ;;  %v17_v4 = vld [vmem:[#allocation1 + $0x2] sm:$0x1]   ;;  %9 = vst.msk [vmem:[#allocation0] sm:$0x1] %vm8_vm0, %v7_v3  }
   0xe   :  { %18 = vrot.lane.b32.xlu0 %v17_v4, %s41_s9 }
  0x7c   :  { %v13_v5 = vpop.permute.xlu0 %12   ;;  %v25_v6 = vpop.permute.xlu1 %24  }
  0x7d   :  { %15 = vst.msk [vmem:[#allocation0] sm:$0x1] %vm14_vm1, %v13_v5  }
  0x80   :  { %v19_v7 = vpop.permute.xlu0 %18  }
  0x81   :  { %21 = vst.msk [vmem:[#allocation0] sm:$0x1] %vm20_vm2, %v19_v7  }
  0x82   :  { %27 = vst.msk [vmem:[#allocation0] sm:$0x1] %vm26_vm3, %v25_v6  }
  0x89   :  { %v32_v8 = vld [vmem:[#allocation0] sm:$0x1] }
  0x8a   :  { %35 = vst [vmem:[%s59_s1] sm:$0x1] %v32_v8 }

// kernel: tile.23
= control target key start
LH: loop header
LB: loop body
LE: loop exit
PB: predicated region body
PF: predicated region fallthrough
CT: control target
= control target key end

     0   :  { %s22_s0 = inlined_call_operand.vmem [shape: f32[4], index: 0, kind: input, shape index: {}]   ;;  %s23_s1 = inlined_call_operand.vmem [shape: f32[4,4], index: 1, kind: output, shape index: {}]  }
   0x1   :  { %v4_v0 = vld [vmem:[%s22_s0] ss:$0 sm:$0xff] }
   0x2   :  { %5 = vst [vmem:[%s23_s1] sm:$0xf] %v4_v0 }

// kernel: _lambda_.5
= control target key start
LH: loop header
LB: loop body
LE: loop exit
PB: predicated region body
PF: predicated region fallthrough
CT: control target
= control target key end

     0   :  { %s5250_s30 = smov 0   ;;  %s8350_s0 = inlined_call_operand.vmem [shape: f32[512,128], index: 0, kind: input, shape index: {}]   ;;  %s8351_s1 = inlined_call_operand.vmem [shape: f32[128,128], index: 1, kind: input, shape index: {}]   ;;  %s8352_s2 = inlined_call_operand.vmem [shape: f32[1,128], index: 2, kind: input, shape index: {}]   ;;  %s8353_s3 = inlined_call_operand.vmem [shape: f32[128,128], index: 3, kind: input, shape index: {}]   ;;  %s8354_s4 = inlined_call_operand.vmem [shape: f32[1,128], index: 4, kind: input, shape index: {}, may-alias: {4,6}]   ;;  %s8355_s5 = inlined_call_operand.vmem [shape: f32[128,128], index: 5, kind: input, shape index: {}]   ;;  %s8356_s6 = inlined_call_operand.vmem [shape: f32[1,128], index: 6, kind: input, shape index: {}, may-alias: {4,6}]   ;;  %s8357_s7 = inlined_call_operand.vmem [shape: f32[128,32], index: 7, kind: input, shape index: {}]   ;;  %s8358_s8 = inlined_call_operand.vmem [shape: f32[1,32], index: 8, kind: input, shape index: {}]   ;;  %s8359_s9 = inlined_call_operand.vmem [shape: f32[512,8], index: 9, kind: output, shape index: {}]  }
   0x1 LB: > { %s4425_s10 = sadd.s32 4294967295, %s5183_s30   ;;  %p4429_p0 = scmp.ge.s32.totalorder %s5183_s30, 1  ;;  %s5183_s30 = sphi %s5250_s30, %s19_s30  }
   0x2   : > { %p288_p1 = scmp.lt.s32.totalorder %s5183_s30, 3 }
   0x4   : > { %p289_p2 = pnand %p4429_p0, %p288_p1 }
   0x6   : > { %292 = sbr.rel (%p289_p2) target bundleno = 1449 (0x5a9), region = 56 }
   0xb   : > { %v383_v0 = vld [vmem:[%s8351_s1 + $0x78] sm:$0xff]  ;;  %v382_v1 = vld [vmem:[%s8351_s1 + $0x70] sm:$0xff]  ;;  %s4430_s15 = sshll.u32 %s4425_s10, 5  ;;  %v5185_v2 = vmov 104   ;;  %v381_v3 = vld [vmem:[%s8351_s1 + $0x68] sm:$0xff]  ;;  %s5186_s11 = smov 127  }
   0xc   : > { %4696 = vmatprep.subr.mxu0 %v383_v0  ;;  %5040 = vset.pattern.permute.xlu1 %v5185_v2  ;;  %p325_p3 = scmp.lt.s32.totalorder %s4430_s15, 63  ;;  %v380_v4 = vld [vmem:[%s8351_s1 + $0x60] sm:$0xff]  ;;  %v379_v5 = vld [vmem:[%s8351_s1 + $0x58] sm:$0xff]  ;;  %v378_v8 = vld [vmem:[%s8351_s1 + $0x50] sm:$0xff]  ;;  %s5187_s12 = smov 126  }
   0xd   : > { %4697 = vmatpush3.msra.mxu0 %v383_v0  ;;  %5039 = vset.pattern.permute.xlu0 %v5185_v2  ;;  %v377_v11 = vld [vmem:[%s8351_s1 + $0x48] sm:$0xff]  ;;  %v376_v12 = vld [vmem:[%s8351_s1 + $0x40] sm:$0xff]  ;;  %v375_v15 = vld [vmem:[%s8351_s1 + $0x38] sm:$0xff]  ;;  %s5188_s13 = smov 125   ;;  %s5189_s17 = smov 64  }
   0xe   : > { %4698 = vmatprep.subr.mxu0 %v382_v1  ;;  %s8825_s15 = smov (!%p325_p3, %s4430_s15), 63  ;;  %v374_v16 = vld [vmem:[%s8351_s1 + $0x30] sm:$0xff]  ;;  %v373_v19 = vld [vmem:[%s8351_s1 + $0x28] sm:$0xff]  ;;  %v372_v20 = vld [vmem:[%s8351_s1 + $0x20] sm:$0xff]  ;;  %s5192_s21 = smov 2  }
   0xf   : > { %4699 = vmatpush3.msra.mxu0 %v382_v1  ;;  %s4431_s20 = sshll.u32 %s8825_s15, 3  ;;  %v371_v23 = vld [vmem:[%s8351_s1 + $0x18] sm:$0xff]  ;;  %v370_v24 = vld [vmem:[%s8351_s1 + $0x10] sm:$0xff]  ;;  %v369_v27 = vld [vmem:[%s8351_s1 + $0x8] sm:$0xff]  ;;  %s5194_s24 = smov 1  }
  0x10   : > { %4700 = vmatprep.subr.mxu0 %v381_v3  ;;  %s5278_s23 = scalar_lea.vmem %s8350_s0, %s4431_s20  ;;  %v368_v28 = vld [vmem:[%s8351_s1] sm:$0xff]  ;;  %s5197_s26 = smov 112  }
  0x11   : > { %4701 = vmatpush3.msra.mxu0 %v381_v3  ;;  %v5284_v6 = vld [vmem:[%s5278_s23 + $0x10] sm:$0xff]  ;;  %v5287_v7 = vld [vmem:[%s5278_s23] sm:$0xff]  ;;  %v5295_v9 = vld [vmem:[%s5278_s23 + $0x18] sm:$0xff]  ;;  %s5198_s27 = smov 120   ;;  %s5199_s28 = smov 104  }
  0x12   : > { %4702 = vmatprep.subr.mxu0 %v380_v4  ;;  %622 = vperm.xlu1 %5040, %v5284_v6   ;;  %v5298_v10 = vld [vmem:[%s5278_s23 + $0x8] sm:$0xff]  ;;  %v5313_v14 = vld [vmem:[%s5278_s23 + $0x20] sm:$0xff]  ;;  %v5324_v17 = vld [vmem:[%s5278_s23 + $0x38] sm:$0xff] }
  0x13   : > { %4703 = vmatpush3.msra.mxu0 %v380_v4  ;;  %612 = vperm.xlu0 %5039, %v5287_v7   ;;  %v5310_v13 = vld [vmem:[%s5278_s23 + $0x28] sm:$0xff]  ;;  %v5327_v18 = vld [vmem:[%s5278_s23 + $0x30] sm:$0xff]  ;;  %v5341_v22 = vld [vmem:[%s5278_s23 + $0x40] sm:$0xff] }
  0x14   : > { %4704 = vmatprep.subr.mxu0 %v379_v5  ;;  %4728 = vmatprep.mubr.f32.mxu0 %v5287_v7  ;;  %v5338_v21 = vld [vmem:[%s5278_s23 + $0x48] sm:$0xff]  ;;  %v5352_v25 = vld [vmem:[%s5278_s23 + $0x58] sm:$0xff]  ;;  %v5355_v26 = vld [vmem:[%s5278_s23 + $0x50] sm:$0xff] }
  0x15   : > { %4705 = vmatpush3.msra.mxu0 %v379_v5  ;;  %v5366_v29 = vld [vmem:[%s5278_s23 + $0x68] sm:$0xff]  ;;  %v5369_v30 = vld [vmem:[%s5278_s23 + $0x60] sm:$0xff]  ;;  %v5375_v31 = vld [vmem:[%s5278_s23 + $0x78] sm:$0xff] }
  0x16   : > { %4706 = vmatprep.subr.mxu0 %v378_v8  ;;  %627 = vperm.xlu1 %5040, %v5295_v9   ;;  %v5378_v32 = vld [vmem:[%s5278_s23 + $0x70] sm:$0xff]  ;;  %v5385_v33 = vld [vmem:[%s5278_s23 + $0x88] sm:$0xff]  ;;  %v5388_v34 = vld [vmem:[%s5278_s23 + $0x80] sm:$0xff] }
  0x17   : > { %4707 = vmatpush3.msra.mxu0 %v378_v8  ;;  %617 = vperm.xlu0 %5039, %v5298_v10   ;;  %v5395_v35 = vld [vmem:[%s5278_s23 + $0x98] sm:$0xff]  ;;  %v5398_v36 = vld [vmem:[%s5278_s23 + $0x90] sm:$0xff]  ;;  %v5405_v37 = vld [vmem:[%s5278_s23 + $0xa8] sm:$0xff] }
  0x18   : > { %4708 = vmatprep.subr.mxu0 %v377_v11  ;;  %v5408_v38 = vld [vmem:[%s5278_s23 + $0xa0] sm:$0xff]  ;;  %v5415_v39 = vld [vmem:[%s5278_s23 + $0xb8] sm:$0xff]  ;;  %v5418_v40 = vld [vmem:[%s5278_s23 + $0xb0] sm:$0xff] }
  0x19   : > { %4709 = vmatpush3.msra.mxu0 %v377_v11  ;;  %v5425_v41 = vld [vmem:[%s5278_s23 + $0xc8] sm:$0xff]  ;;  %v5428_v42 = vld [vmem:[%s5278_s23 + $0xc0] sm:$0xff]  ;;  %v5435_v43 = vld [vmem:[%s5278_s23 + $0xd8] sm:$0xff] }
  0x1a   : > { %4710 = vmatprep.subr.mxu0 %v376_v12  ;;  %637 = vperm.xlu1 %5040, %v5310_v13   ;;  %v5438_v44 = vld [vmem:[%s5278_s23 + $0xd0] sm:$0xff]  ;;  %v5445_v45 = vld [vmem:[%s5278_s23 + $0xe8] sm:$0xff]  ;;  %v5448_v46 = vld [vmem:[%s5278_s23 + $0xe0] sm:$0xff] }
  0x1b   : > { %4711 = vmatpush3.msra.mxu0 %v376_v12  ;;  %632 = vperm.xlu0 %5039, %v5313_v14   ;;  %v5455_v47 = vld [vmem:[%s5278_s23 + $0xf8] sm:$0xff]  ;;  %v5458_v48 = vld [vmem:[%s5278_s23 + $0xf0] sm:$0xff] }
  0x1c   : > { %4712 = vmatprep.subr.mxu0 %v375_v15 }
  0x1d   : > { %4713 = vmatpush3.msra.mxu0 %v375_v15 }
  0x1e   : > { %4714 = vmatprep.subr.mxu0 %v374_v16  ;;  %647 = vperm.xlu1 %5040, %v5324_v17  }
  0x1f   : > { %4715 = vmatpush3.msra.mxu0 %v374_v16  ;;  %642 = vperm.xlu0 %5039, %v5327_v18  }
  0x20   : > { %4716 = vmatprep.subr.mxu0 %v373_v19 }
  0x21   : > { %4717 = vmatpush3.msra.mxu0 %v373_v19 }
  0x22   : > { %4718 = vmatprep.subr.mxu0 %v372_v20  ;;  %657 = vperm.xlu1 %5040, %v5338_v21  }
  0x23   : > { %4719 = vmatpush3.msra.mxu0 %v372_v20  ;;  %652 = vperm.xlu0 %5039, %v5341_v22  }
  0x24   : > { %4720 = vmatprep.subr.mxu0 %v371_v23 }
  0x25   : > { %4721 = vmatpush3.msra.mxu0 %v371_v23 }
  0x26   : > { %4722 = vmatprep.subr.mxu0 %v370_v24  ;;  %667 = vperm.xlu1 %5040, %v5352_v25  }
  0x27   : > { %4723 = vmatpush3.msra.mxu0 %v370_v24  ;;  %662 = vperm.xlu0 %5039, %v5355_v26  }
  0x28   : > { %4724 = vmatprep.subr.mxu0 %v369_v27 }
  0x29   : > { %4725 = vmatpush3.msra.mxu0 %v369_v27 }
  0x2a   : > { %4726 = vmatprep.subr.mxu0 %v368_v28  ;;  %677 = vperm.xlu1 %5040, %v5366_v29  }
  0x2b   : > { %4727 = vmatpush3.msra.mxu0 %v368_v28  ;;  %672 = vperm.xlu0 %5039, %v5369_v30  }
  0x2c   : > { %4729 = vmatmul.mubr.f32.vlgmr.msra.gmra.mxu0 %v5298_v10 }
  0x2d   : > { %4731 = vmatprep.mubr.f32.mxu0 %v5284_v6 }
  0x2e   : > { %687 = vperm.xlu1 %5040, %v5375_v31  }
  0x2f   : > { %682 = vperm.xlu0 %5039, %v5378_v32  }
  0x30   : > { %4732 = vmatmul.mubr.f32.gmra.mxu0 %v5295_v9 }
  0x31   : > { %4734 = vmatprep.mubr.f32.mxu0 %v5313_v14 }
  0x32   : > { %697 = vperm.xlu1 %5040, %v5385_v33  }
  0x33   : > { %692 = vperm.xlu0 %5039, %v5388_v34  }
  0x34   : > { %4735 = vmatmul.mubr.f32.gmra.mxu0 %v5310_v13 }
  0x35   : > { %4737 = vmatprep.mubr.f32.mxu0 %v5327_v18 }
  0x36   : > { %707 = vperm.xlu1 %5040, %v5395_v35  }
  0x37   : > { %702 = vperm.xlu0 %5039, %v5398_v36  }
  0x38   : > { %4738 = vmatmul.mubr.f32.gmra.mxu0 %v5324_v17 }
  0x39   : > { %4740 = vmatprep.mubr.f32.mxu0 %v5341_v22 }
  0x3a   : > { %717 = vperm.xlu1 %5040, %v5405_v37  }
  0x3b   : > { %712 = vperm.xlu0 %5039, %v5408_v38  }
  0x3c   : > { %4741 = vmatmul.mubr.f32.gmra.mxu0 %v5338_v21 }
  0x3d   : > { %4743 = vmatprep.mubr.f32.mxu0 %v5355_v26 }
  0x3e   : > { %727 = vperm.xlu1 %5040, %v5415_v39  }
  0x3f   : > { %722 = vperm.xlu0 %5039, %v5418_v40  }
  0x40   : > { %4744 = vmatmul.mubr.f32.gmra.mxu0 %v5352_v25 }
  0x41   : > { %4746 = vmatprep.mubr.f32.mxu0 %v5369_v30 }
  0x42   : > { %737 = vperm.xlu1 %5040, %v5425_v41  }
  0x43   : > { %732 = vperm.xlu0 %5039, %v5428_v42  }
  0x44   : > { %4747 = vmatmul.mubr.f32.gmra.mxu0 %v5366_v29 }
  0x45   : > { %4749 = vmatprep.mubr.f32.mxu0 %v5378_v32 }
  0x46   : > { %747 = vperm.xlu1 %5040, %v5435_v43  }
  0x47   : > { %742 = vperm.xlu0 %5039, %v5438_v44  }
  0x48   : > { %4750 = vmatmul.mubr.f32.gmra.mxu0 %v5375_v31 }
  0x49   : > { %4752 = vmatprep.mubr.f32.mxu0 %v5388_v34 }
  0x4a   : > { %757 = vperm.xlu1 %5040, %v5445_v45  }
  0x4b   : > { %752 = vperm.xlu0 %5039, %v5448_v46  }
  0x4c   : > { %4753 = vmatmul.mubr.f32.gmra.mxu0 %v5385_v33 }
  0x4d   : > { %4755 = vmatprep.mubr.f32.mxu0 %v5398_v36 }
  0x4e   : > { %767 = vperm.xlu1 %5040, %v5455_v47  }
  0x4f   : > { %762 = vperm.xlu0 %5039, %v5458_v48  }
  0x50   : > { %4756 = vmatmul.mubr.f32.gmra.mxu0 %v5395_v35 }
  0x51   : > { %4758 = vmatprep.mubr.f32.mxu0 %v5408_v38 }
  0x52   : > { %2226 = vrot.lane.b32.xlu1 %v5298_v10, %s5186_s11 }
  0x53   : > { %2224 = vrot.lane.b32.xlu0 %v5287_v7, %s5186_s11 }
  0x54   : > { %4759 = vmatmul.mubr.f32.gmra.mxu0 %v5405_v37 }
  0x55   : > { %4761 = vmatprep.mubr.f32.mxu0 %v5418_v40 }
  0x56   : > { %2230 = vrot.lane.b32.xlu1 %v5295_v9, %s5186_s11 }
  0x57   : > { %2228 = vrot.lane.b32.xlu0 %v5284_v6, %s5186_s11 }
  0x58   : > { %4762 = vmatmul.mubr.f32.gmra.mxu0 %v5415_v39 }
  0x59   : > { %4764 = vmatprep.mubr.f32.mxu0 %v5428_v42 }
  0x5a   : > { %2234 = vrot.lane.b32.xlu1 %v5310_v13, %s5186_s11 }
  0x5b   : > { %2232 = vrot.lane.b32.xlu0 %v5313_v14, %s5186_s11 }
  0x5c   : > { %4765 = vmatmul.mubr.f32.gmra.mxu0 %v5425_v41 }
  0x5d   : > { %4767 = vmatprep.mubr.f32.mxu0 %v5438_v44 }
  0x5e   : > { %2238 = vrot.lane.b32.xlu1 %v5324_v17, %s5186_s11 }
  0x5f   : > { %2236 = vrot.lane.b32.xlu0 %v5327_v18, %s5186_s11 }
  0x60   : > { %4768 = vmatmul.mubr.f32.gmra.mxu0 %v5435_v43 }
  0x61   : > { %4770 = vmatprep.mubr.f32.mxu0 %v5448_v46 }
  0x62   : > { %2242 = vrot.lane.b32.xlu1 %v5338_v21, %s5186_s11 }
  0x63   : > { %2240 = vrot.lane.b32.xlu0 %v5341_v22, %s5186_s11 }
  0x64   : > { %4771 = vmatmul.mubr.f32.gmra.mxu0 %v5445_v45 }
  0x65   : > { %4773 = vmatprep.mubr.f32.mxu0 %v5458_v48 }
  0x66   : > { %2246 = vrot.lane.b32.xlu1 %v5352_v25, %s5186_s11 }
  0x67   : > { %2244 = vrot.lane.b32.xlu0 %v5355_v26, %s5186_s11 }
  0x68   : > { %4774 = vmatmul.mubr.f32.gmra.mxu0 %v5455_v47 }
  0x6a   : > { %2250 = vrot.lane.b32.xlu1 %v5366_v29, %s5186_s11 }
  0x6b   : > { %2248 = vrot.lane.b32.xlu0 %v5369_v30, %s5186_s11 }
  0x6e   : > { %2254 = vrot.lane.b32.xlu1 %v5375_v31, %s5186_s11 }
  0x6f   : > { %2252 = vrot.lane.b32.xlu0 %v5378_v32, %s5186_s11 }
  0x72   : > { %2258 = vrot.lane.b32.xlu1 %v5385_v33, %s5186_s11 }
  0x73   : > { %2256 = vrot.lane.b32.xlu0 %v5388_v34, %s5186_s11 }
  0x76   : > { %2262 = vrot.lane.b32.xlu1 %v5395_v35, %s5186_s11 }
  0x77   : > { %2260 = vrot.lane.b32.xlu0 %v5398_v36, %s5186_s11 }
  0x7a   : > { %2266 = vrot.lane.b32.xlu1 %v5405_v37, %s5186_s11 }
  0x7b   : > { %2264 = vrot.lane.b32.xlu0 %v5408_v38, %s5186_s11 }
  0x7e   : > { %2270 = vrot.lane.b32.xlu1 %v5415_v39, %s5186_s11 }
  0x7f   : > { %2268 = vrot.lane.b32.xlu0 %v5418_v40, %s5186_s11 }
  0x82   : > { %2274 = vrot.lane.b32.xlu1 %v5425_v41, %s5186_s11 }
  0x83   : > { %2272 = vrot.lane.b32.xlu0 %v5428_v42, %s5186_s11 }
  0x86   : > { %2278 = vrot.lane.b32.xlu1 %v5435_v43, %s5186_s11 }
  0x87   : > { %2276 = vrot.lane.b32.xlu0 %v5438_v44, %s5186_s11 }
  0x8a   : > { %2282 = vrot.lane.b32.xlu1 %v5445_v45, %s5186_s11 }
  0x8b   : > { %2280 = vrot.lane.b32.xlu0 %v5448_v46, %s5186_s11 }
  0x8d   : > { %v5536_v49 = vpop.permute.xlu1 %622 }
  0x8e   : > { %v5538_v50 = vpop.permute.xlu0 %612  ;;  %2286 = vrot.lane.b32.xlu1 %v5455_v47, %s5186_s11 }
  0x8f   : > { %2284 = vrot.lane.b32.xlu0 %v5458_v48, %s5186_s11  ;;  %s8084_s11 = scalar_lea.vmem %s8359_s9, %s4431_s20 }
  0x91   : > { %v5544_v51 = vpop.permute.xlu1 %627 }
  0x92   : > { %v5546_v52 = vpop.permute.xlu0 %617  ;;  %2354 = vrot.lane.b32.xlu1 %v5298_v10, %s5187_s12 }
  0x93   : > { %2352 = vrot.lane.b32.xlu0 %v5287_v7, %s5187_s12 }
  0x95   : > { %v5552_v53 = vpop.permute.xlu1 %637 }
  0x96   : > { %v5554_v54 = vpop.permute.xlu0 %632  ;;  %2358 = vrot.lane.b32.xlu1 %v5295_v9, %s5187_s12 }
  0x97   : > { %2356 = vrot.lane.b32.xlu0 %v5284_v6, %s5187_s12 }
  0x99   : > { %v5560_v55 = vpop.permute.xlu1 %647 }
  0x9a   : > { %v5562_v56 = vpop.permute.xlu0 %642  ;;  %2362 = vrot.lane.b32.xlu1 %v5310_v13, %s5187_s12 }
  0x9b   : > { %2360 = vrot.lane.b32.xlu0 %v5313_v14, %s5187_s12 }
  0x9d   : > { %v5568_v57 = vpop.permute.xlu1 %657 }
  0x9e   : > { %v5570_v58 = vpop.permute.xlu0 %652  ;;  %2366 = vrot.lane.b32.xlu1 %v5324_v17, %s5187_s12 }
  0x9f   : > { %2364 = vrot.lane.b32.xlu0 %v5327_v18, %s5187_s12 }
  0xa1   : > { %v5576_v59 = vpop.permute.xlu1 %667 }
  0xa2   : > { %v5578_v60 = vpop.permute.xlu0 %662  ;;  %2370 = vrot.lane.b32.xlu1 %v5338_v21, %s5187_s12 }
  0xa3   : > { %2368 = vrot.lane.b32.xlu0 %v5341_v22, %s5187_s12 }
  0xa5   : > { %v5584_v61 = vpop.permute.xlu1 %677 }
  0xa6   : > { %v5586_v62 = vpop.permute.xlu0 %672  ;;  %2374 = vrot.lane.b32.xlu1 %v5352_v25, %s5187_s12 }
  0xa7   : > { %2372 = vrot.lane.b32.xlu0 %v5355_v26, %s5187_s12 }
  0xa9   : > { %v5592_v63 = vpop.permute.xlu1 %687 }
  0xaa   : > { %v5594_v0 = vpop.permute.xlu0 %682  ;;  %2378 = vrot.lane.b32.xlu1 %v5366_v29, %s5187_s12 }
  0xab   : > { %2376 = vrot.lane.b32.xlu0 %v5369_v30, %s5187_s12 }
  0xad   : > { %v5600_v1 = vpop.permute.xlu1 %697 }
  0xae   : > { %v5602_v2 = vpop.permute.xlu0 %692  ;;  %2382 = vrot.lane.b32.xlu1 %v5375_v31, %s5187_s12 }
  0xaf   : > { %2380 = vrot.lane.b32.xlu0 %v5378_v32, %s5187_s12 }
  0xb1   : > { %v5608_v3 = vpop.permute.xlu1 %707 }
  0xb2   : > { %v5610_v4 = vpop.permute.xlu0 %702  ;;  %2386 = vrot.lane.b32.xlu1 %v5385_v33, %s5187_s12 }
  0xb3   : > { %2384 = vrot.lane.b32.xlu0 %v5388_v34, %s5187_s12 }
  0xb5   : > { %v5616_v5 = vpop.permute.xlu1 %717 }
  0xb6   : > { %v5618_v8 = vpop.permute.xlu0 %712  ;;  %2390 = vrot.lane.b32.xlu1 %v5395_v35, %s5187_s12 }
  0xb7   : > { %2388 = vrot.lane.b32.xlu0 %v5398_v36, %s5187_s12 }
  0xb9   : > { %v5624_v11 = vpop.permute.xlu1 %727 }
  0xba   : > { %v5626_v12 = vpop.permute.xlu0 %722  ;;  %2394 = vrot.lane.b32.xlu1 %v5405_v37, %s5187_s12 }
  0xbb   : > { %2392 = vrot.lane.b32.xlu0 %v5408_v38, %s5187_s12 }
  0xbd   : > { %v5632_v15 = vpop.permute.xlu1 %737 }
  0xbe   : > { %v5634_v16 = vpop.permute.xlu0 %732  ;;  %2398 = vrot.lane.b32.xlu1 %v5415_v39, %s5187_s12 }
  0xbf   : > { %2396 = vrot.lane.b32.xlu0 %v5418_v40, %s5187_s12 }
  0xc1   : > { %v5640_v19 = vpop.permute.xlu1 %747 }
  0xc2   : > { %v5642_v20 = vpop.permute.xlu0 %742  ;;  %2402 = vrot.lane.b32.xlu1 %v5425_v41, %s5187_s12 }
  0xc3   : > { %2400 = vrot.lane.b32.xlu0 %v5428_v42, %s5187_s12 }
  0xc5   : > { %v5648_v23 = vpop.permute.xlu1 %757 }
  0xc6   : > { %v5650_v24 = vpop.permute.xlu0 %752  ;;  %2406 = vrot.lane.b32.xlu1 %v5435_v43, %s5187_s12 }
  0xc7   : > { %2404 = vrot.lane.b32.xlu0 %v5438_v44, %s5187_s12 }
  0xc9   : > { %v5656_v27 = vpop.permute.xlu1 %767 }
  0xca   : > { %v5658_v28 = vpop.permute.xlu0 %762  ;;  %2410 = vrot.lane.b32.xlu1 %v5445_v45, %s5187_s12 }
  0xcb   : > { %2408 = vrot.lane.b32.xlu0 %v5448_v46, %s5187_s12 }
  0xcd   : > { %v5664_v39 = vpop.permute.xlu1 %2226 }
  0xce   : > { %v5666_v40 = vpop.permute.xlu0 %2224  ;;  %2414 = vrot.lane.b32.xlu1 %v5455_v47, %s5187_s12 }
  0xcf   : > { %2412 = vrot.lane.b32.xlu0 %v5458_v48, %s5187_s12 }
  0xd1   : > { %v5672_v41 = vpop.permute.xlu1 %2230 }
  0xd2   : > { %8462 = vst [vmem:[#allocation2_spill] sm:$0xff] %v5672_v41  ;;  %v5674_v42 = vpop.permute.xlu0 %2228  ;;  %2482 = vrot.lane.b32.xlu1 %v5298_v10, %s5188_s13 }
  0xd3   : > { %8463 = vst [vmem:[#allocation3_spill] sm:$0xff] %v5674_v42  ;;  %2480 = vrot.lane.b32.xlu0 %v5287_v7, %s5188_s13 }
  0xd5   : > { %v5680_v43 = vpop.permute.xlu1 %2234 }
  0xd6   : > { %8464 = vst [vmem:[#allocation4_spill] sm:$0xff] %v5680_v43  ;;  %v5682_v44 = vpop.permute.xlu0 %2232  ;;  %2486 = vrot.lane.b32.xlu1 %v5295_v9, %s5188_s13 }
  0xd7   : > { %8465 = vst [vmem:[#allocation5_spill] sm:$0xff] %v5682_v44  ;;  %2484 = vrot.lane.b32.xlu0 %v5284_v6, %s5188_s13 }
  0xd9   : > { %v5688_v45 = vpop.permute.xlu1 %2238 }
  0xda   : > { %8466 = vst [vmem:[#allocation6_spill] sm:$0xff] %v5688_v45  ;;  %v5690_v46 = vpop.permute.xlu0 %2236  ;;  %2490 = vrot.lane.b32.xlu1 %v5310_v13, %s5188_s13 }
  0xdb   : > { %8467 = vst [vmem:[#allocation7_spill] sm:$0xff] %v5690_v46  ;;  %2488 = vrot.lane.b32.xlu0 %v5313_v14, %s5188_s13 }
  0xdd   : > { %v5696_v7 = vpop.permute.xlu1 %2242 }
  0xde   : > { %8468 = vst [vmem:[#allocation8_spill] sm:$0xff] %v5696_v7  ;;  %v5698_v10 = vpop.permute.xlu0 %2240  ;;  %2494 = vrot.lane.b32.xlu1 %v5324_v17, %s5188_s13  ;;  %v5723_v17 = vld [vmem:[%s8352_s2] ss:$0 sm:$0xff] }
  0xdf   : > { %8469 = vst [vmem:[#allocation9_spill] sm:$0xff] %v5698_v10  ;;  %2492 = vrot.lane.b32.xlu0 %v5327_v18, %s5188_s13 }
  0xe1   : > { %v5704_v6 = vpop.permute.xlu1 %2246 }
  0xe2   : > { %8470 = vst [vmem:[#allocation10_spill] sm:$0xff] %v5704_v6  ;;  %v5706_v9 = vpop.permute.xlu0 %2244  ;;  %2498 = vrot.lane.b32.xlu1 %v5338_v21, %s5188_s13  ;;  %v777_v21 = vmul.f32 %v5723_v17, %v5546_v52 }
  0xe3   : > { %8471 = vst [vmem:[#allocation11_spill] sm:$0xff] %v5706_v9  ;;  %2496 = vrot.lane.b32.xlu0 %v5341_v22, %s5188_s13 }
  0xe5   : > { %v5712_v13 = vpop.permute.xlu1 %2250 }
  0xe6   : > { %8472 = vst [vmem:[#allocation12_spill] sm:$0xff] %v5712_v13  ;;  %v5714_v14 = vpop.permute.xlu0 %2248  ;;  %2502 = vrot.lane.b32.xlu1 %v5352_v25, %s5188_s13 }
  0xe7   : > { %8473 = vst [vmem:[#allocation13_spill] sm:$0xff] %v5714_v14  ;;  %2500 = vrot.lane.b32.xlu0 %v5355_v26, %s5188_s13  ;;  %v776_v26 = vmul.f32 %v5723_v17, %v5538_v50 }
  0xe9   : > { %v5725_v18 = vpop.permute.xlu1 %2254 }
  0xea   : > { %8474 = vst [vmem:[#allocation14_spill] sm:$0xff] %v5725_v18  ;;  %v5729_v22 = vpop.permute.xlu0 %2252  ;;  %2506 = vrot.lane.b32.xlu1 %v5366_v29, %s5188_s13 }
  0xeb   : > { %8475 = vst [vmem:[#allocation15_spill] sm:$0xff] %v5729_v22  ;;  %2504 = vrot.lane.b32.xlu0 %v5369_v30, %s5188_s13 }
  0xec   : > { %v4730_v25 = vpop.f32.mrf.mxu0 }
  0xed   : > { %v809_v47 = vmul.f32 %v4730_v25, %v777_v21  ;;  %v5737_v48 = vpop.permute.xlu1 %2258  ;;  %v779_v21 = vmul.f32 %v5723_v17, %v5544_v51  ;;  %v780_v51 = vmul.f32 %v5723_v17, %v5554_v54  ;;  %v5778_v54 = vmul.f32 %v5723_v17, %v5570_v58 }
  0xee   : > { %8476 = vst [vmem:[#allocation16_spill] sm:$0xff] %v5737_v48  ;;  %v450_v14 = vpop.f32.mrf.mxu0  ;;  %v5739_v13 = vpop.permute.xlu0 %2256  ;;  %2510 = vrot.lane.b32.xlu1 %v5375_v31, %s5188_s13  ;;  %v778_v31 = vmul.f32 %v5723_v17, %v5536_v49  ;;  %v5800_v58 = vmul.f32 %v5723_v17, %v5586_v62 }
  0xef   : > { %v4436_v18 = vclamps-f32 %v809_v47, 1.999999  ;;  %8477 = vst [vmem:[#allocation17_spill] sm:$0xff] %v5739_v13  ;;  %v808_v52 = vmul.f32 %v776_v26, %v450_v14  ;;  %2508 = vrot.lane.b32.xlu0 %v5378_v32, %s5188_s13  ;;  %v781_v14 = vmul.f32 %v5723_v17, %v5552_v53  ;;  %v783_v26 = vmul.f32 %v5723_v17, %v5560_v55 }
  0xf0   : > { %v4733_v29 = vpop.f32.mrf.mxu0  ;;  %v5774_v53 = vmul.f32 %v5723_v17, %v5568_v57  ;;  %v5796_v57 = vmul.f32 %v5723_v17, %v5584_v61  ;;  %v5814_v61 = vmul.f32 %v5723_v17, %v5600_v1  ;;  %v5829_v1 = vmul.f32 %v5723_v17, %v5610_v4 }
  0xf1   : > { %v5745_v30 = vand.u32 2147483647, %v4436_v18  ;;  %v5747_v22 = vpop.permute.xlu1 %2262  ;;  %v4435_v25 = vclamps-f32 %v808_v52, 1.999999  ;;  %v811_v18 = vmul.f32 %v4733_v29, %v779_v21 }
  0xf2   : > { %8478 = vst [vmem:[#allocation18_spill] sm:$0xff] %v5747_v22  ;;  %v460_v50 = vpop.f32.mrf.mxu0  ;;  %v5751_v47 = vpop.permute.xlu0 %2260  ;;  %2514 = vrot.lane.b32.xlu1 %v5385_v33, %s5188_s13 }
  0xf3   : > { %8479 = vst [vmem:[#allocation19_spill] sm:$0xff] %v5751_v47  ;;  %2512 = vrot.lane.b32.xlu0 %v5388_v34, %s5188_s13  ;;  %v969_v52 = vmul.f32 0.5, %v5745_v30  ;;  %v810_v33 = vmul.f32 %v778_v31, %v460_v50  ;;  %v5770_v34 = vmul.f32 %v5723_v17, %v5562_v56  ;;  %v5780_v29 = vand.u32 2147483647, %v4435_v25 }
  0xf4   : > { %v4736_v32 = vpop.f32.mrf.mxu0  ;;  %v5788_v50 = vmul.f32 %v5723_v17, %v5576_v59  ;;  %v5792_v56 = vmul.f32 %v5723_v17, %v5578_v60  ;;  %v5806_v59 = vmul.f32 %v5723_v17, %v5592_v63  ;;  %v5810_v60 = vmul.f32 %v5723_v17, %v5594_v0 }
  0xf5   : > { %v5766_v47 = vpop.permute.xlu1 %2266  ;;  %v4438_v21 = vclamps-f32 %v811_v18, 1.999999  ;;  %v4468_v25 = vadd.f32 -1.0, %v969_v52  ;;  %v1097_v62 = vsub.f32 2.0, %v5745_v30  ;;  %v4437_v31 = vclamps-f32 %v810_v33, 1.999999 }
  0xf6   : > { %8480 = vst [vmem:[#allocation20_spill] sm:$0xff] %v5766_v47  ;;  %v470_v49 = vpop.f32.mrf.mxu0  ;;  %v5782_v55 = vpop.permute.xlu0 %2264  ;;  %2518 = vrot.lane.b32.xlu1 %v5395_v35, %s5188_s13  ;;  %v5821_v63 = vmul.f32 %v5723_v17, %v5602_v2  ;;  %v5825_v0 = vmul.f32 %v5723_v17, %v5608_v3  ;;  %v968_v18 = vmul.f32 0.5, %v5780_v29  ;;  %v5842_v2 = vmul.f32 %v5723_v17, %v5618_v8 }
  0xf7   : > { %8481 = vst [vmem:[#allocation21_spill] sm:$0xff] %v5782_v55  ;;  %2516 = vrot.lane.b32.xlu0 %v5398_v36, %s5188_s13  ;;  %v813_v55 = vmul.f32 %v4736_v32, %v781_v14  ;;  %v5838_v32 = vmul.f32 %v5723_v17, %v5616_v5  ;;  %v937_v3 = vmul.f32 %v5745_v30, %v5745_v30  ;;  %v5860_v8 = vand.u32 2147483647, %v4438_v21 }
  0xf8   : > { %v4739_v35 = vpop.f32.mrf.mxu0  ;;  %v812_v4 = vmul.f32 %v780_v51, %v470_v49  ;;  %v5850_v33 = vmul.f32 %v5723_v17, %v5624_v11  ;;  %v5858_v5 = vmul.f32 %v5723_v17, %v5632_v15  ;;  %v1129_v22 = vmul.f32 %v1097_v62, %v1097_v62 }
  0xf9   : > { %v5817_v36 = vpop.permute.xlu1 %2270  ;;  %v4440_v51 = vclamps-f32 %v813_v55, 1.999999  ;;  %v5868_v11 = vmul.f32 %v5723_v17, %v5634_v16  ;;  %v5876_v15 = vmul.f32 %v5723_v17, %v5642_v20  ;;  %v4467_v21 = vadd.f32 -1.0, %v968_v18 }
  0xfa   : > { %8482 = vst [vmem:[#allocation22_spill] sm:$0xff] %v5817_v36  ;;  %v480_v47 = vpop.f32.mrf.mxu0  ;;  %v5832_v52 = vpop.permute.xlu0 %2268  ;;  %2522 = vrot.lane.b32.xlu1 %v5405_v37, %s5188_s13  ;;  %v5854_v37 = vmul.f32 %v5723_v17, %v5626_v12  ;;  %v1033_v36 = vmul.f32 %v4468_v25, %v937_v3  ;;  %v5872_v12 = vmul.f32 %v5723_v17, %v5640_v19  ;;  %v1096_v25 = vsub.f32 2.0, %v5780_v29 }
  0xfb   : > { %8483 = vst [vmem:[#allocation23_spill] sm:$0xff] %v5832_v52  ;;  %2520 = vrot.lane.b32.xlu0 %v5408_v38, %s5188_s13  ;;  %v5862_v52 = vand.u32 2147483647, %v4437_v31  ;;  %v5882_v55 = vmul.f32 %v5723_v17, %v5648_v23  ;;  %v4439_v3 = vclamps-f32 %v812_v4, 1.999999  ;;  %v815_v16 = vmul.f32 %v4739_v35, %v783_v26 }
  0xfc   : > { %v4742_v14 = vpop.f32.mrf.mxu0  ;;  %v5889_v19 = vmul.f32 %v5723_v17, %v5650_v24  ;;  %v5893_v20 = vmul.f32 %v5723_v17, %v5656_v27  ;;  %v936_v18 = vmul.f32 %v5780_v29, %v5780_v29  ;;  %v971_v23 = vmul.f32 0.5, %v5860_v8 }
  0xfd   : > { %v5864_v49 = vpop.permute.xlu1 %2274  ;;  %v5899_v13 = vand.u32 2147483647, %v4440_v51  ;;  %v1065_v26 = vadd.f32 0.6666667, %v1033_v36  ;;  %v1161_v35 = vmul.f32 %v1129_v22, %v1097_v62  ;;  %v5907_v24 = vmul.f32 %v5723_v17, %v5658_v28 }
  0xfe   : > { %8484 = vst [vmem:[#allocation24_spill] sm:$0xff] %v5864_v49  ;;  %v490_v38 = vpop.f32.mrf.mxu0  ;;  %v5878_v31 = vpop.permute.xlu0 %2272  ;;  %v939_v27 = vmul.f32 %v5860_v8, %v5860_v8  ;;  %v814_v9 = vmul.f32 %v5770_v34, %v480_v47  ;;  %v1032_v6 = vmul.f32 %v4467_v21, %v936_v18  ;;  %v5914_v51 = vand.u32 2147483647, %v4439_v3 }
  0xff   : > { %8485 = vst [vmem:[#allocation25_spill] sm:$0xff] %v5878_v31  ;;  %v970_v31 = vmul.f32 0.5, %v5862_v52  ;;  %v4442_v36 = vclamps-f32 %v815_v16, 1.999999  ;;  %v1193_v22 = vmul.f32 0.16666667, %v1161_v35  ;;  %v1128_v62 = vmul.f32 %v1096_v25, %v1096_v25 }
 0x100   : > { %v5885_v49 = vpop.f32.mrf.mxu0  ;;  %v4470_v7 = vadd.f32 -1.0, %v971_v23  ;;  %v1099_v46 = vsub.f32 2.0, %v5860_v8  ;;  %v938_v28 = vmul.f32 %v5862_v52, %v5862_v52  ;;  %vm1225_vm0 = vcmp.le.f32.partialorder %v5745_v30, 1.0  ;;  %v1430_v35 = vld [vmem:[%s8353_s3 + $0x70] sm:$0xff] }
 0x101   : > { %v5901_v4 = vpop.permute.xlu1 %2278  ;;  %v4469_v17 = vadd.f32 -1.0, %v970_v31  ;;  %v1098_v47 = vsub.f32 2.0, %v5862_v52  ;;  %v973_v34 = vmul.f32 0.5, %v5899_v13  ;;  %v5924_v21 = vsel %vm1225_vm0, %v1065_v26, %v1193_v22  ;;  %v1431_v26 = vld [vmem:[%s8353_s3 + $0x78] sm:$0xff] }
 0x102   : > { %8486 = vst [vmem:[#allocation26_spill] sm:$0xff] %v5901_v4  ;;  %v5903_v48 = vpop.f32.mrf.mxu0  ;;  %v5912_v10 = vpop.permute.xlu0 %2276  ;;  %8488 = vst [vmem:[#allocation28_spill] sm:$0xff] %v5924_v21  ;;  %v5930_v16 = vmul.f32 %v5899_v13, %v5899_v13  ;;  %v4441_v18 = vclamps-f32 %v814_v9, 1.999999  ;;  %1290 = vrot.lane.b32.xlu1 %v5924_v21, %s5189_s17  ;;  %v1064_v23 = vadd.f32 0.6666667, %v1032_v6  ;;  %v1160_v30 = vmul.f32 %v1128_v62, %v1096_v25 }
 0x103   : > { %8487 = vst [vmem:[#allocation27_spill] sm:$0xff] %v5912_v10  ;;  %v5943_v22 = vsub.f32 2.0, %v5899_v13  ;;  %v5947_v9 = vmul.f32 %v5914_v51, %v5914_v51  ;;  %v817_v6 = vmul.f32 %v4742_v14, %v5774_v53  ;;  %4776 = vmatprep.subr.mxu1 %v1431_v26  ;;  %v816_v62 = vmul.f32 %v5778_v54, %v490_v38 }
 0x104   : > { %v5916_v4 = vpop.f32.mrf.mxu0  ;;  %v1035_v10 = vmul.f32 %v4470_v7, %v939_v27  ;;  %v1131_v21 = vmul.f32 %v1099_v46, %v1099_v46  ;;  %4777 = vmatpush3.msra.mxu1 %v1431_v26  ;;  %v972_v45 = vmul.f32 0.5, %v5914_v51  ;;  %vm1224_vm1 = vcmp.le.f32.partialorder %v5780_v29, 1.0  ;;  %v1429_v7 = vld [vmem:[%s8353_s3 + $0x68] sm:$0xff]  ;;  %v1428_v29 = vld [vmem:[%s8353_s3 + $0x60] sm:$0xff] }
 0x105   : > { %v5926_v3 = vpop.permute.xlu1 %2282  ;;  %v1034_v44 = vmul.f32 %v4469_v17, %v938_v28  ;;  %v1130_v43 = vmul.f32 %v1098_v47, %v1098_v47  ;;  %4778 = vmatprep.subr.mxu1 %v1430_v35  ;;  %v4444_v27 = vclamps-f32 %v817_v6, 1.999999  ;;  %v4472_v17 = vadd.f32 -1.0, %v973_v34 }
 0x106   : > { %8489 = vst [vmem:[#allocation29_spill] sm:$0xff] %v5926_v3  ;;  %v5934_v31 = vpop.permute.xlu0 %2280  ;;  %v5949_v3 = vand.u32 2147483647, %v4442_v36  ;;  %v5952_v25 = vpop.f32.mrf.mxu0  ;;  %v5959_v36 = vand.u32 2147483647, %v4441_v18  ;;  %v1163_v41 = vmul.f32 %v1131_v21, %v1099_v46  ;;  %4779 = vmatpush3.msra.mxu1 %v1430_v35  ;;  %v1100_v21 = vsub.f32 2.0, %v5914_v51 }
 0x107   : > { %8490 = vst [vmem:[#allocation30_spill] sm:$0xff] %v5934_v31  ;;  %v1192_v31 = vmul.f32 0.16666667, %v1160_v30  ;;  %v1067_v14 = vadd.f32 0.6666667, %v1035_v10  ;;  %v1162_v10 = vmul.f32 %v1130_v43, %v1098_v47  ;;  %4780 = vmatprep.subr.mxu1 %v1429_v7  ;;  %v4471_v30 = vadd.f32 -1.0, %v972_v45 }
 0x108   : > { %v975_v38 = vmul.f32 0.5, %v5949_v3  ;;  %v1066_v28 = vadd.f32 0.6666667, %v1034_v44  ;;  %v5974_v46 = vpop.f32.mrf.mxu0  ;;  %v4443_v18 = vclamps-f32 %v816_v62, 1.999999  ;;  %4781 = vmatpush3.msra.mxu1 %v1429_v7  ;;  %vm1227_vm2 = vcmp.le.f32.partialorder %v5860_v8, 1.0 }
 0x109   : > { %v5957_v42 = vpop.permute.xlu1 %2286  ;;  %v5961_v53 = vsel %vm1224_vm1, %v1064_v23, %v1192_v31  ;;  %v1195_v23 = vmul.f32 0.16666667, %v1163_v41  ;;  %v819_v31 = vmul.f32 %v5885_v49, %v5788_v50  ;;  %v1194_v26 = vmul.f32 0.16666667, %v1162_v10  ;;  %4782 = vmatprep.subr.mxu1 %v1428_v29  ;;  %v1427_v45 = vld [vmem:[%s8353_s3 + $0x58] sm:$0xff]  ;;  %v1426_v50 = vld [vmem:[%s8353_s3 + $0x50] sm:$0xff] }
 0x10a   : > { %8491 = vst [vmem:[#allocation31_spill] sm:$0xff] %v5957_v42  ;;  %8492 = vst [vmem:[#allocation32_spill] sm:$0xff] %v5961_v53  ;;  %v5963_v54 = vpop.permute.xlu0 %2284  ;;  %1288 = vrot.lane.b32.xlu0 %v5961_v53, %s5189_s17  ;;  %v5984_v43 = vmul.f32 %v5949_v3, %v5949_v3  ;;  %v974_v44 = vmul.f32 0.5, %v5959_v36  ;;  %vm1226_vm3 = vcmp.le.f32.partialorder %v5862_v52, 1.0  ;;  %4783 = vmatpush3.msra.mxu1 %v1428_v29  ;;  %v4474_v8 = vadd.f32 -1.0, %v975_v38  ;;  %v6007_v6 = vpop.f32.mrf.mxu0 }
 0x10b   : > { %8493 = vst [vmem:[#allocation33_spill] sm:$0xff] %v5963_v54  ;;  %v5987_v47 = vsel %vm1227_vm2, %v1067_v14, %v1195_v23  ;;  %v5999_v49 = vsub.f32 2.0, %v5949_v3  ;;  %v6001_v34 = vand.u32 2147483647, %v4444_v27  ;;  %v6005_v52 = vsel %vm1226_vm3, %v1066_v28, %v1194_v26  ;;  %4784 = vmatprep.subr.mxu1 %v1427_v45  ;;  %v1425_v26 = vld [vmem:[%s8353_s3 + $0x48] sm:$0xff] }
 0x10c   : > { %8494 = vst [vmem:[#allocation34_spill] sm:$0xff] %v5987_v47  ;;  %1294 = vrot.lane.b32.xlu1 %v5987_v47, %s5189_s17  ;;  %8495 = vst [vmem:[#allocation35_spill] sm:$0xff] %v6005_v52  ;;  %v6009_v62 = vand.u32 2147483647, %v4443_v18  ;;  %v818_v14 = vmul.f32 %v5792_v56, %v5903_v48  ;;  %v1037_v7 = vmul.f32 %v4472_v17, %v5930_v16  ;;  %4785 = vmatpush3.msra.mxu1 %v1427_v45 }
 0x10d   : > { %v5980_v35 = vpop.permute.xlu1 %2354  ;;  %v1133_v29 = vmul.f32 %v5943_v22, %v5943_v22  ;;  %v942_v38 = vmul.f32 %v5959_v36, %v5959_v36  ;;  %v4446_v27 = vclamps-f32 %v819_v31, 1.999999  ;;  %v1036_v28 = vmul.f32 %v4471_v30, %v5947_v9  ;;  %4786 = vmatprep.subr.mxu1 %v1426_v50  ;;  %v1424_v9 = vld [vmem:[%s8353_s3 + $0x40] sm:$0xff] }
 0x10e   : > { %v5990_v41 = vpop.permute.xlu0 %2352  ;;  %1292 = vrot.lane.b32.xlu0 %v6005_v52, %s5189_s17  ;;  %v1132_v10 = vmul.f32 %v1100_v21, %v1100_v21  ;;  %v4473_v48 = vadd.f32 -1.0, %v974_v44  ;;  %v1102_v56 = vsub.f32 2.0, %v5959_v36  ;;  %v1069_v23 = vadd.f32 0.6666667, %v1037_v7  ;;  %4787 = vmatpush3.msra.mxu1 %v1426_v50 }
 0x10f   : > { %v1165_v16 = vmul.f32 %v1133_v29, %v5943_v22  ;;  %v6035_v30 = vmul.f32 %v6001_v34, %v6001_v34  ;;  %v977_v31 = vmul.f32 0.5, %v6001_v34  ;;  %v1068_v44 = vadd.f32 0.6666667, %v1036_v28  ;;  %v6038_v22 = vpop.f32.mrf.mxu0  ;;  %4788 = vmatprep.subr.mxu1 %v1425_v26 }
 0x110   : > { %v1164_v45 = vmul.f32 %v1132_v10, %v1100_v21  ;;  %v976_v50 = vmul.f32 0.5, %v6009_v62  ;;  %v4445_v7 = vclamps-f32 %v818_v14, 1.999999  ;;  %v821_v29 = vmul.f32 %v5916_v4, %v5796_v57  ;;  %4789 = vmatpush3.msra.mxu1 %v1425_v26 }
 0x111   : > { %v6021_v18 = vpop.permute.xlu1 %2358  ;;  %v1197_v54 = vmul.f32 0.16666667, %v1165_v16  ;;  %v6043_v42 = vand.u32 2147483647, %v4446_v27  ;;  %v820_v52 = vmul.f32 %v5800_v58, %v5952_v25  ;;  %vm1229_vm4 = vcmp.le.f32.partialorder %v5899_v13, 1.0  ;;  %4790 = vmatprep.subr.mxu1 %v1424_v9  ;;  %v1423_v13 = vld [vmem:[%s8353_s3 + $0x38] sm:$0xff] }
 0x112   : > { %v6025_v17 = vpop.permute.xlu0 %2356  ;;  %v1196_v28 = vmul.f32 0.16666667, %v1164_v45  ;;  %v6051_v10 = vsub.f32 2.0, %v6001_v34  ;;  %v6055_v14 = vmul.f32 %v6009_v62, %v6009_v62  ;;  %vm1228_vm5 = vcmp.le.f32.partialorder %v5914_v51, 1.0  ;;  %4791 = vmatpush3.msra.mxu1 %v1424_v9  ;;  %v1422_v58 = vld [vmem:[%s8353_s3 + $0x30] sm:$0xff] }
 0x113   : > { %v6057_v57 = vsel %vm1229_vm4, %v1069_v23, %v1197_v54  ;;  %v4476_v25 = vadd.f32 -1.0, %v977_v31  ;;  %v6069_v27 = vsub.f32 2.0, %v6009_v62  ;;  %v1039_v51 = vmul.f32 %v4474_v8, %v5984_v43  ;;  %v530_v23 = vpop.f32.mrf.mxu0  ;;  %4792 = vmatprep.subr.mxu1 %v1423_v13 }
 0x114   : > { %8496 = vst [vmem:[#allocation36_spill] sm:$0xff] %v6057_v57  ;;  %1298 = vrot.lane.b32.xlu1 %v6057_v57, %s5189_s17  ;;  %v6073_v54 = vsel %vm1228_vm5, %v1068_v44, %v1196_v28  ;;  %v6076_v16 = vand.u32 2147483647, %v4445_v7  ;;  %v4448_v26 = vclamps-f32 %v821_v29, 1.999999  ;;  %v1135_v9 = vmul.f32 %v5999_v49, %v5999_v49  ;;  %4793 = vmatpush3.msra.mxu1 %v1423_v13 }
 0x115   : > { %v6048_v21 = vpop.permute.xlu1 %2362  ;;  %8497 = vst [vmem:[#allocation37_spill] sm:$0xff] %v6073_v54  ;;  %1296 = vrot.lane.b32.xlu0 %v6073_v54, %s5189_s17  ;;  %v1038_v31 = vmul.f32 %v4473_v48, %v942_v38  ;;  %v4475_v45 = vadd.f32 -1.0, %v976_v50  ;;  %v6084_v44 = vmul.f32 %v6043_v42, %v6043_v42  ;;  %v4447_v28 = vclamps-f32 %v820_v52, 1.999999  ;;  %4794 = vmatprep.subr.mxu1 %v1422_v58  ;;  %v1421_v48 = vld [vmem:[%s8353_s3 + $0x28] sm:$0xff]  ;;  %v1420_v52 = vld [vmem:[%s8353_s3 + $0x20] sm:$0xff] }
 0x116   : > { %v6060_v4 = vpop.permute.xlu0 %2360  ;;  %v1134_v43 = vmul.f32 %v1102_v56, %v1102_v56  ;;  %v979_v7 = vmul.f32 0.5, %v6043_v42  ;;  %v823_v29 = vmul.f32 %v5974_v46, %v5806_v59  ;;  %v1071_v54 = vadd.f32 0.6666667, %v1039_v51  ;;  %4795 = vmatpush3.msra.mxu1 %v1422_v58 }
 0x117   : > { %v1167_v57 = vmul.f32 %v1135_v9, %v5999_v49  ;;  %v6101_v50 = vsub.f32 2.0, %v6043_v42  ;;  %v822_v59 = vmul.f32 %v5810_v60, %v6007_v6  ;;  %v1070_v46 = vadd.f32 0.6666667, %v1038_v31  ;;  %v4757_v49 = vpop.f32.mrf.mxu0  ;;  %4796 = vmatprep.subr.mxu1 %v1421_v48 }
 0x118   : > { %v1166_v13 = vmul.f32 %v1134_v43, %v1102_v56  ;;  %v6107_v58 = vmul.f32 %v6076_v16, %v6076_v16  ;;  %v978_v51 = vmul.f32 0.5, %v6076_v16  ;;  %v6110_v9 = vand.u32 2147483647, %v4448_v26  ;;  %4797 = vmatpush3.msra.mxu1 %v1421_v48 }
 0x119   : > { %v6086_v8 = vpop.permute.xlu1 %2366  ;;  %v1199_v47 = vmul.f32 0.16666667, %v1167_v57  ;;  %v6113_v53 = vsub.f32 2.0, %v6076_v16  ;;  %vm1231_vm6 = vcmp.le.f32.partialorder %v5949_v3, 1.0  ;;  %4798 = vmatprep.subr.mxu1 %v1420_v52  ;;  %v4450_v56 = vclamps-f32 %v823_v29, 1.999999 }
 0x11a   : > { %v6092_v38 = vpop.permute.xlu0 %2364  ;;  %v1198_v60 = vmul.f32 0.16666667, %v1166_v13  ;;  %vm1230_vm7 = vcmp.le.f32.partialorder %v5959_v36, 1.0  ;;  %v1041_v26 = vmul.f32 %v4476_v25, %v6035_v30  ;;  %4799 = vmatpush3.msra.mxu1 %v1420_v52  ;;  %v1418_v3 = vld [vmem:[%s8353_s3 + $0x10] sm:$0xff]  ;;  %v4478_v43 = vadd.f32 -1.0, %v979_v7  ;;  %v540_v30 = vpop.f32.mrf.mxu0 }
 0x11b   : > { %8498 = vst [vmem:[#allocation38_spill] sm:$0xff] %v6092_v38  ;;  %v6115_v38 = vand.u32 2147483647, %v4447_v28  ;;  %v6120_v31 = vsel %vm1231_vm6, %v1071_v54, %v1199_v47  ;;  %v1419_v28 = vld [vmem:[%s8353_s3 + $0x18] sm:$0xff]  ;;  %v4449_v48 = vclamps-f32 %v822_v59, 1.999999  ;;  %v1137_v36 = vmul.f32 %v6051_v10, %v6051_v10 }
 0x11c   : > { %8499 = vst [vmem:[#allocation39_spill] sm:$0xff] %v6120_v31  ;;  %1302 = vrot.lane.b32.xlu1 %v6120_v31, %s5189_s17  ;;  %v6134_v47 = vsel %vm1230_vm7, %v1070_v46, %v1198_v60  ;;  %4800 = vmatprep.subr.mxu1 %v1419_v28  ;;  %v4477_v25 = vadd.f32 -1.0, %v978_v51  ;;  %v825_v54 = vmul.f32 %v6038_v22, %v5814_v61  ;;  %v981_v52 = vmul.f32 0.5, %v6110_v9 }
 0x11d   : > { %v6118_v6 = vpop.permute.xlu1 %2370  ;;  %8501 = vst [vmem:[#allocation41_spill] sm:$0xff] %v6134_v47  ;;  %1300 = vrot.lane.b32.xlu0 %v6134_v47, %s5189_s17  ;;  %v824_v7 = vmul.f32 %v5821_v63, %v530_v23  ;;  %v1040_v29 = vmul.f32 %v4475_v45, %v6055_v14  ;;  %4801 = vmatpush3.msra.mxu1 %v1419_v28  ;;  %v1073_v59 = vadd.f32 0.6666667, %v1041_v26  ;;  %v6155_v61 = vsub.f32 2.0, %v6110_v9  ;;  %v1416_v23 = vld [vmem:[%s8353_s3] sm:$0xff]  ;;  %v4760_v47 = vpop.f32.mrf.mxu0 }
 0x11e   : > { %v6124_v57 = vpop.permute.xlu0 %2368  ;;  %v1169_v46 = vmul.f32 %v1137_v36, %v6051_v10  ;;  %v1136_v13 = vmul.f32 %v6069_v27, %v6069_v27  ;;  %4802 = vmatprep.subr.mxu1 %v1418_v3  ;;  %v6152_v60 = vmul.f32 %v6110_v9, %v6110_v9  ;;  %v980_v63 = vmul.f32 0.5, %v6115_v38  ;;  %v1417_v10 = vld [vmem:[%s8353_s3 + $0x8] sm:$0xff] }
 0x11f   : > { %8500 = vst [vmem:[#allocation40_spill] sm:$0xff] %v6124_v57  ;;  %v6158_v22 = vand.u32 2147483647, %v4450_v56  ;;  %4803 = vmatpush3.msra.mxu1 %v1418_v3  ;;  %v6168_v45 = vand.u32 2147483647, %v4449_v48  ;;  %v6173_v56 = vmul.f32 %v6115_v38, %v6115_v38  ;;  %vm1233_vm8 = vcmp.le.f32.partialorder %v6001_v34, 1.0 }
 0x120   : > { %v1201_v26 = vmul.f32 0.16666667, %v1169_v46  ;;  %v1072_v28 = vadd.f32 0.6666667, %v1040_v29  ;;  %v1168_v36 = vmul.f32 %v1136_v13, %v6069_v27  ;;  %4804 = vmatprep.subr.mxu1 %v1417_v10  ;;  %v4452_v3 = vclamps-f32 %v825_v54, 1.999999 }
 0x121   : > { %v6148_v51 = vpop.permute.xlu1 %2374  ;;  %v4451_v31 = vclamps-f32 %v824_v7, 1.999999  ;;  %4805 = vmatpush3.msra.mxu1 %v1417_v10  ;;  %v827_v29 = vmul.f32 %v4757_v49, %v5825_v0  ;;  %v4480_v13 = vadd.f32 -1.0, %v981_v52  ;;  %vm1232_vm9 = vcmp.le.f32.partialorder %v6009_v62, 1.0 }
 0x122   : > { %8502 = vst [vmem:[#allocation42_spill] sm:$0xff] %v6148_v51  ;;  %v6160_v14 = vpop.permute.xlu0 %2372  ;;  %v6179_v48 = vsel %vm1233_vm8, %v1073_v59, %v1201_v26  ;;  %v1200_v46 = vmul.f32 0.16666667, %v1168_v36  ;;  %4806 = vmatprep.subr.mxu1 %v1416_v23  ;;  %v983_v51 = vmul.f32 0.5, %v6158_v22  ;;  %v1043_v34 = vmul.f32 %v4478_v43, %v6084_v44  ;;  %v550_v59 = vpop.f32.mrf.mxu0 }
 0x123   : > { %8503 = vst [vmem:[#allocation43_spill] sm:$0xff] %v6160_v14  ;;  %v6177_v14 = vsub.f32 2.0, %v6115_v38  ;;  %8504 = vst [vmem:[#allocation44_spill] sm:$0xff] %v6179_v48  ;;  %1306 = vrot.lane.b32.xlu1 %v6179_v48, %s5189_s17  ;;  %4807 = vmatpush3.msra.mxu1 %v1416_v23  ;;  %v4479_v7 = vadd.f32 -1.0, %v980_v63  ;;  %v6193_v0 = vmul.f32 %v6158_v22, %v6158_v22  ;;  %v982_v10 = vmul.f32 0.5, %v6168_v45 }
 0x124   : > { %v6195_v49 = vsel %vm1232_vm9, %v1072_v28, %v1200_v46  ;;  %v826_v52 = vmul.f32 %v5829_v1, %v540_v30  ;;  %v6199_v26 = vand.u32 2147483647, %v4452_v3  ;;  %v6201_v62 = vand.u32 2147483647, %v4451_v31 }
 0x125   : > { %v6182_v27 = vpop.permute.xlu1 %2378  ;;  %8507 = vst [vmem:[#allocation47_spill] sm:$0xff] %v6195_v49  ;;  %1304 = vrot.lane.b32.xlu0 %v6195_v49, %s5189_s17  ;;  %v1139_v44 = vmul.f32 %v6101_v50, %v6101_v50  ;;  %v6208_v43 = vsub.f32 2.0, %v6158_v22  ;;  %v4454_v63 = vclamps-f32 %v827_v29, 1.999999  ;;  %v1042_v23 = vmul.f32 %v4477_v25, %v6107_v58  ;;  %v4763_v25 = vpop.f32.mrf.mxu0 }
 0x126   : > { %8505 = vst [vmem:[#allocation45_spill] sm:$0xff] %v6182_v27  ;;  %v6189_v54 = vpop.permute.xlu0 %2376  ;;  %v1138_v1 = vmul.f32 %v6113_v53, %v6113_v53  ;;  %v4482_v28 = vadd.f32 -1.0, %v983_v51  ;;  %v950_v31 = vmul.f32 %v6168_v45, %v6168_v45  ;;  %v1075_v36 = vadd.f32 0.6666667, %v1043_v34 }
 0x127   : > { %8506 = vst [vmem:[#allocation46_spill] sm:$0xff] %v6189_v54  ;;  %v1171_v3 = vmul.f32 %v1139_v44, %v6101_v50  ;;  %v6221_v49 = vsub.f32 2.0, %v6168_v45  ;;  %v4453_v29 = vclamps-f32 %v826_v52, 1.999999  ;;  %v1074_v48 = vadd.f32 0.6666667, %v1042_v23 }
 0x128   : > { %v1170_v58 = vmul.f32 %v1138_v1, %v6113_v53  ;;  %v4481_v54 = vadd.f32 -1.0, %v982_v10  ;;  %v984_v51 = vmul.f32 0.5, %v6201_v62  ;;  %v6226_v57 = vand.u32 2147483647, %v4454_v63 }
 0x129   : > { %v6213_v30 = vpop.permute.xlu1 %2382  ;;  %v1203_v27 = vmul.f32 0.16666667, %v1171_v3  ;;  %vm1235_vm10 = vcmp.le.f32.partialorder %v6043_v42, 1.0  ;;  %v1045_v34 = vmul.f32 %v4480_v13, %v6152_v60  ;;  %vm1234_vm11 = vcmp.le.f32.partialorder %v6076_v16, 1.0 }
 0x12a   : > { %8508 = vst [vmem:[#allocation48_spill] sm:$0xff] %v6213_v30  ;;  %v6218_v46 = vpop.permute.xlu0 %2380  ;;  %v985_v30 = vmul.f32 0.5, %v6199_v26  ;;  %v1202_v50 = vmul.f32 0.16666667, %v1170_v58  ;;  %v829_v53 = vmul.f32 %v4760_v47, %v5838_v32  ;;  %v1141_v10 = vmul.f32 %v6155_v61, %v6155_v61 }
 0x12b   : > { %v6232_v52 = vsel %vm1235_vm10, %v1075_v36, %v1203_v27  ;;  %v6242_v63 = vmul.f32 %v6199_v26, %v6199_v26  ;;  %v6244_v42 = vand.u32 2147483647, %v4453_v29  ;;  %v828_v16 = vmul.f32 %v5842_v2, %v550_v59  ;;  %v560_v27 = vpop.f32.mrf.mxu0 }
 0x12c   : > { %8509 = vst [vmem:[#allocation49_spill] sm:$0xff] %v6232_v52  ;;  %1310 = vrot.lane.b32.xlu1 %v6232_v52, %s5189_s17  ;;  %v6248_v60 = vsel %vm1234_vm11, %v1074_v48, %v1202_v50  ;;  %v1077_v32 = vadd.f32 0.6666667, %v1045_v34  ;;  %v1173_v47 = vmul.f32 %v1141_v10, %v6155_v61  ;;  %v1044_v13 = vmul.f32 %v4479_v7, %v6173_v56 }
 0x12d   : > { %v6230_v44 = vpop.permute.xlu1 %2386  ;;  %8511 = vst [vmem:[#allocation51_spill] sm:$0xff] %v6248_v60  ;;  %1308 = vrot.lane.b32.xlu0 %v6248_v60, %s5189_s17  ;;  %v1140_v1 = vmul.f32 %v6177_v14, %v6177_v14  ;;  %v6257_v36 = vadd.f32 -1.0, %v985_v30  ;;  %v6260_v3 = vsub.f32 2.0, %v6199_v26  ;;  %v6264_v2 = vmul.f32 %v6201_v62, %v6201_v62  ;;  %v4766_v10 = vpop.f32.mrf.mxu0 }
 0x12e   : > { %v6238_v23 = vpop.permute.xlu0 %2384  ;;  %v6267_v48 = vsub.f32 2.0, %v6201_v62  ;;  %v6271_v61 = vadd.f32 -1.0, %v984_v51  ;;  %v6275_v56 = vmul.f32 %v6226_v57, %v6226_v57  ;;  %v4456_v7 = vclamps-f32 %v829_v53, 1.999999 }
 0x12f   : > { %8510 = vst [vmem:[#allocation50_spill] sm:$0xff] %v6238_v23  ;;  %v1205_v30 = vmul.f32 0.16666667, %v1173_v47  ;;  %v987_v58 = vmul.f32 0.5, %v6226_v57  ;;  %vm1237_vm12 = vcmp.le.f32.partialorder %v6110_v9, 1.0  ;;  %v1172_v34 = vmul.f32 %v1140_v1, %v6177_v14 }
 0x130   : > { %v1076_v50 = vadd.f32 0.6666667, %v1044_v13  ;;  %v6283_v60 = vsub.f32 2.0, %v6226_v57  ;;  %v986_v51 = vmul.f32 0.5, %v6244_v42  ;;  %v4455_v52 = vclamps-f32 %v828_v16, 1.999999 }
 0x131   : > { %v6269_v59 = vpop.permute.xlu1 %2390  ;;  %v1204_v53 = vmul.f32 0.16666667, %v1172_v34  ;;  %v831_v47 = vmul.f32 %v4763_v25, %v5850_v33  ;;  %v1047_v9 = vmul.f32 %v4482_v28, %v6193_v0  ;;  %v1143_v14 = vmul.f32 %v6208_v43, %v6208_v43  ;;  %v570_v25 = vpop.f32.mrf.mxu0 }
 0x132   : > { %8512 = vst [vmem:[#allocation52_spill] sm:$0xff] %v6269_v59  ;;  %v6277_v29 = vpop.permute.xlu0 %2388  ;;  %v6286_v59 = vsel %vm1237_vm12, %v1077_v32, %v1205_v30  ;;  %v6296_v1 = vand.u32 2147483647, %v4456_v7  ;;  %vm1236_vm13 = vcmp.le.f32.partialorder %v6115_v38, 1.0  ;;  %v1046_v16 = vmul.f32 %v4481_v54, %v950_v31 }
 0x133   : > { %8513 = vst [vmem:[#allocation53_spill] sm:$0xff] %v6277_v29  ;;  %8514 = vst [vmem:[#allocation54_spill] sm:$0xff] %v6286_v59  ;;  %1314 = vrot.lane.b32.xlu1 %v6286_v59, %s5189_s17  ;;  %v1142_v32 = vmul.f32 %v6221_v49, %v6221_v49  ;;  %v6303_v34 = vsel %vm1236_vm13, %v1076_v50, %v1204_v53  ;;  %v830_v33 = vmul.f32 %v5854_v37, %v560_v27 }
 0x134   : > { %8517 = vst [vmem:[#allocation57_spill] sm:$0xff] %v6303_v34  ;;  %v1079_v0 = vadd.f32 0.6666667, %v1047_v9  ;;  %v1175_v28 = vmul.f32 %v1143_v14, %v6208_v43  ;;  %v6307_v59 = vadd.f32 -1.0, %v987_v58  ;;  %v6309_v7 = vand.u32 2147483647, %v4455_v52  ;;  %1312 = vrot.lane.b32.xlu0 %v6303_v34, %s5189_s17 }
 0x135   : > { %v6294_v13 = vpop.permute.xlu1 %2394  ;;  %v1078_v38 = vadd.f32 0.6666667, %v1046_v16  ;;  %v1174_v54 = vmul.f32 %v1142_v32, %v6221_v49  ;;  %v6316_v31 = vmul.f32 %v6244_v42, %v6244_v42  ;;  %v6319_v37 = vsub.f32 2.0, %v6244_v42  ;;  %v4769_v16 = vpop.f32.mrf.mxu0 }
 0x136   : > { %8515 = vst [vmem:[#allocation55_spill] sm:$0xff] %v6294_v13  ;;  %v6301_v30 = vpop.permute.xlu0 %2392  ;;  %v4458_v27 = vclamps-f32 %v831_v47, 1.999999  ;;  %v1207_v43 = vmul.f32 0.16666667, %v1175_v28  ;;  %v4485_v58 = vadd.f32 -1.0, %v986_v51  ;;  %v6325_v52 = vmul.f32 %v6296_v1, %v6296_v1 }
 0x137   : > { %8516 = vst [vmem:[#allocation56_spill] sm:$0xff] %v6301_v30  ;;  %vm1239_vm14 = vcmp.le.f32.partialorder %v6158_v22, 1.0  ;;  %v1206_v53 = vmul.f32 0.16666667, %v1174_v54  ;;  %v4457_v9 = vclamps-f32 %v830_v33, 1.999999  ;;  %v833_v47 = vmul.f32 %v4766_v10, %v5858_v5 }
 0x138   : > { %v6330_v14 = vsel %vm1239_vm14, %v1079_v0, %v1207_v43  ;;  %vm1238_vm15 = vcmp.le.f32.partialorder %v6168_v45, 1.0  ;;  %v989_v32 = vmul.f32 0.5, %v6296_v1  ;;  %v6336_v51 = vsub.f32 2.0, %v6296_v1 }
 0x139   : > { %v6321_v50 = vpop.permute.xlu1 %2398  ;;  %8520 = vst [vmem:[#allocation60_spill] sm:$0xff] %v6330_v14  ;;  %v988_v28 = vmul.f32 0.5, %v6309_v7  ;;  %1318 = vrot.lane.b32.xlu1 %v6330_v14, %s5189_s17  ;;  %v6341_v22 = vsel %vm1238_vm15, %v1078_v38, %v1206_v53  ;;  %v6343_v33 = vand.u32 2147483647, %v4458_v27  ;;  %v832_v5 = vmul.f32 %v5868_v11, %v570_v25 }
 0x13a   : > { %8518 = vst [vmem:[#allocation58_spill] sm:$0xff] %v6321_v50  ;;  %v6328_v49 = vpop.permute.xlu0 %2396  ;;  %8521 = vst [vmem:[#allocation61_spill] sm:$0xff] %v6341_v22  ;;  %1316 = vrot.lane.b32.xlu0 %v6341_v22, %s5189_s17  ;;  %v1049_v45 = vmul.f32 %v6257_v36, %v6242_v63  ;;  %v1145_v10 = vmul.f32 %v6260_v3, %v6260_v3  ;;  %v6356_v54 = vmul.f32 %v6309_v7, %v6309_v7 }
 0x13b   : > { %8519 = vst [vmem:[#allocation59_spill] sm:$0xff] %v6328_v49  ;;  %v6359_v38 = vsub.f32 2.0, %v6309_v7  ;;  %v1048_v27 = vmul.f32 %v6271_v61, %v6264_v2  ;;  %v1144_v11 = vmul.f32 %v6267_v48, %v6267_v48  ;;  %v6367_v63 = vand.u32 2147483647, %v4457_v9 }
 0x13c   : > { %v4460_v36 = vclamps-f32 %v833_v47, 1.999999  ;;  %v1081_v43 = vadd.f32 0.6666667, %v1049_v45  ;;  %v1177_v53 = vmul.f32 %v1145_v10, %v6260_v3  ;;  %v4488_v49 = vadd.f32 -1.0, %v989_v32 }
 0x13d   : > { %v6352_v0 = vpop.permute.xlu1 %2402  ;;  %v6370_v50 = vadd.f32 -1.0, %v988_v28  ;;  %v1080_v22 = vadd.f32 0.6666667, %v1048_v27  ;;  %v1176_v14 = vmul.f32 %v1144_v11, %v6267_v48  ;;  %v6375_v2 = vmul.f32 %v6343_v33, %v6343_v33 }
 0x13e   : > { %8522 = vst [vmem:[#allocation62_spill] sm:$0xff] %v6352_v0  ;;  %v6365_v25 = vpop.permute.xlu0 %2400  ;;  %v580_v0 = vpop.f32.mrf.mxu0  ;;  %v4459_v61 = vclamps-f32 %v832_v5, 1.999999  ;;  %v1209_v34 = vmul.f32 0.16666667, %v1177_v53  ;;  %v835_v9 = vmul.f32 %v4769_v16, %v5872_v12  ;;  %v991_v47 = vmul.f32 0.5, %v6343_v33 }
 0x13f   : > { %8523 = vst [vmem:[#allocation63_spill] sm:$0xff] %v6365_v25  ;;  %v6382_v3 = vsub.f32 2.0, %v6343_v33  ;;  %vm1241_vm0 = vcmp.le.f32.partialorder %v6199_v26, 1.0  ;;  %v1208_v32 = vmul.f32 0.16666667, %v1176_v14  ;;  %v990_v48 = vmul.f32 0.5, %v6367_v63 }
 0x140   : > { %v6388_v45 = vand.u32 2147483647, %v4460_v36  ;;  %v6390_v5 = vsel %vm1241_vm0, %v1081_v43, %v1209_v34  ;;  %vm1240_vm1 = vcmp.le.f32.partialorder %v6201_v62, 1.0  ;;  %v4772_v12 = vpop.f32.mrf.mxu0  ;;  %v6395_v16 = vmul.f32 %v6367_v63, %v6367_v63 }
 0x141   : > { %v6378_v25 = vpop.permute.xlu1 %2406  ;;  %8526 = vst [vmem:[#allocation66_spill] sm:$0xff] %v6390_v5  ;;  %1322 = vrot.lane.b32.xlu1 %v6390_v5, %s5189_s17  ;;  %v6399_v26 = vsel %vm1240_vm1, %v1080_v22, %v1208_v32  ;;  %v834_v14 = vmul.f32 %v5876_v15, %v580_v0  ;;  %v1051_v10 = vmul.f32 %v6307_v59, %v6275_v56  ;;  %v6404_v27 = vand.u32 2147483647, %v4459_v61 }
 0x142   : > { %8524 = vst [vmem:[#allocation64_spill] sm:$0xff] %v6378_v25  ;;  %v6385_v28 = vpop.permute.xlu0 %2404  ;;  %8527 = vst [vmem:[#allocation67_spill] sm:$0xff] %v6399_v26  ;;  %1320 = vrot.lane.b32.xlu0 %v6399_v26, %s5189_s17  ;;  %v4462_v62 = vclamps-f32 %v835_v9, 1.999999  ;;  %v1147_v34 = vmul.f32 %v6283_v60, %v6283_v60  ;;  %v1050_v11 = vmul.f32 %v4485_v58, %v6316_v31  ;;  %v6413_v22 = vadd.f32 -1.0, %v991_v47  ;;  %v590_v61 = vpop.f32.mrf.mxu0 }
 0x143   : > { %8525 = vst [vmem:[#allocation65_spill] sm:$0xff] %v6385_v28  ;;  %v6416_v15 = vsub.f32 2.0, %v6367_v63  ;;  %v4461_v0 = vclamps-f32 %v834_v14, 1.999999  ;;  %v1146_v59 = vmul.f32 %v6319_v37, %v6319_v37  ;;  %v6422_v43 = vadd.f32 -1.0, %v990_v48 }
 0x144   : > { %v6426_v53 = vmul.f32 %v6388_v45, %v6388_v45  ;;  %v1083_v31 = vadd.f32 0.6666667, %v1051_v10  ;;  %v1179_v58 = vmul.f32 %v1147_v34, %v6283_v60  ;;  %v993_v9 = vmul.f32 0.5, %v6388_v45 }
 0x145   : > { %v6411_v36 = vpop.permute.xlu1 %2410  ;;  %v1082_v47 = vadd.f32 0.6666667, %v1050_v11  ;;  %v1178_v32 = vmul.f32 %v1146_v59, %v6319_v37  ;;  %v837_v14 = vmul.f32 %v4772_v12, %v5882_v55  ;;  %v992_v48 = vmul.f32 0.5, %v6404_v27  ;;  %v4775_v11 = vpop.f32.mrf.mxu0 }
 0x146   : > { %8528 = vst [vmem:[#allocation68_spill] sm:$0xff] %v6411_v36  ;;  %v6420_v56 = vpop.permute.xlu0 %2408  ;;  %v6433_v36 = vsub.f32 2.0, %v6388_v45  ;;  %v1211_v28 = vmul.f32 0.16666667, %v1179_v58  ;;  %v6440_v10 = vand.u32 2147483647, %v4461_v0  ;;  %v836_v34 = vmul.f32 %v5889_v19, %v590_v61 }
 0x147   : > { %8529 = vst [vmem:[#allocation69_spill] sm:$0xff] %v6420_v56  ;;  %v6436_v56 = vand.u32 2147483647, %v4462_v62  ;;  %vm1243_vm2 = vcmp.le.f32.partialorder %v6226_v57, 1.0  ;;  %v1210_v60 = vmul.f32 0.16666667, %v1178_v32  ;;  %v1053_v62 = vmul.f32 %v4488_v49, %v6325_v52 }
 0x148   : > { %vm1242_vm3 = vcmp.le.f32.partialorder %v6244_v42, 1.0  ;;  %v6446_v55 = vsel %vm1243_vm2, %v1083_v31, %v1211_v28  ;;  %v4464_v12 = vclamps-f32 %v837_v14, 1.999999  ;;  %v6452_v59 = vmul.f32 %v6404_v27, %v6404_v27 }
 0x149   : > { %v6438_v25 = vpop.permute.xlu1 %2414  ;;  %8532 = vst [vmem:[#allocation72_spill] sm:$0xff] %v6446_v55  ;;  %v6455_v0 = vsub.f32 2.0, %v6404_v27  ;;  %1326 = vrot.lane.b32.xlu1 %v6446_v55, %s5189_s17  ;;  %v6459_v57 = vsel %vm1242_vm3, %v1082_v47, %v1210_v60  ;;  %v1149_v42 = vmul.f32 %v6336_v51, %v6336_v51  ;;  %v995_v19 = vmul.f32 0.5, %v6436_v56 }
 0x14a   : > { %8530 = vst [vmem:[#allocation70_spill] sm:$0xff] %v6438_v25  ;;  %v6444_v37 = vpop.permute.xlu0 %2412  ;;  %8533 = vst [vmem:[#allocation73_spill] sm:$0xff] %v6459_v57  ;;  %1324 = vrot.lane.b32.xlu0 %v6459_v57, %s5189_s17  ;;  %v6466_v52 = vand.u32 2147483647, %v4464_v12  ;;  %v4463_v49 = vclamps-f32 %v836_v34, 1.999999  ;;  %v1052_v28 = vmul.f32 %v6370_v50, %v6356_v54  ;;  %v1148_v47 = vmul.f32 %v6359_v38, %v6359_v38 }
 0x14b   : > { %8531 = vst [vmem:[#allocation71_spill] sm:$0xff] %v6444_v37  ;;  %v1085_v58 = vadd.f32 0.6666667, %v1053_v62  ;;  %v1181_v61 = vmul.f32 %v1149_v42, %v6336_v51  ;;  %v839_v32 = vmul.f32 %v4775_v11, %v5893_v20  ;;  %v4492_v60 = vadd.f32 -1.0, %v993_v9  ;;  %v600_v42 = vpop.f32.mrf.mxu0 }
 0x14c   : > { %v4491_v37 = vadd.f32 -1.0, %v992_v48  ;;  %v6480_v12 = vmul.f32 %v6436_v56, %v6436_v56  ;;  %v994_v50 = vmul.f32 0.5, %v6440_v10  ;;  %v1084_v34 = vadd.f32 0.6666667, %v1052_v28 }
 0x14d   : > { %v6470_v31 = vpop.permute.xlu1 %2482  ;;  %v1213_v54 = vmul.f32 0.16666667, %v1181_v61  ;;  %v1180_v62 = vmul.f32 %v1148_v47, %v6359_v38  ;;  %v4466_v51 = vclamps-f32 %v839_v32, 1.999999  ;;  %v4494_v25 = vadd.f32 -1.0, %v995_v19 }
 0x14e   : > { %v6476_v14 = vpop.permute.xlu0 %2480  ;;  %v6485_v57 = vsub.f32 2.0, %v6436_v56  ;;  %v6487_v20 = vand.u32 2147483647, %v4463_v49  ;;  %vm1245_vm4 = vcmp.le.f32.partialorder %v6296_v1, 1.0  ;;  %v962_v48 = vmul.f32 %v6440_v10, %v6440_v10 }
 0x14f   : > { %v997_v11 = vmul.f32 0.5, %v6466_v52  ;;  %v6495_v28 = vsel %vm1245_vm4, %v1085_v58, %v1213_v54  ;;  %v1212_v38 = vmul.f32 0.16666667, %v1180_v62  ;;  %vm1244_vm5 = vcmp.le.f32.partialorder %v6309_v7, 1.0 }
 0x150   : > { %8534 = vst [vmem:[#allocation74_spill] sm:$0xff] %v6495_v28  ;;  %1330 = vrot.lane.b32.xlu1 %v6495_v28, %s5189_s17  ;;  %v6502_v19 = vand.u32 2147483647, %v4466_v51  ;;  %v838_v1 = vmul.f32 %v5907_v24, %v600_v42  ;;  %v1055_v49 = vmul.f32 %v6413_v22, %v6375_v2  ;;  %v4493_v47 = vadd.f32 -1.0, %v994_v50 }
 0x151   : > { %v6490_v9 = vpop.permute.xlu1 %2486  ;;  %v6508_v32 = vsub.f32 2.0, %v6440_v10  ;;  %v965_v58 = vmul.f32 %v6466_v52, %v6466_v52  ;;  %v6512_v54 = vsel %vm1244_vm5, %v1084_v34, %v1212_v38  ;;  %v6515_v62 = vsub.f32 2.0, %v6466_v52 }
 0x152   : > { %v6497_v61 = vpop.permute.xlu0 %2484  ;;  %8535 = vst [vmem:[#allocation75_spill] sm:$0xff] %v6512_v54  ;;  %v996_v7 = vmul.f32 0.5, %v6487_v20  ;;  %1328 = vrot.lane.b32.xlu0 %v6512_v54, %s5189_s17  ;;  %v4465_v24 = vclamps-f32 %v838_v1, 1.999999  ;;  %v1151_v2 = vmul.f32 %v6382_v3, %v6382_v3  ;;  %v4496_v50 = vadd.f32 -1.0, %v997_v11 }
 0x153   : > { %v964_v51 = vmul.f32 %v6487_v20, %v6487_v20  ;;  %v1054_v34 = vmul.f32 %v6422_v43, %v6395_v16  ;;  %v1150_v42 = vmul.f32 %v6416_v15, %v6416_v15  ;;  %v6533_v54 = vsub.f32 2.0, %v6487_v20 }
 0x154   : > { %v999_v1 = vmul.f32 0.5, %v6502_v19  ;;  %v1087_v28 = vadd.f32 0.6666667, %v1055_v49  ;;  %v1183_v55 = vmul.f32 %v1151_v2, %v6382_v3  ;;  %v1057_v5 = vmul.f32 %v4492_v60, %v6426_v53 }
 0x155   : > { %v6522_v22 = vpop.permute.xlu1 %2490  ;;  %v1086_v11 = vadd.f32 0.6666667, %v1054_v34  ;;  %v1182_v26 = vmul.f32 %v1150_v42, %v6416_v15  ;;  %v1153_v16 = vmul.f32 %v6433_v36, %v6433_v36  ;;  %v4495_v43 = vadd.f32 -1.0, %v996_v7 }
 0x156   : > { %v6530_v38 = vpop.permute.xlu0 %2488  ;;  %v967_v30 = vmul.f32 %v6502_v19, %v6502_v19  ;;  %v6543_v13 = vand.u32 2147483647, %v4465_v24  ;;  %v1215_v29 = vmul.f32 0.16666667, %v1183_v55  ;;  %vm1247_vm6 = vcmp.le.f32.partialorder %v6343_v33, 1.0 }
 0x157   : > { %v1214_v3 = vmul.f32 0.16666667, %v1182_v26  ;;  %vm1246_vm7 = vcmp.le.f32.partialorder %v6367_v63, 1.0  ;;  %v1185_v15 = vmul.f32 %v1153_v16, %v6433_v36  ;;  %v1089_v49 = vadd.f32 0.6666667, %v1057_v5 }
 0x158   : > { %v6552_v60 = vsel %vm1247_vm6, %v1087_v28, %v1215_v29  ;;  %v1056_v7 = vmul.f32 %v4491_v37, %v6452_v59  ;;  %v1152_v24 = vmul.f32 %v6455_v0, %v6455_v0  ;;  %v4498_v55 = vadd.f32 -1.0, %v999_v1 }
 0x159   : > { %v6545_v23 = vpop.permute.xlu1 %2494  ;;  %v1127_v2 = vsub.f32 2.0, %v6502_v19  ;;  %1334 = vrot.lane.b32.xlu1 %v6552_v60, %s5189_s17  ;;  %v6560_v33 = vsel %vm1246_vm7, %v1086_v11, %v1214_v3  ;;  %v1217_v63 = vmul.f32 0.16666667, %v1185_v15  ;;  %v966_v26 = vmul.f32 %v6543_v13, %v6543_v13 }
 0x15a   : > { %v6550_v53 = vpop.permute.xlu0 %2492  ;;  %1332 = vrot.lane.b32.xlu0 %v6560_v33, %s5189_s17  ;;  %v1088_v29 = vadd.f32 0.6666667, %v1056_v7  ;;  %v1184_v5 = vmul.f32 %v1152_v24, %v6455_v0  ;;  %v1059_v36 = vmul.f32 %v4494_v25, %v6480_v12  ;;  %v998_v59 = vmul.f32 0.5, %v6543_v13 }
 0x15b   : > { %vm1249_vm8 = vcmp.le.f32.partialorder %v6388_v45, 1.0  ;;  %v1155_v28 = vmul.f32 %v6485_v57, %v6485_v57  ;;  %v1058_v34 = vmul.f32 %v4493_v47, %v962_v48  ;;  %v1126_v1 = vsub.f32 2.0, %v6543_v13 }
 0x15c   : > { %v6577_v11 = vsel %vm1249_vm8, %v1089_v49, %v1217_v63  ;;  %v1216_v16 = vmul.f32 0.16666667, %v1184_v5  ;;  %v1154_v25 = vmul.f32 %v6508_v32, %v6508_v32  ;;  %vm1248_vm9 = vcmp.le.f32.partialorder %v6404_v27, 1.0 }
 0x15d   : > { %v6568_v37 = vpop.permute.xlu1 %2498  ;;  %1338 = vrot.lane.b32.xlu1 %v6577_v11, %s5189_s17  ;;  %v1091_v45 = vadd.f32 0.6666667, %v1059_v36  ;;  %v1187_v0 = vmul.f32 %v1155_v28, %v6485_v57  ;;  %v1090_v12 = vadd.f32 0.6666667, %v1058_v34  ;;  %v1061_v3 = vmul.f32 %v4496_v50, %v965_v58 }
 0x15e   : > { %v6574_v42 = vpop.permute.xlu0 %2496  ;;  %v6585_v48 = vsel %vm1248_vm9, %v1088_v29, %v1216_v16  ;;  %v1186_v47 = vmul.f32 %v1154_v25, %v6508_v32  ;;  %v1157_v15 = vmul.f32 %v6515_v62, %v6515_v62  ;;  %v4497_v7 = vadd.f32 -1.0, %v998_v59 }
 0x15f   : > { %1336 = vrot.lane.b32.xlu0 %v6585_v48, %s5189_s17  ;;  %v1219_v24 = vmul.f32 0.16666667, %v1187_v0  ;;  %v1060_v27 = vmul.f32 %v4495_v43, %v964_v51  ;;  %v1156_v57 = vmul.f32 %v6533_v54, %v6533_v54  ;;  %vm1251_vm10 = vcmp.le.f32.partialorder %v6436_v56, 1.0 }
 0x160   : > { %v1218_v32 = vmul.f32 0.16666667, %v1186_v47  ;;  %vm1250_vm11 = vcmp.le.f32.partialorder %v6440_v10, 1.0  ;;  %v1189_v58 = vmul.f32 %v1157_v15, %v6515_v62  ;;  %v1093_v29 = vadd.f32 0.6666667, %v1061_v3  ;;  %v6633_v47 = vld [vmem:[%s5278_s23 + $0x8] sm:$0xff] }
 0x161   : > { %v6590_v49 = vpop.permute.xlu1 %2502  ;;  %v6601_v50 = vsel %vm1251_vm10, %v1091_v45, %v1219_v24  ;;  %v1092_v5 = vadd.f32 0.6666667, %v1060_v27  ;;  %v1188_v36 = vmul.f32 %v1156_v57, %v6533_v54  ;;  %v1063_v59 = vmul.f32 %v4498_v55, %v967_v30  ;;  %8536 = vst [vmem:[#allocation76_spill] sm:$0xff] %v6633_v47  ;;  %v6655_v27 = vld [vmem:[%s5278_s23 + $0x18] sm:$0xff]  ;;  %v8539_v57 = vld [vmem:[#allocation2_spill] sm:$0xff] }
 0x162   : > { %v6596_v63 = vpop.permute.xlu0 %2500  ;;  %1342 = vrot.lane.b32.xlu1 %v6601_v50, %s5189_s17  ;;  %v6606_v51 = vsel %vm1250_vm11, %v1090_v12, %v1218_v32  ;;  %v1221_v43 = vmul.f32 0.16666667, %v1189_v58  ;;  %v1159_v10 = vmul.f32 %v1127_v2, %v1127_v2  ;;  %v1062_v62 = vmul.f32 %v4497_v7, %v966_v26  ;;  %v6660_v58 = vld [vmem:[%s5278_s23 + $0xb8] sm:$0xff] }
 0x163   : > { %1340 = vrot.lane.b32.xlu0 %v6606_v51, %s5189_s17  ;;  %v1220_v56 = vmul.f32 0.16666667, %v1188_v36  ;;  %vm1253_vm12 = vcmp.le.f32.partialorder %v6466_v52, 1.0  ;;  %vm1252_vm13 = vcmp.le.f32.partialorder %v6487_v20, 1.0  ;;  %v1158_v54 = vmul.f32 %v1126_v1, %v1126_v1  ;;  %v6673_v36 = vld [vmem:[%s5278_s23 + $0xb0] sm:$0xff] }
 0x164   : > { %v6616_v16 = vsel %vm1253_vm12, %v1093_v29, %v1221_v43  ;;  %v1095_v30 = vadd.f32 0.6666667, %v1063_v59  ;;  %v1191_v55 = vmul.f32 %v1159_v10, %v1127_v2  ;;  %v1094_v45 = vadd.f32 0.6666667, %v1062_v62  ;;  %v6683_v10 = vld [vmem:[%s5278_s23 + $0x28] sm:$0xff]  ;;  %v8541_v62 = vld [vmem:[#allocation4_spill] sm:$0xff] }
 0x165   : > { %v6608_v28 = vpop.permute.xlu1 %2506  ;;  %v6618_v25 = vsel %vm1252_vm13, %v1092_v5, %v1220_v56  ;;  %v1190_v26 = vmul.f32 %v1158_v54, %v1126_v1  ;;  %vm1255_vm14 = vcmp.le.f32.partialorder %v6502_v19, 1.0  ;;  %vm1254_vm15 = vcmp.le.f32.partialorder %v6543_v13, 1.0  ;;  %v6644_v19 = vld [vmem:[%s5278_s23] sm:$0xff]  ;;  %v8540_v5 = vld [vmem:[#allocation3_spill] sm:$0xff] }
 0x166   : > { %v6612_v34 = vpop.permute.xlu0 %2504  ;;  %1346 = vrot.lane.b32.xlu1 %v6616_v16, %s5189_s17  ;;  %v1223_v52 = vmul.f32 0.16666667, %v1191_v55  ;;  %v2321_v1 = vadd.f32 %v6633_v47, %v5664_v39  ;;  %8538 = vst [vmem:[#allocation78_spill] sm:$0xff] %v6644_v19  ;;  %v2320_v7 = vadd.f32 %v6644_v19, %v5666_v40  ;;  %v2323_v32 = vadd.f32 %v6655_v27, %v8539_v57  ;;  %v6716_v57 = vld [vmem:[%s5278_s23 + $0xd8] sm:$0xff] }
 0x167   : > { %1344 = vrot.lane.b32.xlu0 %v6618_v25, %s5189_s17  ;;  %v1222_v12 = vmul.f32 0.16666667, %v1190_v26  ;;  %v2325_v54 = vadd.f32 %v6683_v10, %v8541_v62  ;;  %v6701_v26 = vld [vmem:[%s5278_s23 + $0xc0] sm:$0xff]  ;;  %vm4336_vm0 = vcmask 64512  }
 0x168   : > { %v6629_v2 = vsel %vm1255_vm14, %v1095_v30, %v1223_v52  ;;  %v2449_v39 = vadd.f32 %v5980_v35, %v2321_v1  ;;  %v2448_v24 = vadd.f32 %v5990_v41, %v2320_v7  ;;  %v6668_v35 = vld [vmem:[%s5278_s23 + $0x10] sm:$0xff]  ;;  %v6688_v30 = vld [vmem:[%s5278_s23 + $0xc8] sm:$0xff]  ;;  %v6711_v7 = vld [vmem:[%s5278_s23 + $0x38] sm:$0xff] }
 0x169   : > { %v6622_v0 = vpop.permute.xlu1 %2510  ;;  %v6639_v3 = vsel %vm1254_vm15, %v1094_v45, %v1222_v12  ;;  %v2322_v41 = vadd.f32 %v6668_v35, %v8540_v5  ;;  %v2453_v12 = vadd.f32 %v6048_v21, %v2325_v54  ;;  %v6727_v5 = vld [vmem:[%s5278_s23 + $0xd0] sm:$0xff]  ;;  %v6736_v54 = vld [vmem:[%s5278_s23 + $0x48] sm:$0xff] }
 0x16a   : > { %v6626_v20 = vpop.permute.xlu0 %2508  ;;  %1350 = vrot.lane.b32.xlu1 %v6629_v2, %s5189_s17  ;;  %8537 = vst [vmem:[#allocation77_spill] sm:$0xff] %v6639_v3  ;;  %v2577_v40 = vadd.f32 %v6470_v31, %v2449_v39  ;;  %v2576_v43 = vadd.f32 %v6476_v14, %v2448_v24  ;;  %v2451_v31 = vadd.f32 %v6021_v18, %v2323_v32  ;;  %v6696_v18 = vld [vmem:[%s5278_s23 + $0x20] sm:$0xff]  ;;  %v6722_v32 = vld [vmem:[%s5278_s23 + $0x30] sm:$0xff] }
 0x16b   : > { %1348 = vrot.lane.b32.xlu0 %v6639_v3, %s5189_s17  ;;  %v2450_v56 = vadd.f32 %v6025_v17, %v2322_v41  ;;  %v8542_v17 = vld [vmem:[#allocation5_spill] sm:$0xff]  ;;  %v8543_v39 = vld [vmem:[#allocation6_spill] sm:$0xff] }
 0x16c   : > { %5049 = vrcp.f32 %v2577_v40  ;;  %v2579_v14 = vadd.f32 %v6490_v9, %v2451_v31  ;;  %v2324_v45 = vadd.f32 %v6696_v18, %v8542_v17  ;;  %v2327_v24 = vadd.f32 %v6711_v7, %v8543_v39  ;;  %v8544_v40 = vld [vmem:[#allocation7_spill] sm:$0xff]  ;;  %v8545_v31 = vld [vmem:[#allocation28_spill] sm:$0xff]  ;;  %v6752_v39 = vld [vmem:[%s5278_s23 + $0xe0] sm:$0xff] }
 0x16d   : > { %v6641_v15 = vpop.permute.xlu1 %2514  ;;  %5051 = vrcp.f32 %v2576_v43  ;;  %v2578_v52 = vadd.f32 %v6497_v61, %v2450_v56  ;;  %v2581_v61 = vadd.f32 %v6522_v22, %v2453_v12  ;;  %v8546_v56 = vld [vmem:[#allocation38_spill] sm:$0xff]  ;;  %v8548_v12 = vld [vmem:[#allocation9_spill] sm:$0xff] }
 0x16e   : > { %v6650_v13 = vpop.permute.xlu0 %2512  ;;  %2526 = vrot.lane.b32.xlu1 %v6660_v58, %s5188_s13  ;;  %v2452_v1 = vadd.f32 %v6060_v4, %v2324_v45  ;;  %5053 = vrcp.f32 %v2579_v14  ;;  %v2326_v4 = vadd.f32 %v6722_v32, %v8544_v40  ;;  %v2455_v43 = vadd.f32 %v6086_v8, %v2327_v24  ;;  %v8547_v14 = vld [vmem:[#allocation8_spill] sm:$0xff]  ;;  %v6741_v45 = vld [vmem:[%s5278_s23 + $0xe8] sm:$0xff]  ;;  %v6768_v3 = vld [vmem:[%s5278_s23 + $0xf8] sm:$0xff] }
 0x16f   : > { %2524 = vrot.lane.b32.xlu0 %v6673_v36, %s5188_s13  ;;  %5055 = vrcp.f32 %v2578_v52  ;;  %v2329_v17 = vadd.f32 %v6736_v54, %v8547_v14  ;;  %v6747_v52 = vld [vmem:[%s5278_s23 + $0x40] sm:$0xff]  ;;  %8552 = vst [vmem:[#allocation2_spill] sm:$0xff] %v6768_v3 }
 0x170   : > { %v2580_v41 = vadd.f32 %v6530_v38, %v2452_v1  ;;  %v2454_v62 = vadd.f32 %v8546_v56, %v2326_v4  ;;  %5057 = vrcp.f32 %v2581_v61  ;;  %v2583_v38 = vadd.f32 %v6545_v23, %v2455_v43  ;;  %v8550_v4 = vld [vmem:[#allocation40_spill] sm:$0xff]  ;;  %v6763_v56 = vld [vmem:[%s5278_s23 + $0x58] sm:$0xff]  ;;  %v8551_v14 = vld [vmem:[#allocation10_spill] sm:$0xff] }
 0x171   : > { %v6665_v29 = vpop.permute.xlu1 %2518  ;;  %v2328_v1 = vadd.f32 %v6747_v52, %v8548_v12  ;;  %v2457_v23 = vadd.f32 %v6118_v6, %v2329_v17  ;;  %v2331_v12 = vadd.f32 %v6763_v56, %v8551_v14  ;;  %v8557_v14 = vld [vmem:[#allocation35_spill] sm:$0xff] }
 0x172   : > { %v6678_v59 = vpop.permute.xlu0 %2516  ;;  %2530 = vrot.lane.b32.xlu1 %v6688_v30, %s5188_s13  ;;  %5059 = vrcp.f32 %v2580_v41  ;;  %v2582_v24 = vadd.f32 %v6550_v53, %v2454_v62  ;;  %v8553_v62 = vld [vmem:[#allocation11_spill] sm:$0xff] }
 0x173   : > { %2528 = vrot.lane.b32.xlu0 %v6701_v26, %s5188_s13  ;;  %v2456_v43 = vadd.f32 %v8550_v4, %v2328_v1  ;;  %5061 = vrcp.f32 %v2583_v38  ;;  %v2585_v53 = vadd.f32 %v6568_v37, %v2457_v23  ;;  %v8555_v38 = vld [vmem:[#allocation34_spill] sm:$0xff] }
 0x174   : > { %5063 = vrcp.f32 %v2582_v24  ;;  %v8556_v23 = vld [vmem:[#allocation42_spill] sm:$0xff]  ;;  %v8559_v24 = vld [vmem:[#allocation43_spill] sm:$0xff] }
 0x175   : > { %v6693_v55 = vpop.permute.xlu1 %2522  ;;  %v2584_v1 = vadd.f32 %v6574_v42, %v2456_v43  ;;  %v2459_v4 = vadd.f32 %v8556_v23, %v2331_v12  ;;  %5065 = vrcp.f32 %v2585_v53  ;;  %v6805_v12 = vld [vmem:[%s5278_s23 + $0x60] sm:$0xff]  ;;  %v6817_v23 = vld [vmem:[%s5278_s23 + $0x78] sm:$0xff] }
 0x176   : > { %v6707_v9 = vpop.permute.xlu0 %2520  ;;  %2534 = vrot.lane.b32.xlu1 %v6716_v57, %s5188_s13 }
 0x177   : > { %2532 = vrot.lane.b32.xlu0 %v6727_v5, %s5188_s13  ;;  %v2587_v43 = vadd.f32 %v6590_v49, %v2459_v4  ;;  %5067 = vrcp.f32 %v2584_v1  ;;  %v8565_v1 = vld [vmem:[#allocation14_spill] sm:$0xff] }
 0x178   : > { %v2335_v4 = vadd.f32 %v6817_v23, %v8565_v1 }
 0x179   : > { %v1291_v21 = vpop.permute.xlu1 %1290  ;;  %v6773_v41 = vpop.eup %5049  ;;  %5069 = vrcp.f32 %v2587_v43 }
 0x17a   : > { %v1353_v22 = vmul.f32 %v1291_v21, %v8545_v31  ;;  %2538 = vrot.lane.b32.xlu1 %v6741_v45, %s5188_s13  ;;  %v8549_v21 = vld [vmem:[#allocation32_spill] sm:$0xff] }
 0x17b   : > { %2536 = vrot.lane.b32.xlu0 %v6752_v39, %s5188_s13 }
 0x17c   : > { %v1289_v8 = vpop.permute.xlu0 %1288  ;;  %v1385_v40 = vmul.f32 %v6633_v47, %v1353_v22  ;;  %v6776_v22 = vld [vmem:[%s5278_s23 + $0x50] sm:$0xff] }
 0x17d   : > { %v1352_v61 = vmul.f32 %v1289_v8, %v8549_v21  ;;  %v2330_v17 = vadd.f32 %v6776_v22, %v8553_v62  ;;  %v6781_v8 = vld [vmem:[%s5278_s23 + $0xf0] sm:$0xff]  ;;  %v6792_v62 = vld [vmem:[%s5278_s23 + $0x68] sm:$0xff] }
 0x17e   : > { %2542 = vrot.lane.b32.xlu1 %v6768_v3, %s5188_s13  ;;  %v1295_v6 = vpop.permute.xlu1 %1294  ;;  %8554 = vst [vmem:[#allocation3_spill] sm:$0xff] %v6781_v8  ;;  %v8558_v47 = vld [vmem:[#allocation12_spill] sm:$0xff] }
 0x17f   : > { %v1384_v31 = vmul.f32 %v6644_v19, %v1352_v61  ;;  %2540 = vrot.lane.b32.xlu0 %v6781_v8, %s5188_s13  ;;  %v1355_v21 = vmul.f32 %v1295_v6, %v8555_v38  ;;  %v6787_v61 = vpop.eup %5051  ;;  %v2333_v8 = vadd.f32 %v6792_v62, %v8558_v47  ;;  %v2458_v3 = vadd.f32 %v8559_v24, %v2330_v17  ;;  %s5190_s13 = smov 3   ;;  %v8561_v6 = vld [vmem:[#allocation13_spill] sm:$0xff]  ;;  %v8566_v24 = vld [vmem:[#allocation15_spill] sm:$0xff] }
 0x180   : > { %v1293_v37 = vpop.permute.xlu0 %1292  ;;  %v2332_v47 = vadd.f32 %v6805_v12, %v8561_v6  ;;  %v5191_v17 = vmov 108   ;;  %v8563_v38 = vld [vmem:[#allocation45_spill] sm:$0xff] }
 0x181   : > { %4808 = vmatprep.mubr.f32.mxu1 %v1384_v31  ;;  %v1354_v19 = vmul.f32 %v1293_v37, %v8557_v14  ;;  %v1387_v42 = vmul.f32 %v6655_v27, %v1355_v21  ;;  %v2586_v53 = vadd.f32 %v6596_v63, %v2458_v3  ;;  %5042 = vset.pattern.permute.xlu1 %v5191_v17  ;;  %v8564_v21 = vld [vmem:[#allocation46_spill] sm:$0xff] }
 0x182   : > { %4809 = vmatmul.mubr.f32.vlgmr.msra.gmra.mxu1 %v1385_v40  ;;  %2674 = vrot.lane.b32.xlu1 %v6773_v41, %s5190_s13  ;;  %v6802_v40 = vpop.eup %5053  ;;  %v2460_v37 = vadd.f32 %v8564_v21, %v2332_v47 }
 0x183   : > { %v1386_v31 = vmul.f32 %v6668_v35, %v1354_v19  ;;  %8560 = vst [vmem:[#allocation4_spill] sm:$0xff] %v6802_v40  ;;  %2672 = vrot.lane.b32.xlu0 %v6787_v61, %s5190_s13  ;;  %v6812_v49 = vpop.eup %5055  ;;  %v2461_v19 = vadd.f32 %v8563_v38, %v2333_v8  ;;  %v6827_v8 = vld [vmem:[%s5278_s23 + $0x70] sm:$0xff]  ;;  %5071 = vrcp.f32 %v2586_v53  ;;  %v6842_v53 = vld [vmem:[%s5278_s23 + $0x88] sm:$0xff] }
 0x184   : > { %8562 = vst [vmem:[#allocation5_spill] sm:$0xff] %v6812_v49  ;;  %5041 = vset.pattern.permute.xlu0 %v5191_v17  ;;  %v6824_v14 = vpop.eup %5057  ;;  %v2588_v43 = vadd.f32 %v6612_v34, %v2460_v37 }
 0x185   : > { %4811 = vmatprep.mubr.f32.mxu1 %v1386_v31  ;;  %v2589_v63 = vadd.f32 %v6608_v28, %v2461_v19  ;;  %v8567_v31 = vld [vmem:[#allocation36_spill] sm:$0xff]  ;;  %v6835_v17 = vpop.eup %5059  ;;  %v8570_v19 = vld [vmem:[#allocation37_spill] sm:$0xff] }
 0x186   : > { %4812 = vmatmul.mubr.f32.gmra.mxu1 %v1387_v42  ;;  %2678 = vrot.lane.b32.xlu1 %v6802_v40, %s5190_s13  ;;  %v1299_v3 = vpop.permute.xlu1 %1298  ;;  %v2334_v42 = vadd.f32 %v6827_v8, %v8566_v24  ;;  %8568 = vst [vmem:[#allocation6_spill] sm:$0xff] %v6835_v17  ;;  %v8569_v28 = vld [vmem:[#allocation48_spill] sm:$0xff] }
 0x187   : > { %2676 = vrot.lane.b32.xlu0 %v6812_v49, %s5190_s13  ;;  %v1357_v6 = vmul.f32 %v1299_v3, %v8567_v31  ;;  %v1297_v47 = vpop.permute.xlu0 %1296  ;;  %v2463_v38 = vadd.f32 %v8569_v28, %v2335_v4  ;;  %v8571_v40 = vld [vmem:[#allocation16_spill] sm:$0xff]  ;;  %5073 = vrcp.f32 %v2589_v63  ;;  %v6850_v4 = vpop.eup %5061  ;;  %v6853_v3 = vld [vmem:[%s5278_s23 + $0x80] sm:$0xff] }
 0x188   : > { %v1356_v21 = vmul.f32 %v1297_v47, %v8570_v19  ;;  %v2462_v1 = vadd.f32 %v6218_v46, %v2334_v42  ;;  %v2337_v49 = vadd.f32 %v6842_v53, %v8571_v40  ;;  %8572 = vst [vmem:[#allocation7_spill] sm:$0xff] %v6850_v4  ;;  %v8573_v46 = vld [vmem:[#allocation17_spill] sm:$0xff]  ;;  %5075 = vrcp.f32 %v2588_v43  ;;  %v6860_v63 = vpop.eup %5063  ;;  %v8575_v31 = vld [vmem:[#allocation50_spill] sm:$0xff] }
 0x189   : > { %v1389_v24 = vmul.f32 %v6683_v10, %v1357_v6  ;;  %v2591_v34 = vadd.f32 %v6622_v0, %v2463_v38  ;;  %v2336_v42 = vadd.f32 %v6853_v3, %v8573_v46  ;;  %8574 = vst [vmem:[#allocation28_spill] sm:$0xff] %v6860_v63  ;;  %v6865_v47 = vld [vmem:[%s5278_s23 + $0x98] sm:$0xff]  ;;  %v8576_v28 = vld [vmem:[#allocation18_spill] sm:$0xff]  ;;  %v6872_v19 = vpop.eup %5065 }
 0x18a   : > { %2682 = vrot.lane.b32.xlu1 %v6824_v14, %s5190_s13  ;;  %v1388_v37 = vmul.f32 %v6696_v18, %v1356_v21  ;;  %v2590_v40 = vadd.f32 %v6626_v20, %v2462_v1  ;;  %v2465_v0 = vadd.f32 %v6230_v44, %v2337_v49  ;;  %v2339_v38 = vadd.f32 %v6865_v47, %v8576_v28  ;;  %v6875_v44 = vld [vmem:[%s5278_s23 + $0x90] sm:$0xff]  ;;  %v8577_v49 = vld [vmem:[#allocation19_spill] sm:$0xff]  ;;  %v6883_v46 = vpop.eup %5067  ;;  %v8581_v28 = vld [vmem:[#allocation53_spill] sm:$0xff] }
 0x18b   : > { %2680 = vrot.lane.b32.xlu0 %v6835_v17, %s5190_s13  ;;  %v2464_v6 = vadd.f32 %v8575_v31, %v2336_v42  ;;  %5077 = vrcp.f32 %v2591_v34  ;;  %v2338_v21 = vadd.f32 %v6875_v44, %v8577_v49  ;;  %v8582_v17 = vld [vmem:[#allocation20_spill] sm:$0xff] }
 0x18c   : > { %4814 = vmatprep.mubr.f32.mxu1 %v1388_v37  ;;  %v2593_v20 = vadd.f32 %v6641_v15, %v2465_v0  ;;  %5079 = vrcp.f32 %v2590_v40  ;;  %v8579_v15 = vld [vmem:[#allocation52_spill] sm:$0xff]  ;;  %v8580_v0 = vld [vmem:[#allocation41_spill] sm:$0xff]  ;;  %v6890_v40 = vld [vmem:[%s5278_s23 + $0xa8] sm:$0xff] }
 0x18d   : > { %4815 = vmatmul.mubr.f32.gmra.mxu1 %v1389_v24  ;;  %v2592_v1 = vadd.f32 %v6650_v13, %v2464_v6  ;;  %v8578_v24 = vld [vmem:[#allocation39_spill] sm:$0xff]  ;;  %v2467_v42 = vadd.f32 %v8579_v15, %v2339_v38  ;;  %v6898_v38 = vpop.eup %5069 }
 0x18e   : > { %2686 = vrot.lane.b32.xlu1 %v6850_v4, %s5190_s13  ;;  %v1303_v43 = vpop.permute.xlu1 %1302  ;;  %v2466_v4 = vadd.f32 %v8581_v28, %v2338_v21  ;;  %5081 = vrcp.f32 %v2593_v20  ;;  %v8583_v21 = vld [vmem:[#allocation21_spill] sm:$0xff] }
 0x18f   : > { %2684 = vrot.lane.b32.xlu0 %v6860_v63, %s5190_s13  ;;  %v1359_v34 = vmul.f32 %v1303_v43, %v8578_v24  ;;  %v1301_v37 = vpop.permute.xlu0 %1300  ;;  %v2341_v63 = vadd.f32 %v6890_v40, %v8582_v17  ;;  %v2595_v13 = vadd.f32 %v6665_v29, %v2467_v42  ;;  %v6901_v43 = vld [vmem:[%s5278_s23 + $0xa0] sm:$0xff]  ;;  %5083 = vrcp.f32 %v2592_v1  ;;  %v8585_v29 = vld [vmem:[#allocation56_spill] sm:$0xff] }
 0x190   : > { %v1358_v31 = vmul.f32 %v1301_v37, %v8580_v0  ;;  %v2340_v24 = vadd.f32 %v6901_v43, %v8583_v21  ;;  %v2594_v17 = vadd.f32 %v6678_v59, %v2466_v4  ;;  %v6908_v20 = vpop.eup %5071  ;;  %v8586_v0 = vld [vmem:[#allocation44_spill] sm:$0xff] }
 0x191   : > { %v1391_v49 = vmul.f32 %v6711_v7, %v1359_v34  ;;  %v8584_v34 = vld [vmem:[#allocation55_spill] sm:$0xff]  ;;  %5085 = vrcp.f32 %v2595_v13 }
 0x192   : > { %2690 = vrot.lane.b32.xlu1 %v6872_v19, %s5190_s13  ;;  %v1390_v6 = vmul.f32 %v6722_v32, %v1358_v31  ;;  %v2469_v37 = vadd.f32 %v8584_v34, %v2341_v63  ;;  %v2468_v15 = vadd.f32 %v8585_v29, %v2340_v24  ;;  %5087 = vrcp.f32 %v2594_v17  ;;  %v8588_v34 = vld [vmem:[#allocation49_spill] sm:$0xff] }
 0x193   : > { %2688 = vrot.lane.b32.xlu0 %v6883_v46, %s5190_s13 }
 0x194   : > { %4817 = vmatprep.mubr.f32.mxu1 %v1390_v6  ;;  %v2597_v1 = vadd.f32 %v6693_v55, %v2469_v37  ;;  %v6916_v28 = vpop.eup %5073  ;;  %v2596_v59 = vadd.f32 %v6707_v9, %v2468_v15 }
 0x195   : > { %v1307_v42 = vpop.permute.xlu1 %1306  ;;  %4818 = vmatmul.mubr.f32.gmra.mxu1 %v1391_v49  ;;  %v6921_v63 = vpop.eup %5075  ;;  %v8587_v49 = vld [vmem:[#allocation47_spill] sm:$0xff] }
 0x196   : > { %2694 = vrot.lane.b32.xlu1 %v6898_v38, %s5190_s13  ;;  %v1361_v31 = vmul.f32 %v1307_v42, %v8586_v0  ;;  %5089 = vrcp.f32 %v2597_v1  ;;  %v8589_v42 = vld [vmem:[#allocation51_spill] sm:$0xff] }
 0x197   : > { %2692 = vrot.lane.b32.xlu0 %v6908_v20, %s5190_s13  ;;  %v1305_v4 = vpop.permute.xlu0 %1304  ;;  %5091 = vrcp.f32 %v2596_v59 }
 0x198   : > { %v1360_v13 = vmul.f32 %v1305_v4, %v8587_v49  ;;  %v1393_v6 = vmul.f32 %v6736_v54, %v1361_v31  ;;  %v6928_v21 = vpop.eup %5077 }
 0x199   : > { %v6932_v9 = vpop.eup %5079 }
 0x19a   : > { %2698 = vrot.lane.b32.xlu1 %v6916_v28, %s5190_s13  ;;  %v1392_v55 = vmul.f32 %v6747_v52, %v1360_v13  ;;  %v8592_v13 = vld [vmem:[#allocation54_spill] sm:$0xff] }
 0x19b   : > { %2696 = vrot.lane.b32.xlu0 %v6921_v63, %s5190_s13  ;;  %v6936_v17 = vpop.eup %5081 }
 0x19c   : > { %4820 = vmatprep.mubr.f32.mxu1 %v1392_v55  ;;  %v6941_v15 = vpop.eup %5083 }
 0x19d   : > { %4821 = vmatmul.mubr.f32.gmra.mxu1 %v1393_v6 }
 0x19e   : > { %2702 = vrot.lane.b32.xlu1 %v6928_v21, %s5190_s13  ;;  %v1311_v24 = vpop.permute.xlu1 %1310  ;;  %v6948_v59 = vpop.eup %5085 }
 0x19f   : > { %2700 = vrot.lane.b32.xlu0 %v6932_v9, %s5190_s13  ;;  %v1363_v37 = vmul.f32 %v1311_v24, %v8588_v34  ;;  %v1309_v29 = vpop.permute.xlu0 %1308  ;;  %8590 = vst [vmem:[#allocation38_spill] sm:$0xff] %v6948_v59  ;;  %v6952_v4 = vpop.eup %5087 }
 0x1a0   : > { %v1362_v1 = vmul.f32 %v1309_v29, %v8589_v42  ;;  %8591 = vst [vmem:[#allocation8_spill] sm:$0xff] %v6952_v4 }
 0x1a1   : > { %v1395_v0 = vmul.f32 %v6763_v56, %v1363_v37  ;;  %v8595_v37 = vld [vmem:[#allocation57_spill] sm:$0xff] }
 0x1a2   : > { %2706 = vrot.lane.b32.xlu1 %v6936_v17, %s5190_s13  ;;  %v1394_v31 = vmul.f32 %v6776_v22, %v1362_v1 }
 0x1a3   : > { %2704 = vrot.lane.b32.xlu0 %v6941_v15, %s5190_s13  ;;  %v6957_v55 = vpop.eup %5089 }
 0x1a4   : > { %4823 = vmatprep.mubr.f32.mxu1 %v1394_v31  ;;  %8593 = vst [vmem:[#allocation9_spill] sm:$0xff] %v6957_v55  ;;  %v6961_v34 = vpop.eup %5091  ;;  %v8596_v31 = vld [vmem:[#allocation60_spill] sm:$0xff] }
 0x1a5   : > { %v1315_v49 = vpop.permute.xlu1 %1314  ;;  %4824 = vmatmul.mubr.f32.gmra.mxu1 %v1395_v0  ;;  %8594 = vst [vmem:[#allocation32_spill] sm:$0xff] %v6961_v34 }
 0x1a6   : > { %v1365_v6 = vmul.f32 %v1315_v49, %v8592_v13  ;;  %2710 = vrot.lane.b32.xlu1 %v6948_v59, %s5190_s13  ;;  %v1313_v24 = vpop.permute.xlu0 %1312 }
 0x1a7   : > { %2708 = vrot.lane.b32.xlu0 %v6952_v4, %s5190_s13  ;;  %v1364_v29 = vmul.f32 %v1313_v24, %v8595_v37  ;;  %v8597_v4 = vld [vmem:[#allocation61_spill] sm:$0xff]  ;;  %v1710_v37 = vld [vmem:[%s8355_s5 + $0x70] sm:$0xff] }
 0x1a8   : > { %v1397_v42 = vmul.f32 %v6792_v62, %v1365_v6  ;;  %v1711_v6 = vld [vmem:[%s8355_s5 + $0x78] sm:$0xff] }
 0x1a9   : > { %v1396_v1 = vmul.f32 %v6805_v12, %v1364_v29  ;;  %4856 = vmatprep.subr.mxu0 %v1711_v6 }
 0x1aa   : > { %2714 = vrot.lane.b32.xlu1 %v6957_v55, %s5190_s13  ;;  %4857 = vmatpush3.msra.mxu0 %v1711_v6 }
 0x1ab   : > { %2712 = vrot.lane.b32.xlu0 %v6961_v34, %s5190_s13  ;;  %v1319_v0 = vpop.permute.xlu1 %1318  ;;  %4826 = vmatprep.mubr.f32.mxu1 %v1396_v1  ;;  %v1709_v1 = vld [vmem:[%s8355_s5 + $0x68] sm:$0xff] }
 0x1ac   : > { %v1367_v49 = vmul.f32 %v1319_v0, %v8596_v31  ;;  %v1317_v13 = vpop.permute.xlu0 %1316  ;;  %4827 = vmatmul.mubr.f32.gmra.mxu1 %v1397_v42  ;;  %4858 = vmatprep.subr.mxu0 %v1710_v37  ;;  %v8598_v0 = vld [vmem:[#allocation66_spill] sm:$0xff] }
 0x1ad   : > { %v1366_v59 = vmul.f32 %v1317_v13, %v8597_v4  ;;  %4859 = vmatpush3.msra.mxu0 %v1710_v37  ;;  %v1708_v4 = vld [vmem:[%s8355_s5 + $0x60] sm:$0xff]  ;;  %v8599_v13 = vld [vmem:[#allocation67_spill] sm:$0xff]  ;;  %v1706_v37 = vld [vmem:[%s8355_s5 + $0x50] sm:$0xff] }
 0x1ae   : > { %v1399_v24 = vmul.f32 %v6817_v23, %v1367_v49  ;;  %4860 = vmatprep.subr.mxu0 %v1709_v1 }
 0x1af   : > { %v1398_v29 = vmul.f32 %v6827_v8, %v1366_v59  ;;  %4861 = vmatpush3.msra.mxu0 %v1709_v1  ;;  %v1707_v59 = vld [vmem:[%s8355_s5 + $0x58] sm:$0xff]  ;;  %v1705_v1 = vld [vmem:[%s8355_s5 + $0x48] sm:$0xff] }
 0x1b0   : > { %4862 = vmatprep.subr.mxu0 %v1708_v4 }
 0x1b1   : > { %4829 = vmatprep.mubr.f32.mxu1 %v1398_v29  ;;  %4863 = vmatpush3.msra.mxu0 %v1708_v4  ;;  %v1704_v4 = vld [vmem:[%s8355_s5 + $0x40] sm:$0xff] }
 0x1b2   : > { %4830 = vmatmul.mubr.f32.gmra.mxu1 %v1399_v24  ;;  %4864 = vmatprep.subr.mxu0 %v1707_v59 }
 0x1b3   : > { %v1323_v42 = vpop.permute.xlu1 %1322  ;;  %4865 = vmatpush3.msra.mxu0 %v1707_v59  ;;  %v1703_v59 = vld [vmem:[%s8355_s5 + $0x38] sm:$0xff] }
 0x1b4   : > { %v1369_v31 = vmul.f32 %v1323_v42, %v8598_v0  ;;  %v1321_v49 = vpop.permute.xlu0 %1320  ;;  %4866 = vmatprep.subr.mxu0 %v1706_v37  ;;  %v8600_v0 = vld [vmem:[#allocation72_spill] sm:$0xff] }
 0x1b5   : > { %v1368_v6 = vmul.f32 %v1321_v49, %v8599_v13  ;;  %4867 = vmatpush3.msra.mxu0 %v1706_v37  ;;  %v8601_v13 = vld [vmem:[#allocation73_spill] sm:$0xff]  ;;  %v1702_v37 = vld [vmem:[%s8355_s5 + $0x30] sm:$0xff] }
 0x1b6   : > { %v1401_v24 = vmul.f32 %v6842_v53, %v1369_v31  ;;  %4868 = vmatprep.subr.mxu0 %v1705_v1 }
 0x1b7   : > { %v1400_v29 = vmul.f32 %v6853_v3, %v1368_v6  ;;  %4869 = vmatpush3.msra.mxu0 %v1705_v1  ;;  %v1701_v1 = vld [vmem:[%s8355_s5 + $0x28] sm:$0xff] }
 0x1b8   : > { %4870 = vmatprep.subr.mxu0 %v1704_v4 }
 0x1b9   : > { %4832 = vmatprep.mubr.f32.mxu1 %v1400_v29  ;;  %4871 = vmatpush3.msra.mxu0 %v1704_v4 }
 0x1ba   : > { %4833 = vmatmul.mubr.f32.gmra.mxu1 %v1401_v24  ;;  %4872 = vmatprep.subr.mxu0 %v1703_v59 }
 0x1bb   : > { %v1327_v42 = vpop.permute.xlu1 %1326  ;;  %4873 = vmatpush3.msra.mxu0 %v1703_v59 }
 0x1bc   : > { %v1371_v31 = vmul.f32 %v1327_v42, %v8600_v0  ;;  %v1325_v49 = vpop.permute.xlu0 %1324  ;;  %4874 = vmatprep.subr.mxu0 %v1702_v37  ;;  %v8602_v0 = vld [vmem:[#allocation74_spill] sm:$0xff] }
 0x1bd   : > { %v1370_v6 = vmul.f32 %v1325_v49, %v8601_v13  ;;  %4875 = vmatpush3.msra.mxu0 %v1702_v37  ;;  %v8603_v49 = vld [vmem:[#allocation75_spill] sm:$0xff] }
 0x1be   : > { %v1403_v24 = vmul.f32 %v6865_v47, %v1371_v31  ;;  %4876 = vmatprep.subr.mxu0 %v1701_v1 }
 0x1bf   : > { %v1402_v29 = vmul.f32 %v6875_v44, %v1370_v6  ;;  %4877 = vmatpush3.msra.mxu0 %v1701_v1 }
 0x1c1   : > { %4835 = vmatprep.mubr.f32.mxu1 %v1402_v29 }
 0x1c2   : > { %v1331_v42 = vpop.permute.xlu1 %1330  ;;  %4836 = vmatmul.mubr.f32.gmra.mxu1 %v1403_v24 }
 0x1c3   : > { %v1373_v31 = vmul.f32 %v1331_v42, %v8602_v0 }
 0x1c4   : > { %v1329_v4 = vpop.permute.xlu0 %1328 }
 0x1c5   : > { %v1372_v13 = vmul.f32 %v1329_v4, %v8603_v49  ;;  %v1405_v6 = vmul.f32 %v6890_v40, %v1373_v31 }
 0x1c7   : > { %v1404_v59 = vmul.f32 %v6901_v43, %v1372_v13 }
 0x1c9   : > { %4838 = vmatprep.mubr.f32.mxu1 %v1404_v59 }
 0x1ca   : > { %4839 = vmatmul.mubr.f32.gmra.mxu1 %v1405_v6 }
 0x1cb   : > { %v1335_v34 = vpop.permute.xlu1 %1334 }
 0x1cc   : > { %v1375_v29 = vmul.f32 %v1335_v34, %v6552_v60  ;;  %v1333_v55 = vpop.permute.xlu0 %1332 }
 0x1cd   : > { %v1374_v24 = vmul.f32 %v1333_v55, %v6560_v33 }
 0x1ce   : > { %v1407_v37 = vmul.f32 %v6660_v58, %v1375_v29 }
 0x1cf   : > { %v1406_v42 = vmul.f32 %v6673_v36, %v1374_v24  ;;  %v1339_v0 = vpop.permute.xlu1 %1338 }
 0x1d0   : > { %v1377_v1 = vmul.f32 %v1339_v0, %v6577_v11 }
 0x1d1   : > { %v1337_v4 = vpop.permute.xlu0 %1336  ;;  %4841 = vmatprep.mubr.f32.mxu1 %v1406_v42 }
 0x1d2   : > { %v1376_v31 = vmul.f32 %v1337_v4, %v6585_v48  ;;  %4842 = vmatmul.mubr.f32.gmra.mxu1 %v1407_v37  ;;  %v1409_v49 = vmul.f32 %v6688_v30, %v1377_v1 }
 0x1d4   : > { %v1408_v13 = vmul.f32 %v6701_v26, %v1376_v31  ;;  %v1343_v60 = vpop.permute.xlu1 %1342  ;;  %v8605_v31 = vld [vmem:[#allocation23_spill] sm:$0xff] }
 0x1d5   : > { %v1379_v34 = vmul.f32 %v1343_v60, %v6601_v50  ;;  %v1341_v33 = vpop.permute.xlu0 %1340 }
 0x1d6   : > { %v1378_v55 = vmul.f32 %v1341_v33, %v6606_v51  ;;  %4844 = vmatprep.mubr.f32.mxu1 %v1408_v13  ;;  %v8604_v51 = vld [vmem:[#allocation22_spill] sm:$0xff] }
 0x1d7   : > { %v1411_v6 = vmul.f32 %v6716_v57, %v1379_v34  ;;  %4845 = vmatmul.mubr.f32.gmra.mxu1 %v1409_v49  ;;  %v2343_v0 = vadd.f32 %v6660_v58, %v8604_v51  ;;  %v2342_v49 = vadd.f32 %v6673_v36, %v8605_v31  ;;  %v8608_v34 = vld [vmem:[#allocation2_spill] sm:$0xff]  ;;  %v8612_v51 = vld [vmem:[#allocation25_spill] sm:$0xff] }
 0x1d8   : > { %v1410_v11 = vmul.f32 %v6727_v5, %v1378_v55  ;;  %v1347_v59 = vpop.permute.xlu1 %1346  ;;  %v8609_v55 = vld [vmem:[#allocation59_spill] sm:$0xff]  ;;  %v2344_v31 = vadd.f32 %v6701_v26, %v8612_v51 }
 0x1d9   : > { %v1381_v48 = vmul.f32 %v1347_v59, %v6616_v16  ;;  %v1345_v29 = vpop.permute.xlu0 %1344  ;;  %v8606_v16 = vld [vmem:[#allocation77_spill] sm:$0xff] }
 0x1da   : > { %v1380_v24 = vmul.f32 %v1345_v29, %v6618_v25  ;;  %4847 = vmatprep.mubr.f32.mxu1 %v1410_v11  ;;  %v8607_v25 = vld [vmem:[#allocation58_spill] sm:$0xff]  ;;  %v8610_v11 = vld [vmem:[#allocation3_spill] sm:$0xff]  ;;  %v8611_v29 = vld [vmem:[#allocation24_spill] sm:$0xff] }
 0x1db   : > { %v1413_v37 = vmul.f32 %v6741_v45, %v1381_v48  ;;  %4848 = vmatmul.mubr.f32.gmra.mxu1 %v1411_v6  ;;  %v2471_v60 = vadd.f32 %v8607_v25, %v2343_v0  ;;  %v2470_v6 = vadd.f32 %v8609_v55, %v2342_v49 }
 0x1dc   : > { %v1412_v50 = vmul.f32 %v6752_v39, %v1380_v24  ;;  %v1351_v42 = vpop.permute.xlu1 %1350 }
 0x1dd   : > { %v1383_v1 = vmul.f32 %v1351_v42, %v6629_v2  ;;  %v1349_v4 = vpop.permute.xlu0 %1348  ;;  %v2345_v2 = vadd.f32 %v6688_v30, %v8611_v29  ;;  %v8617_v29 = vld [vmem:[#allocation64_spill] sm:$0xff] }
 0x1de   : > { %v1382_v13 = vmul.f32 %v1349_v4, %v8606_v16  ;;  %4850 = vmatprep.mubr.f32.mxu1 %v1412_v50  ;;  %v8613_v50 = vld [vmem:[#allocation62_spill] sm:$0xff] }
 0x1df   : > { %v1415_v33 = vmul.f32 %v8608_v34, %v1383_v1  ;;  %4851 = vmatmul.mubr.f32.gmra.mxu1 %v1413_v37  ;;  %v2473_v0 = vadd.f32 %v8613_v50, %v2345_v2  ;;  %v8614_v37 = vld [vmem:[#allocation63_spill] sm:$0xff]  ;;  %v8615_v16 = vld [vmem:[#allocation26_spill] sm:$0xff] }
 0x1e0   : > { %v1414_v59 = vmul.f32 %v8610_v11, %v1382_v13  ;;  %v2527_v48 = vpop.permute.xlu1 %2526  ;;  %v2472_v1 = vadd.f32 %v8614_v37, %v2344_v31  ;;  %v2347_v13 = vadd.f32 %v6716_v57, %v8615_v16  ;;  %v8619_v31 = vld [vmem:[#allocation29_spill] sm:$0xff]  ;;  %v1698_v37 = vld [vmem:[%s8355_s5 + $0x10] sm:$0xff] }
 0x1e1   : > { %v2599_v24 = vadd.f32 %v2527_v48, %v2471_v60  ;;  %v2525_v42 = vpop.permute.xlu0 %2524  ;;  %v1700_v60 = vld [vmem:[%s8355_s5 + $0x20] sm:$0xff] }
 0x1e2   : > { %v2598_v4 = vadd.f32 %v2525_v42, %v2470_v6  ;;  %4853 = vmatprep.mubr.f32.mxu1 %v1414_v59  ;;  %v1699_v6 = vld [vmem:[%s8355_s5 + $0x18] sm:$0xff]  ;;  %v8616_v59 = vld [vmem:[#allocation27_spill] sm:$0xff]  ;;  %4878 = vmatprep.subr.mxu0 %v1700_v60  ;;  %v2475_v2 = vadd.f32 %v8617_v29, %v2347_v13 }
 0x1e3   : > { %5093 = vrcp.f32 %v2599_v24  ;;  %4854 = vmatmul.mubr.f32.gmra.mxu1 %v1415_v33  ;;  %v2346_v33 = vadd.f32 %v6727_v5, %v8616_v59  ;;  %4879 = vmatpush3.msra.mxu0 %v1700_v60  ;;  %v8618_v24 = vld [vmem:[#allocation65_spill] sm:$0xff] }
 0x1e4   : > { %5095 = vrcp.f32 %v2598_v4  ;;  %v2531_v49 = vpop.permute.xlu1 %2530  ;;  %4880 = vmatprep.subr.mxu0 %v1699_v6  ;;  %v2349_v4 = vadd.f32 %v6741_v45, %v8619_v31  ;;  %v8622_v60 = vld [vmem:[#allocation69_spill] sm:$0xff] }
 0x1e5   : > { %v2601_v25 = vadd.f32 %v2531_v49, %v2473_v0  ;;  %v2529_v55 = vpop.permute.xlu0 %2528  ;;  %v2474_v42 = vadd.f32 %v8618_v24, %v2346_v33  ;;  %4881 = vmatpush3.msra.mxu0 %v1699_v6  ;;  %v8620_v49 = vld [vmem:[#allocation30_spill] sm:$0xff]  ;;  %v8623_v33 = vld [vmem:[#allocation31_spill] sm:$0xff] }
 0x1e6   : > { %v2600_v48 = vadd.f32 %v2529_v55, %v2472_v1  ;;  %v1697_v1 = vld [vmem:[%s8355_s5 + $0x8] sm:$0xff]  ;;  %v2348_v16 = vadd.f32 %v6752_v39, %v8620_v49  ;;  %4882 = vmatprep.subr.mxu0 %v1698_v37  ;;  %v1696_v24 = vld [vmem:[%s8355_s5] sm:$0xff] }
 0x1e7   : > { %5097 = vrcp.f32 %v2601_v25  ;;  %v8621_v25 = vld [vmem:[#allocation68_spill] sm:$0xff]  ;;  %4883 = vmatpush3.msra.mxu0 %v1698_v37  ;;  %v8627_v37 = vld [vmem:[#allocation71_spill] sm:$0xff] }
 0x1e8   : > { %5099 = vrcp.f32 %v2600_v48  ;;  %v2535_v51 = vpop.permute.xlu1 %2534  ;;  %v2477_v55 = vadd.f32 %v8621_v25, %v2349_v4  ;;  %v2476_v59 = vadd.f32 %v8622_v60, %v2348_v16  ;;  %4884 = vmatprep.subr.mxu0 %v1697_v1  ;;  %v2351_v48 = vadd.f32 %v8608_v34, %v8623_v33  ;;  %v8625_v4 = vld [vmem:[#allocation70_spill] sm:$0xff] }
 0x1e9   : > { %v2603_v50 = vadd.f32 %v2535_v51, %v2475_v2  ;;  %v2533_v0 = vpop.permute.xlu0 %2532  ;;  %4885 = vmatpush3.msra.mxu0 %v1697_v1 }
 0x1ea   : > { %v2602_v13 = vadd.f32 %v2533_v0, %v2474_v42  ;;  %v8624_v42 = vld [vmem:[#allocation33_spill] sm:$0xff]  ;;  %4886 = vmatprep.subr.mxu0 %v1696_v24 }
 0x1eb   : > { %5101 = vrcp.f32 %v2603_v50  ;;  %v2350_v51 = vadd.f32 %v8610_v11, %v8624_v42  ;;  %v2479_v50 = vadd.f32 %v8625_v4, %v2351_v48  ;;  %4887 = vmatpush3.msra.mxu0 %v1696_v24 }
 0x1ec   : > { %5103 = vrcp.f32 %v2602_v13  ;;  %v2539_v6 = vpop.permute.xlu1 %2538 }
 0x1ed   : > { %v2605_v29 = vadd.f32 %v2539_v6, %v2477_v55  ;;  %v2537_v2 = vpop.permute.xlu0 %2536  ;;  %v2478_v49 = vadd.f32 %v8627_v37, %v2350_v51 }
 0x1ee   : > { %v2604_v31 = vadd.f32 %v2537_v2, %v2476_v59 }
 0x1ef   : > { %5105 = vrcp.f32 %v2605_v29 }
 0x1f0   : > { %v7083_v0 = vpop.eup %5093  ;;  %5107 = vrcp.f32 %v2604_v31  ;;  %v2543_v16 = vpop.permute.xlu1 %2542 }
 0x1f1   : > { %8626 = vst [vmem:[#allocation40_spill] sm:$0xff] %v7083_v0  ;;  %v7086_v1 = vpop.eup %5095  ;;  %v2607_v13 = vadd.f32 %v2543_v16, %v2479_v50  ;;  %v2541_v25 = vpop.permute.xlu0 %2540  ;;  %2718 = vrot.lane.b32.xlu1 %v7083_v0, %s5190_s13 }
 0x1f2   : > { %8628 = vst [vmem:[#allocation10_spill] sm:$0xff] %v7086_v1  ;;  %v2606_v55 = vadd.f32 %v2541_v25, %v2478_v49  ;;  %2716 = vrot.lane.b32.xlu0 %v7086_v1, %s5190_s13 }
 0x1f3   : > { %5109 = vrcp.f32 %v2607_v13  ;;  %v8637_v13 = vld [vmem:[#allocation76_spill] sm:$0xff] }
 0x1f4   : > { %v7092_v60 = vpop.eup %5097  ;;  %5111 = vrcp.f32 %v2606_v55  ;;  %v2675_v59 = vpop.permute.xlu1 %2674  ;;  %v8638_v55 = vld [vmem:[#allocation78_spill] sm:$0xff] }
 0x1f5   : > { %8629 = vst [vmem:[#allocation11_spill] sm:$0xff] %v7092_v60  ;;  %v7094_v6 = vpop.eup %5099  ;;  %2722 = vrot.lane.b32.xlu1 %v7092_v60, %s5190_s13  ;;  %v2673_v33 = vpop.permute.xlu0 %2672  ;;  %v2769_v25 = vmul.f32 %v8637_v13, %v2675_v59 }
 0x1f6   : > { %8630 = vst [vmem:[#allocation34_spill] sm:$0xff] %v7094_v6  ;;  %2720 = vrot.lane.b32.xlu0 %v7094_v6, %s5190_s13 }
 0x1f8   : > { %v7100_v48 = vpop.eup %5101  ;;  %v2679_v29 = vpop.permute.xlu1 %2678 }
 0x1f9   : > { %8631 = vst [vmem:[#allocation42_spill] sm:$0xff] %v7100_v48  ;;  %v7102_v2 = vpop.eup %5103  ;;  %2726 = vrot.lane.b32.xlu1 %v7100_v48, %s5190_s13  ;;  %v2677_v24 = vpop.permute.xlu0 %2676  ;;  %v2771_v6 = vmul.f32 %v6655_v27, %v2679_v29 }
 0x1fa   : > { %8632 = vst [vmem:[#allocation35_spill] sm:$0xff] %v7102_v2  ;;  %2724 = vrot.lane.b32.xlu0 %v7102_v2, %s5190_s13 }
 0x1fc   : > { %v7108_v42 = vpop.eup %5105  ;;  %v2683_v51 = vpop.permute.xlu1 %2682 }
 0x1fd   : > { %8633 = vst [vmem:[#allocation12_spill] sm:$0xff] %v7108_v42  ;;  %v7110_v31 = vpop.eup %5107  ;;  %2730 = vrot.lane.b32.xlu1 %v7108_v42, %s5190_s13  ;;  %v2681_v4 = vpop.permute.xlu0 %2680  ;;  %v2768_v42 = vmul.f32 %v8638_v55, %v2673_v33 }
 0x1fe   : > { %8634 = vst [vmem:[#allocation43_spill] sm:$0xff] %v7110_v31  ;;  %2728 = vrot.lane.b32.xlu0 %v7110_v31, %s5190_s13  ;;  %v2770_v31 = vmul.f32 %v6668_v35, %v2677_v24 }
 0x200   : > { %v7116_v50 = vpop.eup %5109  ;;  %v2687_v37 = vpop.permute.xlu1 %2686 }
 0x201   : > { %8635 = vst [vmem:[#allocation13_spill] sm:$0xff] %v7116_v50  ;;  %v7118_v49 = vpop.eup %5111  ;;  %2734 = vrot.lane.b32.xlu1 %v7116_v50, %s5190_s13  ;;  %v2685_v16 = vpop.permute.xlu0 %2684  ;;  %v2772_v50 = vmul.f32 %v6696_v18, %v2681_v4  ;;  %v2775_v33 = vmul.f32 %v6711_v7, %v2687_v37 }
 0x202   : > { %8636 = vst [vmem:[#allocation45_spill] sm:$0xff] %v7118_v49  ;;  %2732 = vrot.lane.b32.xlu0 %v7118_v49, %s5190_s13  ;;  %v2773_v49 = vmul.f32 %v6683_v10, %v2683_v51  ;;  %v2774_v59 = vmul.f32 %v6722_v32, %v2685_v16 }
 0x204   : > { %v2691_v2 = vpop.permute.xlu1 %2690 }
 0x205   : > { %2807 = vperm.xlu1 %5042, %v2769_v25   ;;  %v2689_v48 = vpop.permute.xlu0 %2688  ;;  %v2777_v35 = vmul.f32 %v6736_v54, %v2691_v2 }
 0x206   : > { %2802 = vperm.xlu0 %5041, %v2768_v42   ;;  %v2776_v27 = vmul.f32 %v6747_v52, %v2689_v48 }
 0x208   : > { %v2695_v1 = vpop.permute.xlu1 %2694 }
 0x209   : > { %2812 = vperm.xlu1 %5042, %v2770_v31   ;;  %v2693_v60 = vpop.permute.xlu0 %2692  ;;  %v2779_v29 = vmul.f32 %v6763_v56, %v2695_v1 }
 0x20a   : > { %2817 = vperm.xlu0 %5041, %v2771_v6   ;;  %v2778_v18 = vmul.f32 %v6776_v22, %v2693_v60 }
 0x20c   : > { %v2699_v42 = vpop.permute.xlu1 %2698 }
 0x20d   : > { %2822 = vperm.xlu1 %5042, %v2772_v50   ;;  %v2697_v13 = vpop.permute.xlu0 %2696  ;;  %v2781_v32 = vmul.f32 %v6792_v62, %v2699_v42 }
 0x20e   : > { %2827 = vperm.xlu0 %5041, %v2773_v49   ;;  %v2780_v7 = vmul.f32 %v6805_v12, %v2697_v13 }
 0x210   : > { %v2703_v10 = vpop.permute.xlu1 %2702 }
 0x211   : > { %2832 = vperm.xlu1 %5042, %v2774_v59   ;;  %v2701_v6 = vpop.permute.xlu0 %2700  ;;  %v2783_v52 = vmul.f32 %v6817_v23, %v2703_v10 }
 0x212   : > { %2837 = vperm.xlu0 %5041, %v2775_v33   ;;  %v2782_v54 = vmul.f32 %v6827_v8, %v2701_v6 }
 0x214   : > { %v2707_v51 = vpop.permute.xlu1 %2706 }
 0x215   : > { %2842 = vperm.xlu1 %5042, %v2776_v27   ;;  %v2705_v24 = vpop.permute.xlu0 %2704  ;;  %v2785_v1 = vmul.f32 %v6842_v53, %v2707_v51  ;;  %v7149_v53 = vld [vmem:[%s8354_s4] ss:$0 sm:$0xff] }
 0x216   : > { %2847 = vperm.xlu0 %5041, %v2777_v35   ;;  %v2784_v22 = vmul.f32 %v6853_v3, %v2705_v24 }
 0x218   : > { %v2711_v56 = vpop.permute.xlu1 %2710 }
 0x219   : > { %2852 = vperm.xlu1 %5042, %v2778_v18   ;;  %v2709_v48 = vpop.permute.xlu0 %2708  ;;  %v2787_v12 = vmul.f32 %v6865_v47, %v2711_v56 }
 0x21a   : > { %2857 = vperm.xlu0 %5041, %v2779_v29   ;;  %v2786_v62 = vmul.f32 %v6875_v44, %v2709_v48 }
 0x21c   : > { %v2715_v2 = vpop.permute.xlu1 %2714 }
 0x21d   : > { %2862 = vperm.xlu1 %5042, %v2780_v7   ;;  %v2713_v60 = vpop.permute.xlu0 %2712  ;;  %v2789_v8 = vmul.f32 %v6890_v40, %v2715_v2 }
 0x21e   : > { %2867 = vperm.xlu0 %5041, %v2781_v32   ;;  %v2788_v23 = vmul.f32 %v6901_v43, %v2713_v60 }
 0x221   : > { %2872 = vperm.xlu1 %5042, %v2782_v54  }
 0x222   : > { %2877 = vperm.xlu0 %5041, %v2783_v52  }
 0x225   : > { %2882 = vperm.xlu1 %5042, %v2784_v22  }
 0x226   : > { %2887 = vperm.xlu0 %5041, %v2785_v1  }
 0x229   : > { %2892 = vperm.xlu1 %5042, %v2786_v62  }
 0x22a   : > { %2897 = vperm.xlu0 %5041, %v2787_v12  }
 0x22d   : > { %2902 = vperm.xlu1 %5042, %v2788_v23  }
 0x22e   : > { %2907 = vperm.xlu0 %5041, %v2789_v8  }
 0x242   : > { %v4810_v3 = vpop.f32.mrf.mxu1 }
 0x243   : > { %v1511_v44 = vadd.f32 %v4810_v3, %v7149_v53 }
 0x244   : > { %v1505_v31 = vpop.f32.mrf.mxu1 }
 0x245   : > { %v1506_v47 = vadd.f32 %v7149_v53, %v1505_v31  ;;  %v1665_v37 = vmax.f32 %v1511_v44, 0.0 }
 0x246   : > { %v4813_v50 = vpop.f32.mrf.mxu1 }
 0x247   : > { %v1664_v4 = vmax.f32 %v1506_v47, 0.0  ;;  %v1521_v43 = vadd.f32 %v4813_v50, %v7149_v53 }
 0x248   : > { %v1515_v49 = vpop.f32.mrf.mxu1 }
 0x249   : > { %4888 = vmatprep.mubr.f32.mxu0 %v1664_v4  ;;  %v1516_v40 = vadd.f32 %v7149_v53, %v1515_v49  ;;  %v1667_v25 = vmax.f32 %v1521_v43, 0.0 }
 0x24a   : > { %4889 = vmatmul.mubr.f32.vlgmr.msra.gmra.mxu0 %v1665_v37 }
 0x24b   : > { %v1666_v16 = vmax.f32 %v1516_v40, 0.0 }
 0x24d   : > { %4891 = vmatprep.mubr.f32.mxu0 %v1666_v16  ;;  %v4816_v55 = vpop.f32.mrf.mxu1 }
 0x24e   : > { %4892 = vmatmul.mubr.f32.gmra.mxu0 %v1667_v25  ;;  %v1531_v59 = vadd.f32 %v4816_v55, %v7149_v53 }
 0x24f   : > { %v1525_v33 = vpop.f32.mrf.mxu1 }
 0x250   : > { %v1526_v13 = vadd.f32 %v7149_v53, %v1525_v33  ;;  %v1669_v27 = vmax.f32 %v1531_v59, 0.0 }
 0x252   : > { %v1668_v42 = vmax.f32 %v1526_v13, 0.0 }
 0x254   : > { %4894 = vmatprep.mubr.f32.mxu0 %v1668_v42 }
 0x255   : > { %v4819_v35 = vpop.f32.mrf.mxu1  ;;  %4895 = vmatmul.mubr.f32.gmra.mxu0 %v1669_v27 }
 0x256   : > { %v1541_v6 = vadd.f32 %v4819_v35, %v7149_v53 }
 0x257   : > { %v1535_v18 = vpop.f32.mrf.mxu1 }
 0x258   : > { %v1536_v10 = vadd.f32 %v7149_v53, %v1535_v18  ;;  %v1671_v7 = vmax.f32 %v1541_v6, 0.0 }
 0x25a   : > { %v1670_v29 = vmax.f32 %v1536_v10, 0.0  ;;  %v5193_v10 = vmov 107  }
 0x25c   : > { %4897 = vmatprep.mubr.f32.mxu0 %v1670_v29 }
 0x25d   : > { %v4822_v32 = vpop.f32.mrf.mxu1  ;;  %4898 = vmatmul.mubr.f32.gmra.mxu0 %v1671_v7 }
 0x25e   : > { %v1551_v24 = vadd.f32 %v4822_v32, %v7149_v53  ;;  %v8639_v32 = vld [vmem:[#allocation4_spill] sm:$0xff] }
 0x25f   : > { %v1545_v51 = vpop.f32.mrf.mxu1 }
 0x260   : > { %v1546_v54 = vadd.f32 %v7149_v53, %v1545_v51  ;;  %v1673_v22 = vmax.f32 %v1551_v24, 0.0  ;;  %v8640_v24 = vld [vmem:[#allocation5_spill] sm:$0xff] }
 0x262   : > { %v1672_v52 = vmax.f32 %v1546_v54, 0.0 }
 0x263   : > { %v2719_v48 = vpop.permute.xlu1 %2718 }
 0x264   : > { %v2791_v56 = vmul.f32 %v6660_v58, %v2719_v48  ;;  %v2717_v1 = vpop.permute.xlu0 %2716  ;;  %4900 = vmatprep.mubr.f32.mxu0 %v1672_v52  ;;  %v8641_v48 = vld [vmem:[#allocation6_spill] sm:$0xff] }
 0x265   : > { %v2790_v62 = vmul.f32 %v6673_v36, %v2717_v1  ;;  %v4825_v12 = vpop.f32.mrf.mxu1  ;;  %4901 = vmatmul.mubr.f32.gmra.mxu0 %v1673_v22 }
 0x266   : > { %2917 = vperm.xlu0 %5041, %v2791_v56   ;;  %v1561_v2 = vadd.f32 %v4825_v12, %v7149_v53  ;;  %v8643_v12 = vld [vmem:[#allocation28_spill] sm:$0xff] }
 0x267   : > { %2912 = vperm.xlu1 %5042, %v2790_v62   ;;  %v2723_v60 = vpop.permute.xlu1 %2722  ;;  %v1555_v23 = vpop.f32.mrf.mxu1  ;;  %v8642_v62 = vld [vmem:[#allocation7_spill] sm:$0xff] }
 0x268   : > { %v2793_v8 = vmul.f32 %v6688_v30, %v2723_v60  ;;  %v2721_v3 = vpop.permute.xlu0 %2720  ;;  %v1556_v44 = vadd.f32 %v7149_v53, %v1555_v23  ;;  %v1675_v36 = vmax.f32 %v1561_v2, 0.0 }
 0x269   : > { %v2792_v31 = vmul.f32 %v6701_v26, %v2721_v3 }
 0x26a   : > { %2927 = vperm.xlu0 %5041, %v2793_v8   ;;  %v1674_v58 = vmax.f32 %v1556_v44, 0.0 }
 0x26b   : > { %2922 = vperm.xlu1 %5042, %v2792_v31   ;;  %v2727_v47 = vpop.permute.xlu1 %2726 }
 0x26c   : > { %v2795_v4 = vmul.f32 %v6716_v57, %v2727_v47  ;;  %v2725_v50 = vpop.permute.xlu0 %2724  ;;  %4903 = vmatprep.mubr.f32.mxu0 %v1674_v58  ;;  %v4828_v43 = vpop.f32.mrf.mxu1 }
 0x26d   : > { %v2794_v37 = vmul.f32 %v6727_v5, %v2725_v50  ;;  %4904 = vmatmul.mubr.f32.gmra.mxu0 %v1675_v36  ;;  %v1571_v49 = vadd.f32 %v4828_v43, %v7149_v53 }
 0x26e   : > { %2937 = vperm.xlu0 %5041, %v2795_v4   ;;  %v1565_v40 = vpop.f32.mrf.mxu1 }
 0x26f   : > { %2932 = vperm.xlu1 %5042, %v2794_v37   ;;  %v2731_v30 = vpop.permute.xlu1 %2730  ;;  %v1566_v25 = vadd.f32 %v7149_v53, %v1565_v40  ;;  %v1677_v33 = vmax.f32 %v1571_v49, 0.0  ;;  %v1990_v40 = vld [vmem:[%s8357_s7 + $0x70] sm:$0xff] }
 0x270   : > { %v2797_v26 = vmul.f32 %v6741_v45, %v2731_v30  ;;  %v2729_v16 = vpop.permute.xlu0 %2728  ;;  %v1991_v30 = vld [vmem:[%s8357_s7 + $0x78] sm:$0xff] }
 0x271   : > { %v2796_v55 = vmul.f32 %v6752_v39, %v2729_v16  ;;  %v1676_v57 = vmax.f32 %v1566_v25, 0.0  ;;  %4936 = vmatprep.subr.mxu1 %v1991_v30 }
 0x272   : > { %2947 = vperm.xlu0 %5041, %v2797_v26   ;;  %v4831_v59 = vpop.f32.mrf.mxu1  ;;  %4937 = vmatpush3.msra.mxu1 %v1991_v30  ;;  %v8657_v30 = vld [vmem:[#allocation42_spill] sm:$0xff] }
 0x273   : > { %2942 = vperm.xlu1 %5042, %v2796_v55   ;;  %v2735_v5 = vpop.permute.xlu1 %2734  ;;  %v1581_v27 = vadd.f32 %v4831_v59, %v7149_v53  ;;  %4906 = vmatprep.mubr.f32.mxu0 %v1676_v57  ;;  %v1989_v57 = vld [vmem:[%s8357_s7 + $0x68] sm:$0xff] }
 0x274   : > { %v2799_v13 = vmul.f32 %v8608_v34, %v2735_v5  ;;  %v2733_v42 = vpop.permute.xlu0 %2732  ;;  %v1575_v35 = vpop.f32.mrf.mxu1  ;;  %4907 = vmatmul.mubr.f32.gmra.mxu0 %v1677_v33  ;;  %4938 = vmatprep.subr.mxu1 %v1990_v40 }
 0x275   : > { %v2798_v45 = vmul.f32 %v8610_v11, %v2733_v42  ;;  %v1576_v6 = vadd.f32 %v7149_v53, %v1575_v35  ;;  %v1679_v18 = vmax.f32 %v1581_v27, 0.0  ;;  %4939 = vmatpush3.msra.mxu1 %v1990_v40  ;;  %v8644_v27 = vld [vmem:[#allocation38_spill] sm:$0xff]  ;;  %v8658_v40 = vld [vmem:[#allocation35_spill] sm:$0xff] }
 0x276   : > { %2957 = vperm.xlu0 %5041, %v2799_v13   ;;  %4940 = vmatprep.subr.mxu1 %v1989_v57  ;;  %v1988_v35 = vld [vmem:[%s8357_s7 + $0x60] sm:$0xff] }
 0x277   : > { %2952 = vperm.xlu1 %5042, %v2798_v45   ;;  %v1678_v39 = vmax.f32 %v1576_v6, 0.0  ;;  %v8645_v6 = vld [vmem:[#allocation8_spill] sm:$0xff]  ;;  %4941 = vmatpush3.msra.mxu1 %v1989_v57  ;;  %v8661_v57 = vld [vmem:[#allocation43_spill] sm:$0xff] }
 0x278   : > { %4942 = vmatprep.subr.mxu1 %v1988_v35 }
 0x279   : > { %4909 = vmatprep.mubr.f32.mxu0 %v1678_v39  ;;  %4943 = vmatpush3.msra.mxu1 %v1988_v35  ;;  %v1978_v35 = vld [vmem:[%s8357_s7 + $0x10] sm:$0xff] }
 0x27a   : > { %2994 = vrot.lane.b32.xlu0 %v6773_v41, %s5192_s21  ;;  %v4834_v34 = vpop.f32.mrf.mxu1  ;;  %4910 = vmatmul.mubr.f32.gmra.mxu0 %v1679_v18 }
 0x27b   : > { %2992 = vrot.lane.b32.xlu1 %v6787_v61, %s5192_s21  ;;  %5044 = vset.pattern.permute.xlu0 %v5193_v10  ;;  %v1591_v11 = vadd.f32 %v4834_v34, %v7149_v53 }
 0x27c   : > { %v1585_v29 = vpop.f32.mrf.mxu1  ;;  %5043 = vset.pattern.permute.xlu1 %v5193_v10 }
 0x27d   : > { %v1586_v7 = vadd.f32 %v7149_v53, %v1585_v29  ;;  %v1681_v54 = vmax.f32 %v1591_v11, 0.0 }
 0x27e   : > { %2998 = vrot.lane.b32.xlu0 %v8639_v32, %s5192_s21 }
 0x27f   : > { %2996 = vrot.lane.b32.xlu1 %v8640_v24, %s5192_s21  ;;  %v1680_v51 = vmax.f32 %v1586_v7, 0.0 }
 0x280   : > { %v7244_v29 = vpop.permute.xlu1 %2807 }
 0x281   : > { %4912 = vmatprep.mubr.f32.mxu0 %v1680_v51  ;;  %v7241_v18 = vpop.permute.xlu0 %2802  ;;  %8647 = vst [vmem:[#allocation14_spill] sm:$0xff] %v7244_v29  ;;  %v8648_v51 = vld [vmem:[#allocation9_spill] sm:$0xff]  ;;  %v7453_v29 = vld [vmem:[%s5278_s23 + $0x90] sm:$0xff] }
 0x282   : > { %3002 = vrot.lane.b32.xlu0 %v6824_v14, %s5192_s21  ;;  %v4837_v52 = vpop.f32.mrf.mxu1  ;;  %4913 = vmatmul.mubr.f32.gmra.mxu0 %v1681_v54  ;;  %8646 = vst [vmem:[#allocation46_spill] sm:$0xff] %v7241_v18  ;;  %v1987_v54 = vld [vmem:[%s8357_s7 + $0x58] sm:$0xff]  ;;  %8692 = vst [vmem:[#allocation77_spill] sm:$0xff] %v7453_v29 }
 0x283   : > { %3000 = vrot.lane.b32.xlu1 %v8641_v48, %s5192_s21  ;;  %v1601_v22 = vadd.f32 %v4837_v52, %v7149_v53  ;;  %4944 = vmatprep.subr.mxu1 %v1987_v54 }
 0x284   : > { %v1595_v56 = vpop.f32.mrf.mxu1  ;;  %4945 = vmatpush3.msra.mxu1 %v1987_v54 }
 0x285   : > { %v1596_v1 = vadd.f32 %v7149_v53, %v1595_v56  ;;  %v1683_v2 = vmax.f32 %v1601_v22, 0.0  ;;  %v8649_v22 = vld [vmem:[#allocation32_spill] sm:$0xff] }
 0x286   : > { %3006 = vrot.lane.b32.xlu0 %v8642_v62, %s5192_s21 }
 0x287   : > { %3004 = vrot.lane.b32.xlu1 %v8643_v12, %s5192_s21  ;;  %v1682_v60 = vmax.f32 %v1596_v1, 0.0 }
 0x289   : > { %4915 = vmatprep.mubr.f32.mxu0 %v1682_v60 }
 0x28a   : > { %3010 = vrot.lane.b32.xlu0 %v6872_v19, %s5192_s21  ;;  %v4840_v23 = vpop.f32.mrf.mxu1  ;;  %4916 = vmatmul.mubr.f32.gmra.mxu0 %v1683_v2 }
 0x28b   : > { %3008 = vrot.lane.b32.xlu1 %v6883_v46, %s5192_s21  ;;  %v1611_v8 = vadd.f32 %v4840_v23, %v7149_v53 }
 0x28c   : > { %v1605_v3 = vpop.f32.mrf.mxu1 }
 0x28d   : > { %v1606_v44 = vadd.f32 %v7149_v53, %v1605_v3  ;;  %v1685_v58 = vmax.f32 %v1611_v8, 0.0  ;;  %v1986_v8 = vld [vmem:[%s8357_s7 + $0x50] sm:$0xff]  ;;  %v7261_v3 = vpop.permute.xlu0 %2817 }
 0x28e   : > { %3014 = vrot.lane.b32.xlu0 %v6898_v38, %s5192_s21  ;;  %8650 = vst [vmem:[#allocation15_spill] sm:$0xff] %v7261_v3  ;;  %4946 = vmatprep.subr.mxu1 %v1986_v8  ;;  %v7435_v3 = vld [vmem:[%s5278_s23 + $0x70] sm:$0xff] }
 0x28f   : > { %3012 = vrot.lane.b32.xlu1 %v6908_v20, %s5192_s21  ;;  %v1684_v31 = vmax.f32 %v1606_v44, 0.0  ;;  %v8651_v44 = vld [vmem:[#allocation10_spill] sm:$0xff]  ;;  %4947 = vmatpush3.msra.mxu1 %v1986_v8 }
 0x291   : > { %4918 = vmatprep.mubr.f32.mxu0 %v1684_v31  ;;  %v7265_v31 = vpop.permute.xlu1 %2812 }
 0x292   : > { %v4843_v47 = vpop.f32.mrf.mxu1  ;;  %3018 = vrot.lane.b32.xlu0 %v6916_v28, %s5192_s21  ;;  %4919 = vmatmul.mubr.f32.gmra.mxu0 %v1685_v58  ;;  %8652 = vst [vmem:[#allocation36_spill] sm:$0xff] %v7265_v31  ;;  %v7431_v31 = vld [vmem:[%s5278_s23 + $0x68] sm:$0xff] }
 0x293   : > { %3016 = vrot.lane.b32.xlu1 %v6921_v63, %s5192_s21  ;;  %v1621_v36 = vadd.f32 %v4843_v47, %v7149_v53 }
 0x294   : > { %v1615_v4 = vpop.f32.mrf.mxu1 }
 0x295   : > { %v1616_v50 = vadd.f32 %v7149_v53, %v1615_v4  ;;  %v1687_v49 = vmax.f32 %v1621_v36, 0.0  ;;  %v1985_v36 = vld [vmem:[%s8357_s7 + $0x48] sm:$0xff]  ;;  %v8654_v4 = vld [vmem:[#allocation34_spill] sm:$0xff] }
 0x296   : > { %3022 = vrot.lane.b32.xlu0 %v6928_v21, %s5192_s21  ;;  %4948 = vmatprep.subr.mxu1 %v1985_v36 }
 0x297   : > { %v1686_v37 = vmax.f32 %v1616_v50, 0.0  ;;  %v4846_v43 = vpop.f32.mrf.mxu1  ;;  %3020 = vrot.lane.b32.xlu1 %v6932_v9, %s5192_s21  ;;  %v1984_v50 = vld [vmem:[%s8357_s7 + $0x40] sm:$0xff]  ;;  %4949 = vmatpush3.msra.mxu1 %v1985_v36 }
 0x298   : > { %v1631_v26 = vadd.f32 %v4846_v43, %v7149_v53  ;;  %v7279_v43 = vpop.permute.xlu1 %2822  ;;  %4950 = vmatprep.subr.mxu1 %v1984_v50 }
 0x299   : > { %v1625_v16 = vpop.f32.mrf.mxu1  ;;  %4921 = vmatprep.mubr.f32.mxu0 %v1686_v37  ;;  %v7277_v37 = vpop.permute.xlu0 %2827  ;;  %8656 = vst [vmem:[#allocation37_spill] sm:$0xff] %v7279_v43  ;;  %4951 = vmatpush3.msra.mxu1 %v1984_v50 }
 0x29a   : > { %v1626_v25 = vadd.f32 %v7149_v53, %v1625_v16  ;;  %4922 = vmatmul.mubr.f32.gmra.mxu0 %v1687_v49  ;;  %3026 = vrot.lane.b32.xlu0 %v6936_v17, %s5192_s21  ;;  %v1689_v5 = vmax.f32 %v1631_v26, 0.0  ;;  %8655 = vst [vmem:[#allocation48_spill] sm:$0xff] %v7277_v37  ;;  %v1983_v49 = vld [vmem:[%s8357_s7 + $0x38] sm:$0xff]  ;;  %v1982_v26 = vld [vmem:[%s8357_s7 + $0x30] sm:$0xff] }
 0x29b   : > { %v4849_v55 = vpop.f32.mrf.mxu1  ;;  %3024 = vrot.lane.b32.xlu1 %v6941_v15, %s5192_s21  ;;  %4952 = vmatprep.subr.mxu1 %v1983_v49  ;;  %v8659_v16 = vld [vmem:[#allocation12_spill] sm:$0xff] }
 0x29c   : > { %v1688_v59 = vmax.f32 %v1626_v25, 0.0  ;;  %v1641_v33 = vadd.f32 %v4849_v55, %v7149_v53  ;;  %4953 = vmatpush3.msra.mxu1 %v1983_v49  ;;  %v1981_v25 = vld [vmem:[%s8357_s7 + $0x28] sm:$0xff] }
 0x29d   : > { %v1635_v13 = vpop.f32.mrf.mxu1  ;;  %v7296_v55 = vpop.permute.xlu0 %2837  ;;  %4954 = vmatprep.subr.mxu1 %v1982_v26 }
 0x29e   : > { %v1636_v42 = vadd.f32 %v7149_v53, %v1635_v13  ;;  %4924 = vmatprep.mubr.f32.mxu0 %v1688_v59  ;;  %3030 = vrot.lane.b32.xlu0 %v8644_v27, %s5192_s21  ;;  %v1691_v34 = vmax.f32 %v1641_v33, 0.0  ;;  %8660 = vst [vmem:[#allocation16_spill] sm:$0xff] %v7296_v55  ;;  %v7300_v59 = vpop.permute.xlu1 %2832  ;;  %v8663_v33 = vld [vmem:[#allocation13_spill] sm:$0xff] }
 0x29f   : > { %v4852_v45 = vpop.f32.mrf.mxu1  ;;  %4925 = vmatmul.mubr.f32.gmra.mxu0 %v1689_v5  ;;  %3028 = vrot.lane.b32.xlu1 %v8645_v6, %s5192_s21  ;;  %8662 = vst [vmem:[#allocation17_spill] sm:$0xff] %v7300_v59  ;;  %v1980_v5 = vld [vmem:[%s8357_s7 + $0x20] sm:$0xff]  ;;  %v1979_v13 = vld [vmem:[%s8357_s7 + $0x18] sm:$0xff] }
 0x2a0   : > { %v1690_v39 = vmax.f32 %v1636_v42, 0.0  ;;  %v1651_v10 = vadd.f32 %v4852_v45, %v7149_v53  ;;  %4955 = vmatpush3.msra.mxu1 %v1982_v26  ;;  %v8664_v42 = vld [vmem:[#allocation45_spill] sm:$0xff] }
 0x2a1   : > { %v1645_v11 = vpop.f32.mrf.mxu1  ;;  %4956 = vmatprep.subr.mxu1 %v1981_v25  ;;  %v7315_v45 = vpop.permute.xlu0 %2847  ;;  %v7421_v55 = vld [vmem:[%s5278_s23 + $0x58] sm:$0xff] }
 0x2a2   : > { %v1646_v7 = vadd.f32 %v7149_v53, %v1645_v11  ;;  %4927 = vmatprep.mubr.f32.mxu0 %v1690_v39  ;;  %3034 = vrot.lane.b32.xlu0 %v8648_v51, %s5192_s21  ;;  %v1693_v1 = vmax.f32 %v1651_v10, 0.0  ;;  %8665 = vst [vmem:[#allocation50_spill] sm:$0xff] %v7315_v45  ;;  %v7317_v39 = vpop.permute.xlu1 %2842  ;;  %v1976_v10 = vld [vmem:[%s8357_s7] sm:$0xff] }
 0x2a3   : > { %v4855_v52 = vpop.f32.mrf.mxu1  ;;  %4928 = vmatmul.mubr.f32.gmra.mxu0 %v1691_v34  ;;  %3032 = vrot.lane.b32.xlu1 %v8649_v22, %s5192_s21  ;;  %8666 = vst [vmem:[#allocation18_spill] sm:$0xff] %v7317_v39  ;;  %v1977_v34 = vld [vmem:[%s8357_s7 + $0x8] sm:$0xff] }
 0x2a4   : > { %v1692_v56 = vmax.f32 %v1646_v7, 0.0  ;;  %v1661_v60 = vadd.f32 %v4855_v52, %v7149_v53  ;;  %4957 = vmatpush3.msra.mxu1 %v1981_v25 }
 0x2a5   : > { %v1655_v2 = vpop.f32.mrf.mxu1  ;;  %4958 = vmatprep.subr.mxu1 %v1980_v5  ;;  %v7325_v11 = vpop.permute.xlu0 %2857 }
 0x2a6   : > { %v1656_v23 = vadd.f32 %v7149_v53, %v1655_v2  ;;  %4930 = vmatprep.mubr.f32.mxu0 %v1692_v56  ;;  %3038 = vrot.lane.b32.xlu0 %v7083_v0, %s5192_s21  ;;  %v1695_v47 = vmax.f32 %v1661_v60, 0.0  ;;  %v8653_v53 = vld [vmem:[#allocation11_spill] sm:$0xff]  ;;  %8667 = vst [vmem:[#allocation19_spill] sm:$0xff] %v7325_v11  ;;  %v7327_v7 = vpop.permute.xlu1 %2852 }
 0x2a7   : > { %4931 = vmatmul.mubr.f32.gmra.mxu0 %v1693_v1  ;;  %3036 = vrot.lane.b32.xlu1 %v8651_v44, %s5192_s21  ;;  %8668 = vst [vmem:[#allocation39_spill] sm:$0xff] %v7327_v7 }
 0x2a8   : > { %v1694_v58 = vmax.f32 %v1656_v23, 0.0  ;;  %4959 = vmatpush3.msra.mxu1 %v1980_v5 }
 0x2a9   : > { %4960 = vmatprep.subr.mxu1 %v1979_v13  ;;  %v7329_v54 = vpop.permute.xlu0 %2867 }
 0x2aa   : > { %4933 = vmatprep.mubr.f32.mxu0 %v1694_v58  ;;  %3042 = vrot.lane.b32.xlu0 %v8653_v53, %s5192_s21  ;;  %8669 = vst [vmem:[#allocation52_spill] sm:$0xff] %v7329_v54  ;;  %v7331_v52 = vpop.permute.xlu1 %2862 }
 0x2ab   : > { %4934 = vmatmul.mubr.f32.gmra.mxu0 %v1695_v47  ;;  %3040 = vrot.lane.b32.xlu1 %v8654_v4, %s5192_s21  ;;  %8670 = vst [vmem:[#allocation41_spill] sm:$0xff] %v7331_v52 }
 0x2ac   : > { %4961 = vmatpush3.msra.mxu1 %v1979_v13 }
 0x2ad   : > { %4962 = vmatprep.subr.mxu1 %v1978_v35  ;;  %v7333_v56 = vpop.permute.xlu0 %2877 }
 0x2ae   : > { %3046 = vrot.lane.b32.xlu0 %v8657_v30, %s5192_s21  ;;  %4963 = vmatpush3.msra.mxu1 %v1978_v35  ;;  %8671 = vst [vmem:[#allocation53_spill] sm:$0xff] %v7333_v56  ;;  %v7335_v1 = vpop.permute.xlu1 %2872  ;;  %v7398_v56 = vld [vmem:[%s5278_s23 + $0x38] sm:$0xff] }
 0x2af   : > { %3044 = vrot.lane.b32.xlu1 %v8658_v40, %s5192_s21  ;;  %4964 = vmatprep.subr.mxu1 %v1977_v34  ;;  %8672 = vst [vmem:[#allocation20_spill] sm:$0xff] %v7335_v1 }
 0x2b0   : > { %4965 = vmatpush3.msra.mxu1 %v1977_v34 }
 0x2b1   : > { %4966 = vmatprep.subr.mxu1 %v1976_v10  ;;  %v7337_v60 = vpop.permute.xlu0 %2887 }
 0x2b2   : > { %3050 = vrot.lane.b32.xlu0 %v8659_v16, %s5192_s21  ;;  %4967 = vmatpush3.msra.mxu1 %v1976_v10  ;;  %8673 = vst [vmem:[#allocation21_spill] sm:$0xff] %v7337_v60  ;;  %v7339_v2 = vpop.permute.xlu1 %2882 }
 0x2b3   : > { %3048 = vrot.lane.b32.xlu1 %v8661_v57, %s5192_s21  ;;  %8674 = vst [vmem:[#allocation55_spill] sm:$0xff] %v7339_v2  ;;  %v7390_v2 = vld [vmem:[%s5278_s23 + $0x28] sm:$0xff] }
 0x2b5   : > { %v7341_v23 = vpop.permute.xlu0 %2897 }
 0x2b6   : > { %3054 = vrot.lane.b32.xlu0 %v8663_v33, %s5192_s21  ;;  %8675 = vst [vmem:[#allocation56_spill] sm:$0xff] %v7341_v23  ;;  %v7343_v8 = vpop.permute.xlu1 %2892  ;;  %v7386_v23 = vld [vmem:[%s5278_s23 + $0x20] sm:$0xff] }
 0x2b7   : > { %3052 = vrot.lane.b32.xlu1 %v8664_v42, %s5192_s21  ;;  %8676 = vst [vmem:[#allocation44_spill] sm:$0xff] %v7343_v8  ;;  %v7382_v8 = vld [vmem:[%s5278_s23 + $0x18] sm:$0xff] }
 0x2b9   : > { %v7345_v58 = vpop.permute.xlu0 %2907 }
 0x2ba   : > { %8677 = vst [vmem:[#allocation47_spill] sm:$0xff] %v7345_v58  ;;  %v7347_v47 = vpop.permute.xlu1 %2902 }
 0x2bb   : > { %8678 = vst [vmem:[#allocation49_spill] sm:$0xff] %v7347_v47 }
 0x2e1   : > { %v7349_v36 = vpop.permute.xlu0 %2917 }
 0x2e2   : > { %8679 = vst [vmem:[#allocation51_spill] sm:$0xff] %v7349_v36  ;;  %v7351_v50 = vpop.permute.xlu1 %2912 }
 0x2e3   : > { %8680 = vst [vmem:[#allocation54_spill] sm:$0xff] %v7351_v50 }
 0x2e5   : > { %v7353_v49 = vpop.permute.xlu0 %2927 }
 0x2e6   : > { %8681 = vst [vmem:[#allocation57_spill] sm:$0xff] %v7353_v49  ;;  %v7355_v26 = vpop.permute.xlu1 %2922  ;;  %v7370_v49 = vld [vmem:[%s5278_s23 + $0x8] sm:$0xff] }
 0x2e7   : > { %8682 = vst [vmem:[#allocation60_spill] sm:$0xff] %v7355_v26 }
 0x2e9   : > { %v7357_v25 = vpop.permute.xlu0 %2937 }
 0x2ea   : > { %8683 = vst [vmem:[#allocation61_spill] sm:$0xff] %v7357_v25  ;;  %v7359_v5 = vpop.permute.xlu1 %2932  ;;  %v7374_v25 = vld [vmem:[%s5278_s23] sm:$0xff] }
 0x2eb   : > { %8684 = vst [vmem:[#allocation66_spill] sm:$0xff] %v7359_v5 }
 0x2ed   : > { %v7361_v13 = vpop.permute.xlu0 %2947 }
 0x2ee   : > { %8685 = vst [vmem:[#allocation67_spill] sm:$0xff] %v7361_v13  ;;  %v7363_v35 = vpop.permute.xlu1 %2942 }
 0x2ef   : > { %8686 = vst [vmem:[#allocation72_spill] sm:$0xff] %v7363_v35 }
 0x2f1   : > { %v7365_v34 = vpop.permute.xlu0 %2957 }
 0x2f2   : > { %8687 = vst [vmem:[#allocation73_spill] sm:$0xff] %v7365_v34  ;;  %v7367_v10 = vpop.permute.xlu1 %2952  ;;  %v7378_v34 = vld [vmem:[%s5278_s23 + $0x10] sm:$0xff] }
 0x2f3   : > { %8688 = vst [vmem:[#allocation74_spill] sm:$0xff] %v7367_v10 }
 0x2f5   : > { %v2995_v36 = vpop.permute.xlu0 %2994 }
 0x2f6   : > { %v2993_v50 = vpop.permute.xlu1 %2992  ;;  %v3089_v26 = vmul.f32 %v7370_v49, %v2995_v36 }
 0x2f7   : > { %v3088_v5 = vmul.f32 %v7374_v25, %v2993_v50 }
 0x2f8   : > { %3127 = vperm.xlu0 %5044, %v3089_v26  }
 0x2f9   : > { %3122 = vperm.xlu1 %5043, %v3088_v5   ;;  %v2999_v35 = vpop.permute.xlu0 %2998 }
 0x2fa   : > { %v2997_v13 = vpop.permute.xlu1 %2996  ;;  %v3091_v36 = vmul.f32 %v7382_v8, %v2999_v35 }
 0x2fb   : > { %v3090_v10 = vmul.f32 %v7378_v34, %v2997_v13 }
 0x2fd   : > { %3132 = vperm.xlu1 %5043, %v3090_v10   ;;  %v3003_v47 = vpop.permute.xlu0 %3002  ;;  %v7394_v10 = vld [vmem:[%s5278_s23 + $0x30] sm:$0xff] }
 0x2fe   : > { %v3001_v58 = vpop.permute.xlu1 %3000  ;;  %v3093_v13 = vmul.f32 %v7390_v2, %v3003_v47  ;;  %v7408_v47 = vld [vmem:[%s8356_s6] ss:$0 sm:$0xff] }
 0x2ff   : > { %v3092_v50 = vmul.f32 %v7386_v23, %v3001_v58 }
 0x301   : > { %3142 = vperm.xlu0 %5044, %v3092_v50   ;;  %3137 = vperm.xlu1 %5043, %v3091_v36   ;;  %v3007_v26 = vpop.permute.xlu0 %3006  ;;  %v7402_v36 = vld [vmem:[%s5278_s23 + $0x40] sm:$0xff] }
 0x302   : > { %v3005_v5 = vpop.permute.xlu1 %3004  ;;  %v3095_v58 = vmul.f32 %v7398_v56, %v3007_v26  ;;  %v7412_v26 = vld [vmem:[%s5278_s23 + $0x48] sm:$0xff] }
 0x303   : > { %v3094_v60 = vmul.f32 %v7394_v10, %v3005_v5 }
 0x305   : > { %3152 = vperm.xlu0 %5044, %v3094_v60   ;;  %3147 = vperm.xlu1 %5043, %v3093_v13   ;;  %v3011_v35 = vpop.permute.xlu0 %3010 }
 0x306   : > { %v3009_v1 = vpop.permute.xlu1 %3008  ;;  %v3097_v7 = vmul.f32 %v7412_v26, %v3011_v35  ;;  %v7425_v35 = vld [vmem:[%s5278_s23 + $0x60] sm:$0xff] }
 0x307   : > { %v3096_v50 = vmul.f32 %v7402_v36, %v3009_v1  ;;  %v7416_v1 = vld [vmem:[%s5278_s23 + $0x50] sm:$0xff] }
 0x309   : > { %3162 = vperm.xlu0 %5044, %v3096_v50   ;;  %3157 = vperm.xlu1 %5043, %v3095_v58   ;;  %v3015_v60 = vpop.permute.xlu0 %3014 }
 0x30a   : > { %v4890_v5 = vpop.f32.mrf.mxu0  ;;  %v3013_v13 = vpop.permute.xlu1 %3012  ;;  %v3099_v43 = vmul.f32 %v7421_v55, %v3015_v60 }
 0x30b   : > { %v1791_v52 = vadd.f32 %v4890_v5, %v7408_v47  ;;  %v3098_v11 = vmul.f32 %v7416_v1, %v3013_v13 }
 0x30c   : > { %v1785_v54 = vpop.f32.mrf.mxu0 }
 0x30d   : > { %v1786_v39 = vadd.f32 %v7408_v47, %v1785_v54  ;;  %3172 = vperm.xlu0 %5044, %v3098_v11   ;;  %3167 = vperm.xlu1 %5043, %v3097_v7   ;;  %v3019_v58 = vpop.permute.xlu0 %3018  ;;  %v1945_v5 = vmax.f32 %v1791_v52, 0.0 }
 0x30e   : > { %v4893_v45 = vpop.f32.mrf.mxu0  ;;  %v3017_v59 = vpop.permute.xlu1 %3016  ;;  %v3101_v60 = vmul.f32 %v7431_v31, %v3019_v58 }
 0x30f   : > { %v1944_v50 = vmax.f32 %v1786_v39, 0.0  ;;  %v3100_v37 = vmul.f32 %v7425_v35, %v3017_v59  ;;  %v1801_v11 = vadd.f32 %v4893_v45, %v7408_v47 }
 0x310   : > { %v1795_v13 = vpop.f32.mrf.mxu0 }
 0x311   : > { %4968 = vmatprep.mubr.f32.mxu1 %v1944_v50  ;;  %v1796_v7 = vadd.f32 %v7408_v47, %v1795_v13  ;;  %3182 = vperm.xlu0 %5044, %v3100_v37   ;;  %v3023_v39 = vpop.permute.xlu0 %3022  ;;  %v1947_v50 = vmax.f32 %v1801_v11, 0.0 }
 0x312   : > { %4969 = vmatmul.mubr.f32.vlgmr.msra.gmra.mxu1 %v1945_v5  ;;  %3177 = vperm.xlu1 %5043, %v3099_v43   ;;  %v3021_v54 = vpop.permute.xlu1 %3020  ;;  %v7439_v5 = vld [vmem:[%s5278_s23 + $0x78] sm:$0xff] }
 0x313   : > { %v1946_v52 = vmax.f32 %v1796_v7, 0.0  ;;  %v3102_v59 = vmul.f32 %v7435_v3, %v3021_v54  ;;  %8689 = vst [vmem:[#allocation75_spill] sm:$0xff] %v7439_v5  ;;  %v3103_v13 = vmul.f32 %v7439_v5, %v3023_v39  ;;  %v7443_v7 = vld [vmem:[%s5278_s23 + $0x80] sm:$0xff] }
 0x314   : > { %8690 = vst [vmem:[#allocation22_spill] sm:$0xff] %v7443_v7  ;;  %v7461_v5 = vld [vmem:[%s5278_s23 + $0xa0] sm:$0xff] }
 0x315   : > { %4971 = vmatprep.mubr.f32.mxu1 %v1946_v52  ;;  %3192 = vperm.xlu0 %5044, %v3102_v59   ;;  %v3027_v45 = vpop.permute.xlu0 %3026  ;;  %v4896_v37 = vpop.f32.mrf.mxu0  ;;  %8694 = vst [vmem:[#allocation2_spill] sm:$0xff] %v7461_v5 }
 0x316   : > { %3187 = vperm.xlu1 %5043, %v3101_v60   ;;  %v3025_v43 = vpop.permute.xlu1 %3024  ;;  %4972 = vmatmul.mubr.f32.gmra.mxu1 %v1947_v50  ;;  %v1811_v11 = vadd.f32 %v4896_v37, %v7408_v47  ;;  %v7449_v50 = vld [vmem:[%s5278_s23 + $0x88] sm:$0xff] }
 0x317   : > { %v3104_v58 = vmul.f32 %v7443_v7, %v3025_v43  ;;  %v1805_v18 = vpop.f32.mrf.mxu0  ;;  %8691 = vst [vmem:[#allocation23_spill] sm:$0xff] %v7449_v50  ;;  %v3105_v39 = vmul.f32 %v7449_v50, %v3027_v45 }
 0x318   : > { %v1806_v54 = vadd.f32 %v7408_v47, %v1805_v18  ;;  %v1949_v7 = vmax.f32 %v1811_v11, 0.0 }
 0x319   : > { %3202 = vperm.xlu0 %5044, %v3104_v58   ;;  %v3031_v52 = vpop.permute.xlu0 %3030  ;;  %v7457_v58 = vld [vmem:[%s5278_s23 + $0x98] sm:$0xff] }
 0x31a   : > { %3197 = vperm.xlu1 %5043, %v3103_v13   ;;  %v3029_v60 = vpop.permute.xlu1 %3028  ;;  %v1948_v59 = vmax.f32 %v1806_v54, 0.0  ;;  %8693 = vst [vmem:[#allocation58_spill] sm:$0xff] %v7457_v58  ;;  %v3107_v54 = vmul.f32 %v7457_v58, %v3031_v52  ;;  %v7471_v58 = vld [vmem:[%s5278_s23 + $0xb0] sm:$0xff] }
 0x31b   : > { %v3106_v43 = vmul.f32 %v7453_v29, %v3029_v60  ;;  %8696 = vst [vmem:[#allocation3_spill] sm:$0xff] %v7471_v58  ;;  %v7479_v29 = vld [vmem:[%s5278_s23 + $0xc0] sm:$0xff] }
 0x31c   : > { %4974 = vmatprep.mubr.f32.mxu1 %v1948_v59  ;;  %8698 = vst [vmem:[#allocation25_spill] sm:$0xff] %v7479_v29 }
 0x31d   : > { %3212 = vperm.xlu0 %5044, %v3106_v43   ;;  %v3035_v18 = vpop.permute.xlu0 %3034  ;;  %v4899_v37 = vpop.f32.mrf.mxu0  ;;  %4975 = vmatmul.mubr.f32.gmra.mxu1 %v1949_v7  ;;  %v7467_v43 = vld [vmem:[%s5278_s23 + $0xa8] sm:$0xff] }
 0x31e   : > { %3207 = vperm.xlu1 %5043, %v3105_v39   ;;  %v3033_v13 = vpop.permute.xlu1 %3032  ;;  %v1821_v11 = vadd.f32 %v4899_v37, %v7408_v47  ;;  %8695 = vst [vmem:[#allocation59_spill] sm:$0xff] %v7467_v43  ;;  %v3109_v52 = vmul.f32 %v7467_v43, %v3035_v18 }
 0x31f   : > { %v3108_v45 = vmul.f32 %v7461_v5, %v3033_v13  ;;  %v1815_v50 = vpop.f32.mrf.mxu0 }
 0x320   : > { %v1816_v60 = vadd.f32 %v7408_v47, %v1815_v50  ;;  %v1951_v5 = vmax.f32 %v1821_v11, 0.0 }
 0x321   : > { %3222 = vperm.xlu0 %5044, %v3108_v45   ;;  %v3039_v59 = vpop.permute.xlu0 %3038  ;;  %v7475_v45 = vld [vmem:[%s5278_s23 + $0xb8] sm:$0xff] }
 0x322   : > { %3217 = vperm.xlu1 %5043, %v3107_v54   ;;  %v3037_v39 = vpop.permute.xlu1 %3036  ;;  %v1950_v7 = vmax.f32 %v1816_v60, 0.0  ;;  %8697 = vst [vmem:[#allocation24_spill] sm:$0xff] %v7475_v45  ;;  %v3111_v60 = vmul.f32 %v7475_v45, %v3039_v59  ;;  %v7489_v45 = vld [vmem:[%s5278_s23 + $0xd0] sm:$0xff] }
 0x323   : > { %v3110_v13 = vmul.f32 %v7471_v58, %v3037_v39  ;;  %8700 = vst [vmem:[#allocation63_spill] sm:$0xff] %v7489_v45  ;;  %v7497_v58 = vld [vmem:[%s5278_s23 + $0xe0] sm:$0xff] }
 0x324   : > { %4977 = vmatprep.mubr.f32.mxu1 %v1950_v7 }
 0x325   : > { %3232 = vperm.xlu0 %5044, %v3110_v13   ;;  %v3043_v50 = vpop.permute.xlu0 %3042  ;;  %v4902_v37 = vpop.f32.mrf.mxu0  ;;  %4978 = vmatmul.mubr.f32.gmra.mxu1 %v1951_v5  ;;  %v7485_v13 = vld [vmem:[%s5278_s23 + $0xc8] sm:$0xff] }
 0x326   : > { %3227 = vperm.xlu1 %5043, %v3109_v52   ;;  %v3041_v54 = vpop.permute.xlu1 %3040  ;;  %v1831_v11 = vadd.f32 %v4902_v37, %v7408_v47  ;;  %8699 = vst [vmem:[#allocation62_spill] sm:$0xff] %v7485_v13  ;;  %v3113_v59 = vmul.f32 %v7485_v13, %v3043_v50 }
 0x327   : > { %v3112_v18 = vmul.f32 %v7479_v29, %v3041_v54  ;;  %v1825_v43 = vpop.f32.mrf.mxu0 }
 0x328   : > { %v1826_v39 = vadd.f32 %v7408_v47, %v1825_v43  ;;  %v1953_v29 = vmax.f32 %v1831_v11, 0.0 }
 0x329   : > { %3242 = vperm.xlu0 %5044, %v3112_v18   ;;  %v3047_v7 = vpop.permute.xlu0 %3046  ;;  %v7493_v18 = vld [vmem:[%s5278_s23 + $0xd8] sm:$0xff] }
 0x32a   : > { %3237 = vperm.xlu1 %5043, %v3111_v60   ;;  %v3045_v52 = vpop.permute.xlu1 %3044  ;;  %v1952_v5 = vmax.f32 %v1826_v39, 0.0  ;;  %8701 = vst [vmem:[#allocation26_spill] sm:$0xff] %v7493_v18  ;;  %v3115_v39 = vmul.f32 %v7493_v18, %v3047_v7 }
 0x32b   : > { %v3114_v54 = vmul.f32 %v7489_v45, %v3045_v52  ;;  %v7507_v45 = vld [vmem:[%s5278_s23 + $0xf0] sm:$0xff] }
 0x32c   : > { %4980 = vmatprep.mubr.f32.mxu1 %v1952_v5 }
 0x32d   : > { %3252 = vperm.xlu0 %5044, %v3114_v54   ;;  %v4905_v43 = vpop.f32.mrf.mxu0  ;;  %v3051_v60 = vpop.permute.xlu0 %3050  ;;  %4981 = vmatmul.mubr.f32.gmra.mxu1 %v1953_v29  ;;  %v7503_v54 = vld [vmem:[%s5278_s23 + $0xe8] sm:$0xff] }
 0x32e   : > { %3247 = vperm.xlu1 %5043, %v3113_v59   ;;  %v3049_v37 = vpop.permute.xlu1 %3048  ;;  %v1841_v11 = vadd.f32 %v4905_v43, %v7408_v47  ;;  %v3117_v29 = vmul.f32 %v7503_v54, %v3051_v60 }
 0x32f   : > { %v3116_v50 = vmul.f32 %v7497_v58, %v3049_v37  ;;  %v1835_v13 = vpop.f32.mrf.mxu0 }
 0x330   : > { %v1836_v52 = vadd.f32 %v7408_v47, %v1835_v13  ;;  %v1955_v37 = vmax.f32 %v1841_v11, 0.0  ;;  %v7511_v13 = vld [vmem:[%s5278_s23 + $0xf8] sm:$0xff] }
 0x331   : > { %3262 = vperm.xlu0 %5044, %v3116_v50   ;;  %v3055_v18 = vpop.permute.xlu0 %3054 }
 0x332   : > { %3257 = vperm.xlu1 %5043, %v3115_v39   ;;  %v3053_v5 = vpop.permute.xlu1 %3052  ;;  %v1954_v59 = vmax.f32 %v1836_v52, 0.0  ;;  %v3119_v39 = vmul.f32 %v7511_v13, %v3055_v18 }
 0x333   : > { %v3118_v7 = vmul.f32 %v7507_v45, %v3053_v5 }
 0x334   : > { %4983 = vmatprep.mubr.f32.mxu1 %v1954_v59  ;;  %v4908_v43 = vpop.f32.mrf.mxu0  ;;  %v5195_v59 = vmov 106  }
 0x335   : > { %3272 = vperm.xlu0 %5044, %v3118_v7   ;;  %4984 = vmatmul.mubr.f32.gmra.mxu1 %v1955_v37  ;;  %v1851_v52 = vadd.f32 %v4908_v43, %v7408_v47 }
 0x336   : > { %3267 = vperm.xlu1 %5043, %v3117_v29   ;;  %v1845_v50 = vpop.f32.mrf.mxu0 }
 0x337   : > { %v1846_v60 = vadd.f32 %v7408_v47, %v1845_v50  ;;  %v1957_v29 = vmax.f32 %v1851_v52, 0.0 }
 0x339   : > { %3472 = vrot.lane.b32.xlu0 %v6787_v61, %s5194_s24  ;;  %v1956_v11 = vmax.f32 %v1846_v60, 0.0 }
 0x33a   : > { %3277 = vperm.xlu1 %5043, %v3119_v39   ;;  %v4911_v5 = vpop.f32.mrf.mxu0  ;;  %5045 = vset.pattern.permute.xlu0 %v5195_v59 }
 0x33b   : > { %4986 = vmatprep.mubr.f32.mxu1 %v1956_v11  ;;  %v1861_v18 = vadd.f32 %v4911_v5, %v7408_v47 }
 0x33c   : > { %v1855_v7 = vpop.f32.mrf.mxu0  ;;  %4987 = vmatmul.mubr.f32.gmra.mxu1 %v1957_v29 }
 0x33d   : > { %3476 = vrot.lane.b32.xlu0 %v8640_v24, %s5194_s24  ;;  %v1856_v37 = vadd.f32 %v7408_v47, %v1855_v7  ;;  %v1959_v39 = vmax.f32 %v1861_v18, 0.0 }
 0x33e   : > { %3474 = vrot.lane.b32.xlu1 %v6773_v41, %s5194_s24 }
 0x33f   : > { %5046 = vset.pattern.permute.xlu1 %v5195_v59  ;;  %v1958_v43 = vmax.f32 %v1856_v37, 0.0 }
 0x341   : > { %3480 = vrot.lane.b32.xlu0 %v8641_v48, %s5194_s24  ;;  %4989 = vmatprep.mubr.f32.mxu1 %v1958_v43 }
 0x342   : > { %3478 = vrot.lane.b32.xlu1 %v8639_v32, %s5194_s24  ;;  %v4914_v50 = vpop.f32.mrf.mxu0  ;;  %4990 = vmatmul.mubr.f32.gmra.mxu1 %v1959_v39 }
 0x343   : > { %v1871_v60 = vadd.f32 %v4914_v50, %v7408_v47 }
 0x344   : > { %v1865_v52 = vpop.f32.mrf.mxu0 }
 0x345   : > { %3484 = vrot.lane.b32.xlu0 %v8643_v12, %s5194_s24  ;;  %v1866_v11 = vadd.f32 %v7408_v47, %v1865_v52  ;;  %v1961_v59 = vmax.f32 %v1871_v60, 0.0 }
 0x346   : > { %3482 = vrot.lane.b32.xlu1 %v6824_v14, %s5194_s24 }
 0x347   : > { %v1960_v5 = vmax.f32 %v1866_v11, 0.0 }
 0x349   : > { %3488 = vrot.lane.b32.xlu0 %v6883_v46, %s5194_s24  ;;  %4992 = vmatprep.mubr.f32.mxu1 %v1960_v5 }
 0x34a   : > { %3486 = vrot.lane.b32.xlu1 %v8642_v62, %s5194_s24  ;;  %v4917_v29 = vpop.f32.mrf.mxu0  ;;  %4993 = vmatmul.mubr.f32.gmra.mxu1 %v1961_v59 }
 0x34b   : > { %v1881_v18 = vadd.f32 %v4917_v29, %v7408_v47 }
 0x34c   : > { %v1875_v7 = vpop.f32.mrf.mxu0 }
 0x34d   : > { %3492 = vrot.lane.b32.xlu0 %v6908_v20, %s5194_s24  ;;  %v1876_v37 = vadd.f32 %v7408_v47, %v1875_v7  ;;  %v1963_v39 = vmax.f32 %v1881_v18, 0.0 }
 0x34e   : > { %3490 = vrot.lane.b32.xlu1 %v6872_v19, %s5194_s24 }
 0x34f   : > { %v1962_v43 = vmax.f32 %v1876_v37, 0.0 }
 0x351   : > { %3496 = vrot.lane.b32.xlu0 %v6921_v63, %s5194_s24  ;;  %4995 = vmatprep.mubr.f32.mxu1 %v1962_v43 }
 0x352   : > { %3494 = vrot.lane.b32.xlu1 %v6898_v38, %s5194_s24  ;;  %v4920_v50 = vpop.f32.mrf.mxu0  ;;  %4996 = vmatmul.mubr.f32.gmra.mxu1 %v1963_v39 }
 0x353   : > { %v1891_v60 = vadd.f32 %v4920_v50, %v7408_v47 }
 0x354   : > { %v1885_v52 = vpop.f32.mrf.mxu0 }
 0x355   : > { %3500 = vrot.lane.b32.xlu0 %v6932_v9, %s5194_s24  ;;  %v1886_v11 = vadd.f32 %v7408_v47, %v1885_v52  ;;  %v1965_v59 = vmax.f32 %v1891_v60, 0.0 }
 0x356   : > { %3498 = vrot.lane.b32.xlu1 %v6916_v28, %s5194_s24 }
 0x357   : > { %v1964_v5 = vmax.f32 %v1886_v11, 0.0 }
 0x359   : > { %3504 = vrot.lane.b32.xlu0 %v6941_v15, %s5194_s24  ;;  %4998 = vmatprep.mubr.f32.mxu1 %v1964_v5 }
 0x35a   : > { %3502 = vrot.lane.b32.xlu1 %v6928_v21, %s5194_s24  ;;  %v4923_v29 = vpop.f32.mrf.mxu0  ;;  %4999 = vmatmul.mubr.f32.gmra.mxu1 %v1965_v59 }
 0x35b   : > { %v1901_v18 = vadd.f32 %v4923_v29, %v7408_v47 }
 0x35c   : > { %v1895_v7 = vpop.f32.mrf.mxu0 }
 0x35d   : > { %v1896_v37 = vadd.f32 %v7408_v47, %v1895_v7  ;;  %3508 = vrot.lane.b32.xlu0 %v8645_v6, %s5194_s24  ;;  %v1967_v50 = vmax.f32 %v1901_v18, 0.0 }
 0x35e   : > { %3506 = vrot.lane.b32.xlu1 %v6936_v17, %s5194_s24 }
 0x35f   : > { %v1966_v43 = vmax.f32 %v1896_v37, 0.0  ;;  %v4926_v39 = vpop.f32.mrf.mxu0 }
 0x360   : > { %v1911_v52 = vadd.f32 %v4926_v39, %v7408_v47 }
 0x361   : > { %v1905_v60 = vpop.f32.mrf.mxu0  ;;  %3512 = vrot.lane.b32.xlu0 %v8649_v22, %s5194_s24  ;;  %5001 = vmatprep.mubr.f32.mxu1 %v1966_v43 }
 0x362   : > { %3510 = vrot.lane.b32.xlu1 %v8644_v27, %s5194_s24  ;;  %v1906_v11 = vadd.f32 %v7408_v47, %v1905_v60  ;;  %5002 = vmatmul.mubr.f32.gmra.mxu1 %v1967_v50  ;;  %v1969_v29 = vmax.f32 %v1911_v52, 0.0 }
 0x363   : > { %v4929_v5 = vpop.f32.mrf.mxu0 }
 0x364   : > { %v1968_v59 = vmax.f32 %v1906_v11, 0.0  ;;  %v1921_v7 = vadd.f32 %v4929_v5, %v7408_v47 }
 0x365   : > { %v1915_v37 = vpop.f32.mrf.mxu0  ;;  %3516 = vrot.lane.b32.xlu0 %v8651_v44, %s5194_s24 }
 0x366   : > { %3514 = vrot.lane.b32.xlu1 %v8648_v51, %s5194_s24  ;;  %v1916_v18 = vadd.f32 %v7408_v47, %v1915_v37  ;;  %5004 = vmatprep.mubr.f32.mxu1 %v1968_v59  ;;  %v1971_v43 = vmax.f32 %v1921_v7, 0.0 }
 0x367   : > { %v4932_v39 = vpop.f32.mrf.mxu0  ;;  %5005 = vmatmul.mubr.f32.gmra.mxu1 %v1969_v29 }
 0x368   : > { %v1970_v60 = vmax.f32 %v1916_v18, 0.0  ;;  %v1931_v50 = vadd.f32 %v4932_v39, %v7408_v47 }
 0x369   : > { %v1925_v11 = vpop.f32.mrf.mxu0  ;;  %3520 = vrot.lane.b32.xlu0 %v8654_v4, %s5194_s24  ;;  %v8744_v4 = vld [vmem:[#allocation62_spill] sm:$0xff] }
 0x36a   : > { %3518 = vrot.lane.b32.xlu1 %v7083_v0, %s5194_s24  ;;  %v1926_v52 = vadd.f32 %v7408_v47, %v1925_v11  ;;  %5007 = vmatprep.mubr.f32.mxu1 %v1970_v60  ;;  %v1973_v59 = vmax.f32 %v1931_v50, 0.0 }
 0x36b   : > { %v4935_v5 = vpop.f32.mrf.mxu0  ;;  %5008 = vmatmul.mubr.f32.gmra.mxu1 %v1971_v43 }
 0x36c   : > { %v1972_v37 = vmax.f32 %v1926_v52, 0.0  ;;  %v1941_v29 = vadd.f32 %v4935_v5, %v7408_v47 }
 0x36d   : > { %v1935_v18 = vpop.f32.mrf.mxu0  ;;  %3524 = vrot.lane.b32.xlu0 %v8658_v40, %s5194_s24  ;;  %v8742_v40 = vld [vmem:[#allocation24_spill] sm:$0xff] }
 0x36e   : > { %3522 = vrot.lane.b32.xlu1 %v8653_v53, %s5194_s24  ;;  %v1936_v7 = vadd.f32 %v7408_v47, %v1935_v18  ;;  %5010 = vmatprep.mubr.f32.mxu1 %v1972_v37  ;;  %v1975_v11 = vmax.f32 %v1941_v29, 0.0 }
 0x36f   : > { %5011 = vmatmul.mubr.f32.gmra.mxu1 %v1973_v59 }
 0x370   : > { %v1974_v39 = vmax.f32 %v1936_v7, 0.0 }
 0x371   : > { %3528 = vrot.lane.b32.xlu0 %v8661_v57, %s5194_s24  ;;  %v8740_v57 = vld [vmem:[#allocation59_spill] sm:$0xff] }
 0x372   : > { %3526 = vrot.lane.b32.xlu1 %v8657_v30, %s5194_s24  ;;  %5013 = vmatprep.mubr.f32.mxu1 %v1974_v39 }
 0x373   : > { %5014 = vmatmul.mubr.f32.gmra.mxu1 %v1975_v11  ;;  %v7598_v47 = vpop.permute.xlu0 %3127 }
 0x374   : > { %v7592_v60 = vpop.permute.xlu1 %3122  ;;  %8703 = vst [vmem:[#allocation64_spill] sm:$0xff] %v7598_v47 }
 0x375   : > { %8702 = vst [vmem:[#allocation27_spill] sm:$0xff] %v7592_v60  ;;  %3532 = vrot.lane.b32.xlu0 %v8664_v42, %s5194_s24  ;;  %v8738_v42 = vld [vmem:[#allocation58_spill] sm:$0xff] }
 0x376   : > { %3530 = vrot.lane.b32.xlu1 %v8659_v16, %s5194_s24  ;;  %v8736_v16 = vld [vmem:[#allocation23_spill] sm:$0xff] }
 0x378   : > { %v7600_v43 = vpop.permute.xlu1 %3132 }
 0x379   : > { %8704 = vst [vmem:[#allocation65_spill] sm:$0xff] %v7600_v43 }
 0x37a   : > { %3534 = vrot.lane.b32.xlu1 %v8663_v33, %s5194_s24 }
 0x37c   : > { %v7604_v50 = vpop.permute.xlu1 %3137  ;;  %v7606_v52 = vpop.permute.xlu0 %3142 }
 0x37d   : > { %8705 = vst [vmem:[#allocation29_spill] sm:$0xff] %v7604_v50  ;;  %8706 = vst [vmem:[#allocation30_spill] sm:$0xff] %v7606_v52 }
 0x380   : > { %v7608_v5 = vpop.permute.xlu1 %3147  ;;  %v7610_v37 = vpop.permute.xlu0 %3152 }
 0x381   : > { %8707 = vst [vmem:[#allocation68_spill] sm:$0xff] %v7608_v5  ;;  %8708 = vst [vmem:[#allocation69_spill] sm:$0xff] %v7610_v37 }
 0x384   : > { %v7612_v59 = vpop.permute.xlu1 %3157  ;;  %v7614_v29 = vpop.permute.xlu0 %3162 }
 0x385   : > { %8709 = vst [vmem:[#allocation31_spill] sm:$0xff] %v7612_v59  ;;  %8710 = vst [vmem:[#allocation33_spill] sm:$0xff] %v7614_v29 }
 0x388   : > { %v7616_v18 = vpop.permute.xlu1 %3167  ;;  %v7618_v7 = vpop.permute.xlu0 %3172 }
 0x389   : > { %8711 = vst [vmem:[#allocation70_spill] sm:$0xff] %v7616_v18  ;;  %8712 = vst [vmem:[#allocation71_spill] sm:$0xff] %v7618_v7 }
 0x38c   : > { %v7622_v11 = vpop.permute.xlu0 %3182 }
 0x38d   : > { %v7620_v39 = vpop.permute.xlu1 %3177  ;;  %8714 = vst [vmem:[#allocation78_spill] sm:$0xff] %v7622_v11 }
 0x38e   : > { %8713 = vst [vmem:[#allocation76_spill] sm:$0xff] %v7620_v39 }
 0x390   : > { %v7626_v50 = vpop.permute.xlu0 %3192 }
 0x391   : > { %v7624_v43 = vpop.permute.xlu1 %3187  ;;  %8716 = vst [vmem:[#allocation5_spill] sm:$0xff] %v7626_v50 }
 0x392   : > { %8715 = vst [vmem:[#allocation4_spill] sm:$0xff] %v7624_v43 }
 0x394   : > { %v7630_v5 = vpop.permute.xlu0 %3202 }
 0x395   : > { %v7628_v52 = vpop.permute.xlu1 %3197  ;;  %8718 = vst [vmem:[#allocation7_spill] sm:$0xff] %v7630_v5 }
 0x396   : > { %8717 = vst [vmem:[#allocation6_spill] sm:$0xff] %v7628_v52 }
 0x398   : > { %v7634_v59 = vpop.permute.xlu0 %3212 }
 0x399   : > { %v7632_v37 = vpop.permute.xlu1 %3207  ;;  %8720 = vst [vmem:[#allocation8_spill] sm:$0xff] %v7634_v59 }
 0x39a   : > { %8719 = vst [vmem:[#allocation28_spill] sm:$0xff] %v7632_v37 }
 0x39c   : > { %v7638_v18 = vpop.permute.xlu0 %3222 }
 0x39d   : > { %v7636_v29 = vpop.permute.xlu1 %3217  ;;  %8722 = vst [vmem:[#allocation10_spill] sm:$0xff] %v7638_v18 }
 0x39e   : > { %8721 = vst [vmem:[#allocation32_spill] sm:$0xff] %v7636_v29 }
 0x3a0   : > { %v7642_v39 = vpop.permute.xlu0 %3232 }
 0x3a1   : > { %v7640_v7 = vpop.permute.xlu1 %3227  ;;  %8724 = vst [vmem:[#allocation80_spill] sm:$0xff] %v7642_v39 }
 0x3a2   : > { %8723 = vst [vmem:[#allocation79_spill] sm:$0xff] %v7640_v7 }
 0x3a4   : > { %v7646_v43 = vpop.permute.xlu0 %3242 }
 0x3a5   : > { %v7644_v11 = vpop.permute.xlu1 %3237  ;;  %8726 = vst [vmem:[#allocation82_spill] sm:$0xff] %v7646_v43 }
 0x3a6   : > { %8725 = vst [vmem:[#allocation81_spill] sm:$0xff] %v7644_v11 }
 0x3a8   : > { %v7650_v52 = vpop.permute.xlu0 %3252 }
 0x3a9   : > { %v7648_v50 = vpop.permute.xlu1 %3247  ;;  %8728 = vst [vmem:[#allocation84_spill] sm:$0xff] %v7650_v52 }
 0x3aa   : > { %8727 = vst [vmem:[#allocation83_spill] sm:$0xff] %v7648_v50 }
 0x3ac   : > { %v7654_v37 = vpop.permute.xlu0 %3262 }
 0x3ad   : > { %v7652_v5 = vpop.permute.xlu1 %3257  ;;  %8730 = vst [vmem:[#allocation86_spill] sm:$0xff] %v7654_v37 }
 0x3ae   : > { %8729 = vst [vmem:[#allocation85_spill] sm:$0xff] %v7652_v5 }
 0x3b0   : > { %v7658_v29 = vpop.permute.xlu0 %3272 }
 0x3b1   : > { %v7656_v59 = vpop.permute.xlu1 %3267  ;;  %8732 = vst [vmem:[#allocation88_spill] sm:$0xff] %v7658_v29 }
 0x3b2   : > { %8731 = vst [vmem:[#allocation87_spill] sm:$0xff] %v7656_v59 }
 0x3b4   : > { %v3473_v7 = vpop.permute.xlu0 %3472 }
 0x3b5   : > { %v7660_v18 = vpop.permute.xlu1 %3277  ;;  %v3568_v39 = vmul.f32 %v7374_v25, %v3473_v7 }
 0x3b6   : > { %8733 = vst [vmem:[#allocation89_spill] sm:$0xff] %v7660_v18 }
 0x3b7   : > { %3602 = vperm.xlu0 %5045, %v3568_v39  }
 0x3b8   : > { %v3477_v43 = vpop.permute.xlu0 %3476 }
 0x3b9   : > { %v3475_v11 = vpop.permute.xlu1 %3474  ;;  %v3570_v5 = vmul.f32 %v7378_v34, %v3477_v43 }
 0x3ba   : > { %v3569_v50 = vmul.f32 %v7370_v49, %v3475_v11 }
 0x3bc   : > { %3607 = vperm.xlu1 %5046, %v3569_v50   ;;  %v3481_v47 = vpop.permute.xlu0 %3480 }
 0x3bd   : > { %v3479_v52 = vpop.permute.xlu1 %3478  ;;  %v3572_v18 = vmul.f32 %v7386_v23, %v3481_v47 }
 0x3be   : > { %v3571_v37 = vmul.f32 %v7382_v8, %v3479_v52 }
 0x3c0   : > { %3617 = vperm.xlu0 %5045, %v3571_v37   ;;  %3612 = vperm.xlu1 %5046, %v3570_v5   ;;  %v3485_v59 = vpop.permute.xlu0 %3484 }
 0x3c1   : > { %v3483_v29 = vpop.permute.xlu1 %3482  ;;  %v3574_v50 = vmul.f32 %v7394_v10, %v3485_v59 }
 0x3c2   : > { %v3573_v7 = vmul.f32 %v7390_v2, %v3483_v29 }
 0x3c4   : > { %3627 = vperm.xlu0 %5045, %v3573_v7   ;;  %3622 = vperm.xlu1 %5046, %v3572_v18   ;;  %v3489_v60 = vpop.permute.xlu0 %3488 }
 0x3c5   : > { %v3487_v39 = vpop.permute.xlu1 %3486  ;;  %v3576_v5 = vmul.f32 %v7402_v36, %v3489_v60 }
 0x3c6   : > { %v3575_v11 = vmul.f32 %v7398_v56, %v3487_v39 }
 0x3c8   : > { %3637 = vperm.xlu0 %5045, %v3575_v11   ;;  %3632 = vperm.xlu1 %5046, %v3574_v50   ;;  %v3493_v52 = vpop.permute.xlu0 %3492 }
 0x3c9   : > { %v3491_v43 = vpop.permute.xlu1 %3490  ;;  %v3578_v18 = vmul.f32 %v7416_v1, %v3493_v52 }
 0x3ca   : > { %v3577_v37 = vmul.f32 %v7412_v26, %v3491_v43 }
 0x3cc   : > { %3647 = vperm.xlu0 %5045, %v3577_v37   ;;  %3642 = vperm.xlu1 %5046, %v3576_v5   ;;  %v3497_v29 = vpop.permute.xlu0 %3496  ;;  %v8734_v37 = vld [vmem:[#allocation75_spill] sm:$0xff] }
 0x3cd   : > { %v3495_v47 = vpop.permute.xlu1 %3494  ;;  %v3580_v50 = vmul.f32 %v7425_v35, %v3497_v29 }
 0x3ce   : > { %v3579_v7 = vmul.f32 %v7421_v55, %v3495_v47 }
 0x3d0   : > { %3657 = vperm.xlu0 %5045, %v3579_v7   ;;  %3652 = vperm.xlu1 %5046, %v3578_v18   ;;  %v3501_v39 = vpop.permute.xlu0 %3500  ;;  %v8735_v7 = vld [vmem:[#allocation22_spill] sm:$0xff] }
 0x3d1   : > { %v3499_v59 = vpop.permute.xlu1 %3498  ;;  %v3582_v5 = vmul.f32 %v7435_v3, %v3501_v39 }
 0x3d2   : > { %v3581_v11 = vmul.f32 %v7431_v31, %v3499_v59 }
 0x3d4   : > { %3667 = vperm.xlu0 %5045, %v3581_v11   ;;  %3662 = vperm.xlu1 %5046, %v3580_v50   ;;  %v3505_v43 = vpop.permute.xlu0 %3504  ;;  %v8737_v11 = vld [vmem:[#allocation77_spill] sm:$0xff] }
 0x3d5   : > { %v3503_v60 = vpop.permute.xlu1 %3502  ;;  %v3584_v18 = vmul.f32 %v8735_v7, %v3505_v43 }
 0x3d6   : > { %v3583_v33 = vmul.f32 %v8734_v37, %v3503_v60 }
 0x3d8   : > { %3677 = vperm.xlu0 %5045, %v3583_v33   ;;  %3672 = vperm.xlu1 %5046, %v3582_v5   ;;  %v3509_v47 = vpop.permute.xlu0 %3508  ;;  %v8739_v33 = vld [vmem:[#allocation2_spill] sm:$0xff] }
 0x3d9   : > { %v3507_v52 = vpop.permute.xlu1 %3506  ;;  %v3586_v50 = vmul.f32 %v8737_v11, %v3509_v47 }
 0x3da   : > { %v3585_v30 = vmul.f32 %v8736_v16, %v3507_v52 }
 0x3dc   : > { %3687 = vperm.xlu0 %5045, %v3585_v30   ;;  %3682 = vperm.xlu1 %5046, %v3584_v18   ;;  %v3513_v59 = vpop.permute.xlu0 %3512  ;;  %v8741_v30 = vld [vmem:[#allocation3_spill] sm:$0xff] }
 0x3dd   : > { %v3511_v29 = vpop.permute.xlu1 %3510  ;;  %v3588_v5 = vmul.f32 %v8739_v33, %v3513_v59 }
 0x3de   : > { %v3587_v53 = vmul.f32 %v8738_v42, %v3511_v29 }
 0x3e0   : > { %3697 = vperm.xlu0 %5045, %v3587_v53   ;;  %3692 = vperm.xlu1 %5046, %v3586_v50   ;;  %v3517_v60 = vpop.permute.xlu0 %3516  ;;  %v8743_v53 = vld [vmem:[#allocation25_spill] sm:$0xff] }
 0x3e1   : > { %v3515_v39 = vpop.permute.xlu1 %3514  ;;  %v3590_v18 = vmul.f32 %v8741_v30, %v3517_v60 }
 0x3e2   : > { %v3589_v0 = vmul.f32 %v8740_v57, %v3515_v39  ;;  %v8746_v57 = vld [vmem:[#allocation26_spill] sm:$0xff] }
 0x3e4   : > { %3707 = vperm.xlu0 %5045, %v3589_v0   ;;  %3702 = vperm.xlu1 %5046, %v3588_v5   ;;  %v3521_v52 = vpop.permute.xlu0 %3520  ;;  %v8745_v0 = vld [vmem:[#allocation63_spill] sm:$0xff] }
 0x3e5   : > { %v3519_v43 = vpop.permute.xlu1 %3518  ;;  %v3592_v50 = vmul.f32 %v8743_v53, %v3521_v52 }
 0x3e6   : > { %v3591_v51 = vmul.f32 %v8742_v40, %v3519_v43 }
 0x3e8   : > { %3717 = vperm.xlu0 %5045, %v3591_v51   ;;  %3712 = vperm.xlu1 %5046, %v3590_v18   ;;  %v3525_v29 = vpop.permute.xlu0 %3524 }
 0x3e9   : > { %v3523_v47 = vpop.permute.xlu1 %3522  ;;  %v3594_v5 = vmul.f32 %v8745_v0, %v3525_v29  ;;  %v3953_v29 = vmul.f32 %v7370_v49, %v6773_v41  ;;  %v3955_v41 = vmul.f32 %v7382_v8, %v8639_v32  ;;  %v3957_v49 = vmul.f32 %v7390_v2, %v6824_v14 }
 0x3ea   : > { %v3593_v42 = vmul.f32 %v8744_v4, %v3523_v47  ;;  %v3964_v32 = vmul.f32 %v7425_v35, %v6921_v63  ;;  %v3966_v14 = vmul.f32 %v7435_v3, %v6932_v9  ;;  %v3967_v63 = vmul.f32 %v8734_v37, %v6928_v21  ;;  %v8748_v3 = vld [vmem:[#allocation58_spill] sm:$0xff] }
 0x3eb   : > { %v3969_v9 = vmul.f32 %v8736_v16, %v6936_v17  ;;  %v8753_v16 = vld [vmem:[#allocation40_spill] sm:$0xff] }
 0x3ec   : > { %3727 = vperm.xlu0 %5045, %v3593_v42   ;;  %3722 = vperm.xlu1 %5046, %v3592_v50   ;;  %v3529_v39 = vpop.permute.xlu0 %3528  ;;  %v5196_v50 = vmov 105  }
 0x3ed   : > { %v3527_v59 = vpop.permute.xlu1 %3526  ;;  %v3596_v51 = vmul.f32 %v7497_v58, %v3529_v39  ;;  %v3954_v39 = vmul.f32 %v7378_v34, %v8640_v24  ;;  %v3962_v24 = vmul.f32 %v7416_v1, %v6908_v20  ;;  %v3968_v20 = vmul.f32 %v8735_v7, %v6941_v15  ;;  %v8747_v15 = vld [vmem:[#allocation38_spill] sm:$0xff] }
 0x3ee   : > { %v3595_v27 = vmul.f32 %v8746_v57, %v3527_v59  ;;  %v3956_v59 = vmul.f32 %v7386_v23, %v8641_v48  ;;  %v3959_v48 = vmul.f32 %v7398_v56, %v8642_v62  ;;  %v3965_v62 = vmul.f32 %v7431_v31, %v6916_v28  ;;  %v8751_v56 = vld [vmem:[#allocation59_spill] sm:$0xff] }
 0x3ef   : > { %v3974_v28 = vmul.f32 %v8741_v30, %v8651_v44  ;;  %v3971_v31 = vmul.f32 %v8748_v3, %v8747_v15  ;;  %v3975_v23 = vmul.f32 %v8742_v40, %v8753_v16  ;;  %v8754_v44 = vld [vmem:[#allocation43_spill] sm:$0xff]  ;;  %v8757_v40 = vld [vmem:[#allocation42_spill] sm:$0xff] }
 0x3f0   : > { %3737 = vperm.xlu0 %5045, %v3595_v27   ;;  %3732 = vperm.xlu1 %5046, %v3594_v5   ;;  %v3533_v18 = vpop.permute.xlu0 %3532  ;;  %v3952_v27 = vmul.f32 %v7374_v25, %v6787_v61  ;;  %v3958_v5 = vmul.f32 %v7394_v10, %v8643_v12  ;;  %v3960_v61 = vmul.f32 %v7402_v36, %v6883_v46  ;;  %v8755_v25 = vld [vmem:[#allocation11_spill] sm:$0xff]  ;;  %v4970_v10 = vpop.f32.mrf.mxu1  ;;  %v7753_v36 = vld [vmem:[%s8358_s8] ss:$0 sm:$0xff] }
 0x3f1   : > { %v3531_v60 = vpop.permute.xlu1 %3530  ;;  %v3598_v42 = vmul.f32 %v7507_v45, %v3533_v18  ;;  %v3961_v12 = vmul.f32 %v7412_v26, %v6872_v19  ;;  %v3963_v46 = vmul.f32 %v7421_v55, %v6898_v38  ;;  %v3970_v19 = vmul.f32 %v8737_v11, %v8645_v6  ;;  %v8749_v6 = vld [vmem:[#allocation34_spill] sm:$0xff]  ;;  %v8750_v55 = vld [vmem:[#allocation9_spill] sm:$0xff]  ;;  %v8758_v11 = vld [vmem:[#allocation12_spill] sm:$0xff] }
 0x3f2   : > { %v3597_v43 = vmul.f32 %v7503_v54, %v3531_v60  ;;  %v3972_v38 = vmul.f32 %v8739_v33, %v8649_v22  ;;  %v3976_v21 = vmul.f32 %v8743_v53, %v8749_v6  ;;  %v3973_v2 = vmul.f32 %v8751_v56, %v8750_v55  ;;  %v8752_v22 = vld [vmem:[#allocation35_spill] sm:$0xff]  ;;  %v8756_v26 = vld [vmem:[#allocation45_spill] sm:$0xff]  ;;  %v2065_v37 = vpop.f32.mrf.mxu1 }
 0x3f3   : > { %v3978_v17 = vmul.f32 %v8745_v0, %v8752_v22  ;;  %v3980_v8 = vmul.f32 %v7497_v58, %v8754_v44  ;;  %v3977_v34 = vmul.f32 %v8744_v4, %v8755_v25  ;;  %v3982_v1 = vmul.f32 %v7507_v45, %v8756_v26  ;;  %v8759_v0 = vld [vmem:[#allocation13_spill] sm:$0xff] }
 0x3f4   : > { %3747 = vperm.xlu0 %5045, %v3597_v43   ;;  %3742 = vperm.xlu1 %5046, %v3596_v51   ;;  %v3979_v35 = vmul.f32 %v8746_v57, %v8757_v40  ;;  %v7760_v58 = vadd.f32 %v4970_v10, %v7753_v36  ;;  %v3981_v33 = vmul.f32 %v7503_v54, %v8758_v11  ;;  %v8760_v51 = vld [vmem:[#allocation27_spill] sm:$0xff] }
 0x3f5   : > { %v3535_v52 = vpop.permute.xlu1 %3534  ;;  %v7765_v30 = vadd.f32 %v7753_v36, %v2065_v37  ;;  %v3983_v60 = vmul.f32 %v7511_v13, %v8759_v0 }
 0x3f6   : > { %v3599_v47 = vmul.f32 %v7511_v13, %v3535_v52  ;;  %v8761_v52 = vld [vmem:[#allocation64_spill] sm:$0xff] }
 0x3f7   : > { %v3280_v43 = vmul.f32 %v8760_v51, %v7765_v30 }
 0x3f8   : > { %3757 = vperm.xlu0 %5045, %v3599_v47   ;;  %3752 = vperm.xlu1 %5046, %v3598_v42   ;;  %v3281_v42 = vmul.f32 %v8761_v52, %v7760_v58 }
 0x3fc   : > { %5048 = vset.pattern.permute.xlu0 %v5196_v50  ;;  %5047 = vset.pattern.permute.xlu1 %v5196_v50 }
 0x3fd   : > { %3991 = vperm.xlu0 %5048, %v3953_v29   ;;  %3986 = vperm.xlu1 %5047, %v3952_v27  }
 0x401   : > { %4006 = vperm.xlu0 %5048, %v3956_v59   ;;  %3996 = vperm.xlu1 %5047, %v3954_v39  }
 0x405   : > { %4016 = vperm.xlu0 %5048, %v3958_v5   ;;  %4001 = vperm.xlu1 %5047, %v3955_v41  }
 0x409   : > { %4026 = vperm.xlu0 %5048, %v3960_v61   ;;  %4011 = vperm.xlu1 %5047, %v3957_v49  }
 0x40d   : > { %4036 = vperm.xlu0 %5048, %v3962_v24   ;;  %4021 = vperm.xlu1 %5047, %v3959_v48  }
 0x411   : > { %4046 = vperm.xlu0 %5048, %v3964_v32   ;;  %4031 = vperm.xlu1 %5047, %v3961_v12  }
 0x415   : > { %4056 = vperm.xlu0 %5048, %v3966_v14   ;;  %4041 = vperm.xlu1 %5047, %v3963_v46  }
 0x419   : > { %4066 = vperm.xlu0 %5048, %v3968_v20   ;;  %4051 = vperm.xlu1 %5047, %v3965_v62  }
 0x41d   : > { %4076 = vperm.xlu0 %5048, %v3970_v19   ;;  %4061 = vperm.xlu1 %5047, %v3967_v63  }
 0x421   : > { %4086 = vperm.xlu0 %5048, %v3972_v38   ;;  %4071 = vperm.xlu1 %5047, %v3969_v9  }
 0x425   : > { %4096 = vperm.xlu0 %5048, %v3974_v28   ;;  %4081 = vperm.xlu1 %5047, %v3971_v31   ;;  %v4973_v31 = vpop.f32.mrf.mxu1 }
 0x426   : > { %v7836_v22 = vadd.f32 %v4973_v31, %v7753_v36 }
 0x429   : > { %4106 = vperm.xlu0 %5048, %v3976_v21   ;;  %4091 = vperm.xlu1 %5047, %v3973_v2   ;;  %v2075_v2 = vpop.f32.mrf.mxu1 }
 0x42a   : > { %v7841_v16 = vadd.f32 %v7753_v36, %v2075_v2 }
 0x42b   : > { %v4976_v26 = vpop.f32.mrf.mxu1 }
 0x42d   : > { %4116 = vperm.xlu0 %5048, %v3978_v17   ;;  %4101 = vperm.xlu1 %5047, %v3975_v23   ;;  %v2085_v37 = vpop.f32.mrf.mxu1 }
 0x431   : > { %4126 = vperm.xlu0 %5048, %v3980_v8   ;;  %4111 = vperm.xlu1 %5047, %v3977_v34   ;;  %v8762_v8 = vld [vmem:[#allocation65_spill] sm:$0xff] }
 0x432   : > { %v3603_v4 = vpop.permute.xlu0 %3602  ;;  %v3282_v25 = vmul.f32 %v8762_v8, %v7841_v16  ;;  %v8763_v34 = vld [vmem:[#allocation29_spill] sm:$0xff] }
 0x433   : > { %v3760_v23 = vmul.f32 %v3603_v4, %v7765_v30  ;;  %v3283_v10 = vmul.f32 %v8763_v34, %v7836_v22  ;;  %v7856_v4 = vadd.f32 %v4976_v26, %v7753_v36 }
 0x435   : > { %4136 = vperm.xlu0 %5048, %v3982_v1   ;;  %4121 = vperm.xlu1 %5047, %v3979_v35  }
 0x437   : > { %v3608_v7 = vpop.permute.xlu1 %3607 }
 0x438   : > { %v3761_v53 = vmul.f32 %v3608_v7, %v7760_v58  ;;  %v7861_v7 = vadd.f32 %v7753_v36, %v2085_v37 }
 0x439   : > { %4131 = vperm.xlu1 %5047, %v3981_v33  }
 0x43a   : > { %3826 = vrot.lane.b32.xlu0 %v3761_v53, %s5197_s26  ;;  %v4979_v53 = vpop.f32.mrf.mxu1 }
 0x43b   : > { %v7769_v57 = vpop.permute.xlu1 %3612  ;;  %v3618_v45 = vpop.permute.xlu0 %3617  ;;  %v7877_v31 = vadd.f32 %v4979_v53, %v7753_v36  ;;  %v8768_v53 = vld [vmem:[#allocation70_spill] sm:$0xff] }
 0x43c   : > { %v3763_v44 = vmul.f32 %v3618_v45, %v7836_v22  ;;  %v3762_v11 = vmul.f32 %v7769_v57, %v7841_v16  ;;  %v8764_v45 = vld [vmem:[#allocation30_spill] sm:$0xff] }
 0x43d   : > { %4141 = vperm.xlu1 %5047, %v3983_v60   ;;  %v3284_v0 = vmul.f32 %v8764_v45, %v7861_v7  ;;  %v8765_v60 = vld [vmem:[#allocation68_spill] sm:$0xff] }
 0x43e   : > { %3344 = vrot.lane.b32.xlu0 %v3280_v43, %s5198_s27  ;;  %v3285_v51 = vmul.f32 %v8765_v60, %v7856_v4 }
 0x43f   : > { %v7776_v54 = vpop.permute.xlu1 %3622  ;;  %v3628_v18 = vpop.permute.xlu0 %3627 }
 0x440   : > { %v3765_v33 = vmul.f32 %v3628_v18, %v7856_v4 }
 0x441   : > { %3346 = vrot.lane.b32.xlu1 %v3281_v42, %s5198_s27  ;;  %v2095_v42 = vpop.f32.mrf.mxu1 }
 0x443   : > { %v7781_v47 = vpop.permute.xlu1 %3632  ;;  %v7783_v29 = vpop.permute.xlu0 %3637 }
 0x447   : > { %v7785_v13 = vpop.permute.xlu1 %3642  ;;  %v7787_v27 = vpop.permute.xlu0 %3647 }
 0x44b   : > { %v7789_v50 = vpop.permute.xlu1 %3652  ;;  %v7791_v59 = vpop.permute.xlu0 %3657 }
 0x44f   : > { %v7793_v39 = vpop.permute.xlu1 %3662  ;;  %v7795_v5 = vpop.permute.xlu0 %3667 }
 0x453   : > { %v7797_v41 = vpop.permute.xlu1 %3672  ;;  %v7799_v61 = vpop.permute.xlu0 %3677 }
 0x457   : > { %v7801_v49 = vpop.permute.xlu1 %3682  ;;  %v7803_v24 = vpop.permute.xlu0 %3687 }
 0x45b   : > { %v7805_v48 = vpop.permute.xlu1 %3692  ;;  %v7807_v32 = vpop.permute.xlu0 %3697 }
 0x45f   : > { %v7809_v12 = vpop.permute.xlu1 %3702  ;;  %v7811_v14 = vpop.permute.xlu0 %3707 }
 0x463   : > { %v7813_v46 = vpop.permute.xlu1 %3712  ;;  %v7815_v20 = vpop.permute.xlu0 %3717 }
 0x467   : > { %v7817_v62 = vpop.permute.xlu1 %3722  ;;  %v7819_v19 = vpop.permute.xlu0 %3727 }
 0x46b   : > { %v7821_v63 = vpop.permute.xlu1 %3732  ;;  %v7823_v38 = vpop.permute.xlu0 %3737 }
 0x46f   : > { %v7825_v9 = vpop.permute.xlu1 %3742  ;;  %v7827_v28 = vpop.permute.xlu0 %3747 }
 0x473   : > { %v7829_v15 = vpop.permute.xlu1 %3752  ;;  %v7831_v3 = vpop.permute.xlu0 %3757 }
 0x478   : > { %v3987_v6 = vpop.permute.xlu1 %3986  ;;  %v3992_v21 = vpop.permute.xlu0 %3991 }
 0x479   : > { %v4144_v55 = vmul.f32 %v3987_v6, %v7765_v30  ;;  %v4145_v56 = vmul.f32 %v3992_v21, %v7760_v58  ;;  %v7882_v6 = vadd.f32 %v7753_v36, %v2095_v42  ;;  %v3764_v21 = vmul.f32 %v7776_v54, %v7861_v7 }
 0x47b   : > { %4208 = vrot.lane.b32.xlu0 %v4144_v55, %s5199_s28  ;;  %4210 = vrot.lane.b32.xlu1 %v4145_v56, %s5199_s28  ;;  %v3767_v55 = vmul.f32 %v7783_v29, %v7877_v31 }
 0x47c   : > { %v3997_v17 = vpop.permute.xlu1 %3996  ;;  %v4007_v43 = vpop.permute.xlu0 %4006 }
 0x47d   : > { %v4146_v40 = vmul.f32 %v3997_v17, %v7841_v16  ;;  %v4148_v57 = vmul.f32 %v4007_v43, %v7861_v7  ;;  %v8766_v17 = vld [vmem:[#allocation31_spill] sm:$0xff] }
 0x47f   : > { %3830 = vrot.lane.b32.xlu0 %v3763_v44, %s5197_s26  ;;  %3824 = vrot.lane.b32.xlu1 %v3760_v23, %s5197_s26  ;;  %v3287_v23 = vmul.f32 %v8766_v17, %v7877_v31  ;;  %v8767_v44 = vld [vmem:[#allocation69_spill] sm:$0xff]  ;;  %v8770_v17 = vld [vmem:[#allocation76_spill] sm:$0xff] }
 0x480   : > { %v4002_v1 = vpop.permute.xlu1 %4001  ;;  %v4017_v56 = vpop.permute.xlu0 %4016  ;;  %v3286_v8 = vmul.f32 %v8767_v44, %v7882_v6  ;;  %v8771_v44 = vld [vmem:[#allocation71_spill] sm:$0xff] }
 0x481   : > { %v4147_v35 = vmul.f32 %v4002_v1, %v7836_v22  ;;  %v4150_v54 = vmul.f32 %v4017_v56, %v7882_v6 }
 0x483   : > { %3348 = vrot.lane.b32.xlu0 %v3282_v25, %s5198_s27  ;;  %3350 = vrot.lane.b32.xlu1 %v3283_v10, %s5198_s27  ;;  %v4982_v25 = vpop.f32.mrf.mxu1 }
 0x484   : > { %v4012_v52 = vpop.permute.xlu1 %4011  ;;  %v4027_v34 = vpop.permute.xlu0 %4026  ;;  %v7899_v1 = vadd.f32 %v4982_v25, %v7753_v36 }
 0x485   : > { %v4149_v18 = vmul.f32 %v4012_v52, %v7856_v4  ;;  %v2105_v26 = vpop.f32.mrf.mxu1 }
 0x486   : > { %v3769_v37 = vmul.f32 %v7787_v27, %v7899_v1  ;;  %v3289_v45 = vmul.f32 %v8768_v53, %v7899_v1  ;;  %v8772_v53 = vld [vmem:[#allocation4_spill] sm:$0xff] }
 0x487   : > { %4212 = vrot.lane.b32.xlu0 %v4146_v40, %s5199_s28  ;;  %4214 = vrot.lane.b32.xlu1 %v4147_v35, %s5199_s28  ;;  %v7904_v40 = vadd.f32 %v7753_v36, %v2105_v26  ;;  %v3766_v35 = vmul.f32 %v7781_v47, %v7882_v6 }
 0x488   : > { %v4022_v2 = vpop.permute.xlu1 %4021 }
 0x489   : > { %v4151_v29 = vmul.f32 %v4022_v2, %v7877_v31  ;;  %v4152_v47 = vmul.f32 %v4027_v34, %v7904_v40 }
 0x48b   : > { %3834 = vrot.lane.b32.xlu0 %v3765_v33, %s5197_s26  ;;  %3828 = vrot.lane.b32.xlu1 %v3762_v11, %s5197_s26  ;;  %v4037_v11 = vpop.permute.xlu0 %4036 }
 0x48c   : > { %v4032_v10 = vpop.permute.xlu1 %4031 }
 0x48d   : > { %v4153_v27 = vmul.f32 %v4032_v10, %v7899_v1 }
 0x48f   : > { %3352 = vrot.lane.b32.xlu0 %v3284_v0, %s5198_s27  ;;  %3354 = vrot.lane.b32.xlu1 %v3285_v51, %s5198_s27  ;;  %v8769_v0 = vld [vmem:[#allocation33_spill] sm:$0xff]  ;;  %v4985_v51 = vpop.f32.mrf.mxu1  ;;  %v4047_v43 = vpop.permute.xlu0 %4046 }
 0x490   : > { %v4042_v33 = vpop.permute.xlu1 %4041  ;;  %v3288_v60 = vmul.f32 %v8769_v0, %v7904_v40  ;;  %v8773_v0 = vld [vmem:[#allocation78_spill] sm:$0xff] }
 0x493   : > { %4218 = vrot.lane.b32.xlu1 %v4149_v18, %s5199_s28  ;;  %4216 = vrot.lane.b32.xlu0 %v4148_v57, %s5199_s28  ;;  %v2115_v57 = vpop.f32.mrf.mxu1  ;;  %v7921_v18 = vadd.f32 %v4985_v51, %v7753_v36  ;;  %v4057_v56 = vpop.permute.xlu0 %4056 }
 0x494   : > { %v4052_v52 = vpop.permute.xlu1 %4051  ;;  %v7926_v42 = vadd.f32 %v7753_v36, %v2115_v57 }
 0x495   : > { %v4988_v25 = vpop.f32.mrf.mxu1 }
 0x496   : > { %v7945_v10 = vadd.f32 %v4988_v25, %v7753_v36  ;;  %v8775_v25 = vld [vmem:[#allocation5_spill] sm:$0xff] }
 0x497   : > { %3832 = vrot.lane.b32.xlu1 %v3764_v21, %s5197_s26  ;;  %3838 = vrot.lane.b32.xlu0 %v3767_v55, %s5197_s26  ;;  %v3768_v21 = vmul.f32 %v7785_v13, %v7904_v40  ;;  %v3771_v55 = vmul.f32 %v7791_v59, %v7921_v18  ;;  %v7938_v34 = vpop.permute.xlu0 %4066  ;;  %v4154_v13 = vmul.f32 %v4037_v11, %v7926_v42 }
 0x498   : > { %v4062_v2 = vpop.permute.xlu1 %4061  ;;  %v4155_v59 = vmul.f32 %v4042_v33, %v7921_v18 }
 0x49b   : > { %3358 = vrot.lane.b32.xlu1 %v3287_v23, %s5198_s27  ;;  %3356 = vrot.lane.b32.xlu0 %v3286_v8, %s5198_s27  ;;  %v3291_v23 = vmul.f32 %v8770_v17, %v7921_v18  ;;  %v3290_v8 = vmul.f32 %v8771_v44, %v7926_v42  ;;  %v7956_v11 = vpop.permute.xlu0 %4076  ;;  %v8774_v44 = vld [vmem:[#allocation6_spill] sm:$0xff] }
 0x49f   : > { %4222 = vrot.lane.b32.xlu1 %v4151_v29, %s5199_s28  ;;  %4220 = vrot.lane.b32.xlu0 %v4150_v54, %s5199_s28  ;;  %v4072_v54 = vpop.permute.xlu1 %4071  ;;  %v2125_v29 = vpop.f32.mrf.mxu1 }
 0x4a0   : > { %v7950_v26 = vadd.f32 %v7753_v36, %v2125_v29 }
 0x4a1   : > { %v4991_v51 = vpop.f32.mrf.mxu1 }
 0x4a2   : > { %v3772_v17 = vmul.f32 %v7793_v39, %v7950_v26 }
 0x4a3   : > { %3836 = vrot.lane.b32.xlu1 %v3766_v35, %s5197_s26  ;;  %3842 = vrot.lane.b32.xlu0 %v3769_v37, %s5197_s26  ;;  %v3770_v35 = vmul.f32 %v7789_v50, %v7926_v42  ;;  %v3773_v37 = vmul.f32 %v7795_v5, %v7945_v10  ;;  %v7958_v33 = vpop.permute.xlu1 %4081  ;;  %v4156_v50 = vmul.f32 %v4047_v43, %v7950_v26  ;;  %v2135_v57 = vpop.f32.mrf.mxu1 }
 0x4a4   : > { %v4157_v5 = vmul.f32 %v4052_v52, %v7945_v10 }
 0x4a7   : > { %3362 = vrot.lane.b32.xlu1 %v3289_v45, %s5198_s27  ;;  %3360 = vrot.lane.b32.xlu0 %v3288_v60, %s5198_s27  ;;  %v3293_v45 = vmul.f32 %v8772_v53, %v7945_v10  ;;  %v3292_v60 = vmul.f32 %v8773_v0, %v7950_v26 }
 0x4ab   : > { %4226 = vrot.lane.b32.xlu1 %v4153_v27, %s5199_s28  ;;  %4224 = vrot.lane.b32.xlu0 %v4152_v47, %s5199_s28  ;;  %v7966_v47 = vpop.permute.xlu0 %4086  ;;  %v7972_v27 = vpop.permute.xlu1 %4091 }
 0x4af   : > { %3840 = vrot.lane.b32.xlu1 %v3768_v21, %s5197_s26  ;;  %3846 = vrot.lane.b32.xlu0 %v3771_v55, %s5197_s26  ;;  %v7975_v21 = vadd.f32 %v4991_v51, %v7753_v36  ;;  %v7980_v55 = vadd.f32 %v7753_v36, %v2135_v57  ;;  %v7986_v52 = vpop.permute.xlu0 %4096  ;;  %v8776_v51 = vld [vmem:[#allocation28_spill] sm:$0xff] }
 0x4b1   : > { %v3775_v43 = vmul.f32 %v7799_v61, %v7975_v21  ;;  %v4158_v39 = vmul.f32 %v4057_v56, %v7980_v55  ;;  %v4159_v61 = vmul.f32 %v4062_v2, %v7975_v21  ;;  %v3774_v0 = vmul.f32 %v7797_v41, %v7980_v55 }
 0x4b3   : > { %3366 = vrot.lane.b32.xlu1 %v3291_v23, %s5198_s27  ;;  %3364 = vrot.lane.b32.xlu0 %v3290_v8, %s5198_s27  ;;  %v7988_v23 = vpop.permute.xlu1 %4101  ;;  %v3295_v8 = vmul.f32 %v8774_v44, %v7975_v21  ;;  %v7996_v29 = vpop.permute.xlu0 %4106 }
 0x4b7   : > { %4230 = vrot.lane.b32.xlu1 %v4155_v59, %s5199_s28  ;;  %4228 = vrot.lane.b32.xlu0 %v4154_v13, %s5199_s28  ;;  %v3294_v13 = vmul.f32 %v8775_v25, %v7980_v55  ;;  %v4994_v59 = vpop.f32.mrf.mxu1  ;;  %v8016_v2 = vpop.permute.xlu0 %4116 }
 0x4b8   : > { %v8005_v53 = vadd.f32 %v4994_v59, %v7753_v36 }
 0x4ba   : > { %v3777_v56 = vmul.f32 %v7803_v24, %v8005_v53  ;;  %v4161_v24 = vmul.f32 %v4072_v54, %v8005_v53 }
 0x4bb   : > { %3844 = vrot.lane.b32.xlu1 %v3770_v35, %s5197_s26  ;;  %3850 = vrot.lane.b32.xlu0 %v3773_v37, %s5197_s26  ;;  %v8002_v35 = vpop.permute.xlu1 %4111  ;;  %v2145_v37 = vpop.f32.mrf.mxu1 }
 0x4bf   : > { %3370 = vrot.lane.b32.xlu1 %v3293_v45, %s5198_s27  ;;  %3368 = vrot.lane.b32.xlu0 %v3292_v60, %s5198_s27  ;;  %v8010_v45 = vadd.f32 %v7753_v36, %v2145_v37  ;;  %v8018_v60 = vpop.permute.xlu1 %4121 }
 0x4c1   : > { %v4160_v41 = vmul.f32 %v7938_v34, %v8010_v45  ;;  %v3776_v59 = vmul.f32 %v7801_v49, %v8010_v45 }
 0x4c3   : > { %4234 = vrot.lane.b32.xlu1 %v4157_v5, %s5199_s28  ;;  %4232 = vrot.lane.b32.xlu0 %v4156_v50, %s5199_s28  ;;  %v3297_v50 = vmul.f32 %v8776_v51, %v8005_v53  ;;  %v8777_v5 = vld [vmem:[#allocation7_spill] sm:$0xff]  ;;  %v8033_v44 = vpop.permute.xlu1 %4131 }
 0x4c4   : > { %v3296_v57 = vmul.f32 %v8777_v5, %v8010_v45 }
 0x4c7   : > { %3848 = vrot.lane.b32.xlu1 %v3772_v17, %s5197_s26  ;;  %3854 = vrot.lane.b32.xlu0 %v3775_v43, %s5197_s26  ;;  %v4997_v17 = vpop.f32.mrf.mxu1  ;;  %v8026_v43 = vpop.permute.xlu0 %4126 }
 0x4c8   : > { %v8036_v25 = vadd.f32 %v4997_v17, %v7753_v36  ;;  %v8780_v17 = vld [vmem:[#allocation14_spill] sm:$0xff] }
 0x4ca   : > { %v3779_v34 = vmul.f32 %v7807_v32, %v8036_v25  ;;  %v4163_v32 = vmul.f32 %v7958_v33, %v8036_v25 }
 0x4cb   : > { %3374 = vrot.lane.b32.xlu1 %v3295_v8, %s5198_s27  ;;  %3372 = vrot.lane.b32.xlu0 %v3294_v13, %s5198_s27  ;;  %v2155_v8 = vpop.f32.mrf.mxu1  ;;  %v8047_v54 = vpop.permute.xlu0 %4136 }
 0x4cc   : > { %v8041_v13 = vadd.f32 %v7753_v36, %v2155_v8 }
 0x4cd   : > { %v5000_v51 = vpop.f32.mrf.mxu1 }
 0x4ce   : > { %v4162_v49 = vmul.f32 %v7956_v11, %v8041_v13  ;;  %v3778_v11 = vmul.f32 %v7805_v48, %v8041_v13  ;;  %v8781_v48 = vld [vmem:[#allocation79_spill] sm:$0xff] }
 0x4cf   : > { %4238 = vrot.lane.b32.xlu1 %v4159_v61, %s5199_s28  ;;  %4236 = vrot.lane.b32.xlu0 %v4158_v39, %s5199_s28  ;;  %v8049_v39 = vpop.permute.xlu1 %4141  ;;  %v8778_v61 = vld [vmem:[#allocation32_spill] sm:$0xff] }
 0x4d0   : > { %v3299_v37 = vmul.f32 %v8778_v61, %v8036_v25 }
 0x4d3   : > { %3852 = vrot.lane.b32.xlu1 %v3774_v0, %s5197_s26  ;;  %3858 = vrot.lane.b32.xlu0 %v3777_v56, %s5197_s26  ;;  %v8779_v0 = vld [vmem:[#allocation8_spill] sm:$0xff]  ;;  %v3347_v5 = vpop.permute.xlu1 %3346 }
 0x4d4   : > { %v3298_v56 = vmul.f32 %v8779_v0, %v8041_v13 }
 0x4d7   : > { %3378 = vrot.lane.b32.xlu1 %v3297_v50, %s5198_s27  ;;  %3376 = vrot.lane.b32.xlu0 %v3296_v57, %s5198_s27  ;;  %v3827_v50 = vpop.permute.xlu0 %3826  ;;  %v2165_v57 = vpop.f32.mrf.mxu1 }
 0x4db   : > { %4242 = vrot.lane.b32.xlu1 %v4161_v24, %s5199_s28  ;;  %4240 = vrot.lane.b32.xlu0 %v4160_v41, %s5199_s28  ;;  %v2961_v41 = vmul.f32 %v8780_v17, %v7760_v58  ;;  %v8066_v24 = vadd.f32 %v5000_v51, %v7753_v36  ;;  %v5003_v51 = vpop.f32.mrf.mxu1 }
 0x4dd   : > { %v3441_v8 = vadd.f32 %v3347_v5, %v2961_v41  ;;  %v3781_v33 = vmul.f32 %v7811_v14, %v8066_v24  ;;  %v3301_v0 = vmul.f32 %v8781_v48, %v8066_v24  ;;  %v8782_v14 = vld [vmem:[#allocation10_spill] sm:$0xff]  ;;  %v4165_v17 = vmul.f32 %v7972_v27, %v8066_v24 }
 0x4df   : > { %3856 = vrot.lane.b32.xlu1 %v3776_v59, %s5197_s26  ;;  %3862 = vrot.lane.b32.xlu0 %v3779_v34, %s5197_s26  ;;  %v8071_v59 = vadd.f32 %v7753_v36, %v2165_v57  ;;  %v3345_v34 = vpop.permute.xlu0 %3344  ;;  %v3921_v58 = vadd.f32 %v3827_v50, %v3441_v8 }
 0x4e1   : > { %v4164_v57 = vmul.f32 %v7966_v47, %v8071_v59  ;;  %v3780_v27 = vmul.f32 %v7809_v12, %v8071_v59  ;;  %v8786_v12 = vld [vmem:[#allocation80_spill] sm:$0xff] }
 0x4e3   : > { %3382 = vrot.lane.b32.xlu1 %v3299_v37, %s5198_s27  ;;  %3380 = vrot.lane.b32.xlu0 %v3298_v56, %s5198_s27  ;;  %v3300_v56 = vmul.f32 %v8782_v14, %v8071_v59 }
 0x4e7   : > { %4246 = vrot.lane.b32.xlu1 %v4163_v32, %s5199_s28  ;;  %4244 = vrot.lane.b32.xlu0 %v4162_v49, %s5199_s28  ;;  %v8783_v49 = vld [vmem:[#allocation46_spill] sm:$0xff] }
 0x4e8   : > { %v2960_v50 = vmul.f32 %v8783_v49, %v7765_v30  ;;  %v8101_v30 = vadd.f32 %v5003_v51, %v7753_v36  ;;  %v8785_v49 = vld [vmem:[#allocation81_spill] sm:$0xff] }
 0x4ea   : > { %v3440_v5 = vadd.f32 %v3345_v34, %v2960_v50  ;;  %v3783_v48 = vmul.f32 %v7815_v20, %v8101_v30  ;;  %v3303_v50 = vmul.f32 %v8785_v49, %v8101_v30 }
 0x4eb   : > { %3860 = vrot.lane.b32.xlu1 %v3778_v11, %s5197_s26  ;;  %3866 = vrot.lane.b32.xlu0 %v3781_v33, %s5197_s26  ;;  %v2175_v11 = vpop.f32.mrf.mxu1 }
 0x4ec   : > { %v8108_v47 = vadd.f32 %v7753_v36, %v2175_v11  ;;  %v4167_v11 = vmul.f32 %v7988_v23, %v8101_v30 }
 0x4ed   : > { %v4211_v61 = vpop.permute.xlu1 %4210  ;;  %v4209_v37 = vpop.permute.xlu0 %4208 }
 0x4ee   : > { %v4305_v32 = vadd.f32 %v4211_v61, %v3921_v58  ;;  %v8784_v58 = vld [vmem:[#allocation15_spill] sm:$0xff]  ;;  %v5006_v20 = vpop.f32.mrf.mxu1  ;;  %v3782_v23 = vmul.f32 %v7813_v46, %v8108_v47  ;;  %v8790_v46 = vld [vmem:[#allocation82_spill] sm:$0xff] }
 0x4ef   : > { %3386 = vrot.lane.b32.xlu1 %v3301_v0, %s5198_s27  ;;  %3384 = vrot.lane.b32.xlu0 %v3300_v56, %s5198_s27  ;;  %v2963_v61 = vmul.f32 %v8784_v58, %v7836_v22 }
 0x4f0   : > { %4338 = vst.msk [vmem:[%s8084_s11 + $0x8] sm:$0xff] %vm4336_vm0, %v4305_v32  ;;  %v3302_v32 = vmul.f32 %v8786_v12, %v8108_v47  ;;  %v2185_v58 = vpop.f32.mrf.mxu1 }
 0x4f1   : > { %v3825_v41 = vpop.permute.xlu1 %3824  ;;  %v3831_v8 = vpop.permute.xlu0 %3830 }
 0x4f2   : > { %v3920_v33 = vadd.f32 %v3825_v41, %v3440_v5  ;;  %v8787_v5 = vld [vmem:[#allocation36_spill] sm:$0xff] }
 0x4f3   : > { %4250 = vrot.lane.b32.xlu1 %v4165_v17, %s5199_s28  ;;  %4248 = vrot.lane.b32.xlu0 %v4164_v57, %s5199_s28  ;;  %v2962_v57 = vmul.f32 %v8787_v5, %v7841_v16  ;;  %v8133_v16 = vadd.f32 %v5006_v20, %v7753_v36  ;;  %v8791_v20 = vld [vmem:[#allocation37_spill] sm:$0xff] }
 0x4f4   : > { %v4304_v34 = vadd.f32 %v4209_v37, %v3920_v33  ;;  %v2964_v5 = vmul.f32 %v8791_v20, %v7861_v7 }
 0x4f5   : > { %v3351_v0 = vpop.permute.xlu1 %3350  ;;  %v3349_v14 = vpop.permute.xlu0 %3348 }
 0x4f6   : > { %4337 = vst.msk [vmem:[%s8084_s11] sm:$0xff] %vm4336_vm0, %v4304_v34  ;;  %v3443_v56 = vadd.f32 %v3351_v0, %v2963_v61  ;;  %v3442_v41 = vadd.f32 %v3349_v14, %v2962_v57  ;;  %v3785_v14 = vmul.f32 %v7819_v19, %v8133_v16  ;;  %v5009_v19 = vpop.f32.mrf.mxu1 }
 0x4f7   : > { %3864 = vrot.lane.b32.xlu1 %v3780_v27, %s5197_s26  ;;  %3870 = vrot.lane.b32.xlu0 %v3783_v48, %s5197_s26  ;;  %v8788_v48 = vld [vmem:[#allocation48_spill] sm:$0xff]  ;;  %v8165_v7 = vadd.f32 %v5009_v19, %v7753_v36 }
 0x4f8   : > { %v3923_v22 = vadd.f32 %v3831_v8, %v3443_v56  ;;  %v4166_v8 = vmul.f32 %v7986_v52, %v8108_v47  ;;  %v2965_v0 = vmul.f32 %v8788_v48, %v7856_v4  ;;  %v8140_v52 = vadd.f32 %v7753_v36, %v2185_v58 }
 0x4f9   : > { %v4215_v37 = vpop.permute.xlu1 %4214  ;;  %v4213_v51 = vpop.permute.xlu0 %4212  ;;  %v4171_v20 = vmul.f32 %v8018_v60, %v8165_v7 }
 0x4fa   : > { %v4307_v17 = vadd.f32 %v4215_v37, %v3923_v22 }
 0x4fb   : > { %3390 = vrot.lane.b32.xlu1 %v3303_v50, %s5198_s27  ;;  %3388 = vrot.lane.b32.xlu0 %v3302_v32, %s5198_s27  ;;  %v8789_v50 = vld [vmem:[#allocation83_spill] sm:$0xff]  ;;  %v3304_v32 = vmul.f32 %v8790_v46, %v8140_v52 }
 0x4fc   : > { %4340 = vst.msk [vmem:[%s8084_s11 + $0x18] sm:$0xff] %vm4336_vm0, %v4307_v17  ;;  %v3305_v12 = vmul.f32 %v8789_v50, %v8133_v16  ;;  %v8795_v50 = vld [vmem:[#allocation17_spill] sm:$0xff] }
 0x4fd   : > { %v3829_v33 = vpop.permute.xlu1 %3828  ;;  %v3835_v34 = vpop.permute.xlu0 %3834 }
 0x4fe   : > { %v3922_v61 = vadd.f32 %v3829_v33, %v3442_v41  ;;  %v4168_v41 = vmul.f32 %v7996_v29, %v8140_v52 }
 0x4ff   : > { %4254 = vrot.lane.b32.xlu1 %v4167_v11, %s5199_s28  ;;  %4252 = vrot.lane.b32.xlu0 %v4166_v8, %s5199_s28  ;;  %v4169_v8 = vmul.f32 %v8002_v35, %v8133_v16  ;;  %v3784_v35 = vmul.f32 %v7817_v62, %v8140_v52  ;;  %v8794_v62 = vld [vmem:[#allocation84_spill] sm:$0xff] }
 0x500   : > { %v4306_v27 = vadd.f32 %v4213_v51, %v3922_v61 }
 0x501   : > { %v3355_v56 = vpop.permute.xlu1 %3354  ;;  %v3353_v22 = vpop.permute.xlu0 %3352 }
 0x502   : > { %4339 = vst.msk [vmem:[%s8084_s11 + $0x10] sm:$0xff] %vm4336_vm0, %v4306_v27  ;;  %v3445_v37 = vadd.f32 %v3355_v56, %v2965_v0  ;;  %v3444_v17 = vadd.f32 %v3353_v22, %v2964_v5  ;;  %v8792_v27 = vld [vmem:[#allocation16_spill] sm:$0xff]  ;;  %v3787_v0 = vmul.f32 %v7823_v38, %v8165_v7 }
 0x503   : > { %3868 = vrot.lane.b32.xlu1 %v3782_v23, %s5197_s26  ;;  %3874 = vrot.lane.b32.xlu0 %v3785_v14, %s5197_s26  ;;  %v2967_v48 = vmul.f32 %v8792_v27, %v7877_v31 }
 0x504   : > { %v3925_v4 = vadd.f32 %v3835_v34, %v3445_v37  ;;  %v2195_v34 = vpop.f32.mrf.mxu1 }
 0x505   : > { %v4219_v51 = vpop.permute.xlu1 %4218  ;;  %v4217_v49 = vpop.permute.xlu0 %4216  ;;  %v8172_v29 = vadd.f32 %v7753_v36, %v2195_v34 }
 0x506   : > { %v4309_v57 = vadd.f32 %v4219_v51, %v3925_v4  ;;  %v8793_v4 = vld [vmem:[#allocation85_spill] sm:$0xff]  ;;  %v5012_v38 = vpop.f32.mrf.mxu1 }
 0x507   : > { %3394 = vrot.lane.b32.xlu1 %v3305_v12, %s5198_s27  ;;  %3392 = vrot.lane.b32.xlu0 %v3304_v32, %s5198_s27  ;;  %v3307_v51 = vmul.f32 %v8793_v4, %v8165_v7  ;;  %v2966_v12 = vmul.f32 %v8795_v50, %v7882_v6  ;;  %v4170_v19 = vmul.f32 %v8016_v2, %v8172_v29 }
 0x508   : > { %4342 = vst.msk [vmem:[%s8084_s11 + $0x28] sm:$0xff] %vm4336_vm0, %v4309_v57  ;;  %v8197_v6 = vadd.f32 %v5012_v38, %v7753_v36  ;;  %v3786_v60 = vmul.f32 %v7821_v63, %v8172_v29  ;;  %v8798_v63 = vld [vmem:[#allocation86_spill] sm:$0xff] }
 0x509   : > { %v3833_v11 = vpop.permute.xlu1 %3832  ;;  %v3839_v33 = vpop.permute.xlu0 %3838 }
 0x50a   : > { %v3924_v58 = vadd.f32 %v3833_v11, %v3444_v17  ;;  %v2205_v17 = vpop.f32.mrf.mxu1  ;;  %v8796_v11 = vld [vmem:[#allocation50_spill] sm:$0xff]  ;;  %v3789_v34 = vmul.f32 %v7827_v28, %v8197_v6 }
 0x50b   : > { %4258 = vrot.lane.b32.xlu1 %v4169_v8, %s5199_s28  ;;  %4256 = vrot.lane.b32.xlu0 %v4168_v41, %s5199_s28  ;;  %v8204_v2 = vadd.f32 %v7753_v36, %v2205_v17 }
 0x50c   : > { %v4308_v61 = vadd.f32 %v4217_v49, %v3924_v58  ;;  %v3306_v49 = vmul.f32 %v8794_v62, %v8172_v29  ;;  %v5015_v28 = vpop.f32.mrf.mxu1 }
 0x50d   : > { %v3359_v23 = vpop.permute.xlu1 %3358  ;;  %v3357_v14 = vpop.permute.xlu0 %3356  ;;  %v4172_v4 = vmul.f32 %v8026_v43, %v8204_v2 }
 0x50e   : > { %4341 = vst.msk [vmem:[%s8084_s11 + $0x20] sm:$0xff] %vm4336_vm0, %v4308_v61  ;;  %v3447_v56 = vadd.f32 %v3359_v23, %v2967_v48  ;;  %v3446_v32 = vadd.f32 %v3357_v14, %v2966_v12  ;;  %v3308_v14 = vmul.f32 %v8798_v63, %v8204_v2  ;;  %v2215_v38 = vpop.f32.mrf.mxu1 }
 0x50f   : > { %3872 = vrot.lane.b32.xlu1 %v3784_v35, %s5197_s26  ;;  %3878 = vrot.lane.b32.xlu0 %v3787_v0, %s5197_s26  ;;  %v8797_v0 = vld [vmem:[#allocation87_spill] sm:$0xff]  ;;  %v8236_v43 = vadd.f32 %v7753_v36, %v2215_v38 }
 0x510   : > { %v3927_v31 = vadd.f32 %v3839_v33, %v3447_v56  ;;  %v2969_v33 = vmul.f32 %v8796_v11, %v7899_v1  ;;  %v3309_v23 = vmul.f32 %v8797_v0, %v8197_v6  ;;  %v8799_v56 = vld [vmem:[#allocation18_spill] sm:$0xff] }
 0x511   : > { %v4223_v22 = vpop.permute.xlu1 %4222  ;;  %v4221_v37 = vpop.permute.xlu0 %4220 }
 0x512   : > { %v4311_v46 = vadd.f32 %v4223_v22, %v3927_v31  ;;  %v2968_v31 = vmul.f32 %v8799_v56, %v7904_v40  ;;  %v8229_v40 = vadd.f32 %v5015_v28, %v7753_v36 }
 0x513   : > { %3398 = vrot.lane.b32.xlu1 %v3307_v51, %s5198_s27  ;;  %3396 = vrot.lane.b32.xlu0 %v3306_v49, %s5198_s27  ;;  %v4173_v51 = vmul.f32 %v8033_v44, %v8197_v6  ;;  %v3788_v44 = vmul.f32 %v7825_v9, %v8204_v2  ;;  %v8802_v9 = vld [vmem:[#allocation88_spill] sm:$0xff] }
 0x514   : > { %4344 = vst.msk [vmem:[%s8084_s11 + $0x38] sm:$0xff] %vm4336_vm0, %v4311_v46  ;;  %v8800_v46 = vld [vmem:[#allocation19_spill] sm:$0xff]  ;;  %v3310_v11 = vmul.f32 %v8802_v9, %v8236_v43 }
 0x515   : > { %v3837_v5 = vpop.permute.xlu1 %3836  ;;  %v3843_v57 = vpop.permute.xlu0 %3842 }
 0x516   : > { %v3926_v41 = vadd.f32 %v3837_v5, %v3446_v32  ;;  %v2971_v32 = vmul.f32 %v8800_v46, %v7921_v18 }
 0x517   : > { %4262 = vrot.lane.b32.xlu1 %v4171_v20, %s5199_s28  ;;  %4260 = vrot.lane.b32.xlu0 %v4170_v19, %s5199_s28  ;;  %v3791_v19 = vmul.f32 %v7831_v3, %v8229_v40  ;;  %v8803_v3 = vld [vmem:[#allocation39_spill] sm:$0xff] }
 0x518   : > { %v4310_v8 = vadd.f32 %v4221_v37, %v3926_v41  ;;  %v8801_v41 = vld [vmem:[#allocation89_spill] sm:$0xff] }
 0x519   : > { %v3363_v58 = vpop.permute.xlu1 %3362  ;;  %v3361_v61 = vpop.permute.xlu0 %3360 }
 0x51a   : > { %4343 = vst.msk [vmem:[%s8084_s11 + $0x30] sm:$0xff] %vm4336_vm0, %v4310_v8  ;;  %v3449_v27 = vadd.f32 %v3363_v58, %v2969_v33  ;;  %v3448_v37 = vadd.f32 %v3361_v61, %v2968_v31  ;;  %v3311_v8 = vmul.f32 %v8801_v41, %v8229_v40  ;;  %v2970_v33 = vmul.f32 %v8803_v3, %v7926_v42  ;;  %v8805_v31 = vld [vmem:[#allocation41_spill] sm:$0xff] }
 0x51b   : > { %3876 = vrot.lane.b32.xlu1 %v3786_v60, %s5197_s26  ;;  %3882 = vrot.lane.b32.xlu0 %v3789_v34, %s5197_s26  ;;  %v3790_v58 = vmul.f32 %v7829_v15, %v8236_v43  ;;  %v4174_v61 = vmul.f32 %v8047_v54, %v8236_v43  ;;  %v8808_v41 = vld [vmem:[#allocation21_spill] sm:$0xff] }
 0x51c   : > { %v3929_v1 = vadd.f32 %v3843_v57, %v3449_v27 }
 0x51d   : > { %v4227_v48 = vpop.permute.xlu1 %4226  ;;  %v4225_v35 = vpop.permute.xlu0 %4224 }
 0x51e   : > { %v4313_v22 = vadd.f32 %v4227_v48, %v3929_v1 }
 0x51f   : > { %3402 = vrot.lane.b32.xlu1 %v3309_v23, %s5198_s27  ;;  %3400 = vrot.lane.b32.xlu0 %v3308_v14, %s5198_s27  ;;  %v4175_v23 = vmul.f32 %v8049_v39, %v8229_v40 }
 0x520   : > { %4346 = vst.msk [vmem:[%s8084_s11 + $0x48] sm:$0xff] %vm4336_vm0, %v4313_v22  ;;  %v2972_v22 = vmul.f32 %v8805_v31, %v7950_v26 }
 0x521   : > { %v3841_v62 = vpop.permute.xlu1 %3840  ;;  %v3847_v49 = vpop.permute.xlu0 %3846 }
 0x522   : > { %v3928_v50 = vadd.f32 %v3841_v62, %v3448_v37 }
 0x523   : > { %4266 = vrot.lane.b32.xlu1 %v4173_v51, %s5199_s28  ;;  %4264 = vrot.lane.b32.xlu0 %v4172_v4, %s5199_s28 }
 0x524   : > { %v4312_v12 = vadd.f32 %v4225_v35, %v3928_v50  ;;  %v8804_v35 = vld [vmem:[#allocation52_spill] sm:$0xff] }
 0x525   : > { %v3367_v20 = vpop.permute.xlu1 %3366  ;;  %v3365_v5 = vpop.permute.xlu0 %3364  ;;  %v2973_v0 = vmul.f32 %v8804_v35, %v7945_v10  ;;  %v8810_v35 = vld [vmem:[#allocation56_spill] sm:$0xff] }
 0x526   : > { %4345 = vst.msk [vmem:[%s8084_s11 + $0x40] sm:$0xff] %vm4336_vm0, %v4312_v12  ;;  %v3451_v57 = vadd.f32 %v3367_v20, %v2971_v32  ;;  %v3450_v34 = vadd.f32 %v3365_v5, %v2970_v33 }
 0x527   : > { %3880 = vrot.lane.b32.xlu1 %v3788_v44, %s5197_s26  ;;  %3886 = vrot.lane.b32.xlu0 %v3791_v19, %s5197_s26  ;;  %v8807_v19 = vld [vmem:[#allocation20_spill] sm:$0xff] }
 0x528   : > { %v3931_v18 = vadd.f32 %v3847_v49, %v3451_v57  ;;  %v8806_v49 = vld [vmem:[#allocation53_spill] sm:$0xff]  ;;  %v2974_v20 = vmul.f32 %v8807_v19, %v7980_v55 }
 0x529   : > { %v4231_v17 = vpop.permute.xlu1 %4230  ;;  %v4229_v36 = vpop.permute.xlu0 %4228  ;;  %v2975_v38 = vmul.f32 %v8806_v49, %v7975_v21 }
 0x52a   : > { %v4315_v60 = vadd.f32 %v4231_v17, %v3931_v18 }
 0x52b   : > { %3406 = vrot.lane.b32.xlu1 %v3311_v8, %s5198_s27  ;;  %3404 = vrot.lane.b32.xlu0 %v3310_v11, %s5198_s27  ;;  %v2977_v8 = vmul.f32 %v8808_v41, %v8005_v53 }
 0x52c   : > { %4348 = vst.msk [vmem:[%s8084_s11 + $0x58] sm:$0xff] %vm4336_vm0, %v4315_v60 }
 0x52d   : > { %v3845_v27 = vpop.permute.xlu1 %3844  ;;  %v3851_v1 = vpop.permute.xlu0 %3850 }
 0x52e   : > { %v3930_v48 = vadd.f32 %v3845_v27, %v3450_v34  ;;  %v8809_v34 = vld [vmem:[#allocation55_spill] sm:$0xff] }
 0x52f   : > { %3884 = vrot.lane.b32.xlu1 %v3790_v58, %s5197_s26  ;;  %4268 = vrot.lane.b32.xlu0 %v4174_v61, %s5199_s28  ;;  %v2976_v58 = vmul.f32 %v8809_v34, %v8010_v45 }
 0x530   : > { %v4314_v42 = vadd.f32 %v4229_v36, %v3930_v48 }
 0x531   : > { %v3371_v63 = vpop.permute.xlu1 %3370  ;;  %v3369_v15 = vpop.permute.xlu0 %3368 }
 0x532   : > { %4347 = vst.msk [vmem:[%s8084_s11 + $0x50] sm:$0xff] %vm4336_vm0, %v4314_v42  ;;  %v3453_v54 = vadd.f32 %v3371_v63, %v2973_v0  ;;  %v3452_v4 = vadd.f32 %v3369_v15, %v2972_v22  ;;  %v2979_v0 = vmul.f32 %v8810_v35, %v8036_v25  ;;  %v8817_v35 = vld [vmem:[#allocation60_spill] sm:$0xff] }
 0x533   : > { %4270 = vrot.lane.b32.xlu1 %v4175_v23, %s5199_s28 }
 0x534   : > { %v3933_v14 = vadd.f32 %v3851_v1, %v3453_v54 }
 0x535   : > { %v4235_v28 = vpop.permute.xlu1 %4234  ;;  %v4233_v56 = vpop.permute.xlu0 %4232 }
 0x536   : > { %v4317_v37 = vadd.f32 %v4235_v28, %v3933_v14  ;;  %v8811_v28 = vld [vmem:[#allocation44_spill] sm:$0xff] }
 0x538   : > { %4350 = vst.msk [vmem:[%s8084_s11 + $0x68] sm:$0xff] %vm4336_vm0, %v4317_v37 }
 0x539   : > { %v3849_v10 = vpop.permute.xlu1 %3848  ;;  %v3855_v39 = vpop.permute.xlu0 %3854 }
 0x53a   : > { %v3932_v51 = vadd.f32 %v3849_v10, %v3452_v4 }
 0x53c   : > { %v4316_v62 = vadd.f32 %v4233_v56, %v3932_v51  ;;  %v2978_v56 = vmul.f32 %v8811_v28, %v8041_v13 }
 0x53d   : > { %v3375_v50 = vpop.permute.xlu1 %3374  ;;  %v3373_v12 = vpop.permute.xlu0 %3372 }
 0x53e   : > { %4349 = vst.msk [vmem:[%s8084_s11 + $0x60] sm:$0xff] %vm4336_vm0, %v4316_v62  ;;  %v3455_v46 = vadd.f32 %v3375_v50, %v2975_v38  ;;  %v3454_v57 = vadd.f32 %v3373_v12, %v2974_v20 }
 0x540   : > { %v3935_v32 = vadd.f32 %v3855_v39, %v3455_v46  ;;  %v8812_v39 = vld [vmem:[#allocation47_spill] sm:$0xff]  ;;  %v8813_v46 = vld [vmem:[#allocation49_spill] sm:$0xff] }
 0x541   : > { %v4239_v26 = vpop.permute.xlu1 %4238  ;;  %v4237_v44 = vpop.permute.xlu0 %4236  ;;  %v2981_v51 = vmul.f32 %v8812_v39, %v8066_v24 }
 0x542   : > { %v4319_v5 = vadd.f32 %v4239_v26, %v3935_v32  ;;  %v2980_v32 = vmul.f32 %v8813_v46, %v8071_v59 }
 0x544   : > { %4352 = vst.msk [vmem:[%s8084_s11 + $0x78] sm:$0xff] %vm4336_vm0, %v4319_v5 }
 0x545   : > { %v3853_v18 = vpop.permute.xlu1 %3852  ;;  %v3859_v17 = vpop.permute.xlu0 %3858 }
 0x546   : > { %v3934_v21 = vadd.f32 %v3853_v18, %v3454_v57  ;;  %v8814_v57 = vld [vmem:[#allocation51_spill] sm:$0xff] }
 0x547   : > { %v2983_v18 = vmul.f32 %v8814_v57, %v8101_v30 }
 0x548   : > { %v4318_v36 = vadd.f32 %v4237_v44, %v3934_v21 }
 0x549   : > { %v3379_v9 = vpop.permute.xlu1 %3378  ;;  %v3377_v11 = vpop.permute.xlu0 %3376 }
 0x54a   : > { %4351 = vst.msk [vmem:[%s8084_s11 + $0x70] sm:$0xff] %vm4336_vm0, %v4318_v36  ;;  %v3457_v3 = vadd.f32 %v3379_v9, %v2977_v8  ;;  %v3456_v27 = vadd.f32 %v3377_v11, %v2976_v58  ;;  %v8815_v9 = vld [vmem:[#allocation54_spill] sm:$0xff]  ;;  %v8816_v58 = vld [vmem:[#allocation57_spill] sm:$0xff] }
 0x54b   : > { %v2982_v11 = vmul.f32 %v8815_v9, %v8108_v47 }
 0x54c   : > { %v3937_v33 = vadd.f32 %v3859_v17, %v3457_v3 }
 0x54d   : > { %v4243_v55 = vpop.permute.xlu1 %4242  ;;  %v4241_v60 = vpop.permute.xlu0 %4240 }
 0x54e   : > { %v4321_v61 = vadd.f32 %v4243_v55, %v3937_v33 }
 0x550   : > { %4354 = vst.msk [vmem:[%s8084_s11 + $0x88] sm:$0xff] %vm4336_vm0, %v4321_v61  ;;  %v2985_v61 = vmul.f32 %v8816_v58, %v8133_v16 }
 0x551   : > { %v3857_v1 = vpop.permute.xlu1 %3856  ;;  %v3863_v48 = vpop.permute.xlu0 %3862 }
 0x552   : > { %v3936_v53 = vadd.f32 %v3857_v1, %v3456_v27 }
 0x554   : > { %v4320_v42 = vadd.f32 %v4241_v60, %v3936_v53 }
 0x555   : > { %v3383_v23 = vpop.permute.xlu1 %3382  ;;  %v3381_v63 = vpop.permute.xlu0 %3380 }
 0x556   : > { %4353 = vst.msk [vmem:[%s8084_s11 + $0x80] sm:$0xff] %vm4336_vm0, %v4320_v42  ;;  %v3459_v15 = vadd.f32 %v3383_v23, %v2979_v0  ;;  %v3458_v22 = vadd.f32 %v3381_v63, %v2978_v56  ;;  %v2984_v0 = vmul.f32 %v8817_v35, %v8140_v52 }
 0x558   : > { %v3939_v54 = vadd.f32 %v3863_v48, %v3459_v15 }
 0x559   : > { %v4247_v45 = vpop.permute.xlu1 %4246  ;;  %v4245_v14 = vpop.permute.xlu0 %4244 }
 0x55a   : > { %v4323_v31 = vadd.f32 %v4247_v45, %v3939_v54 }
 0x55c   : > { %4356 = vst.msk [vmem:[%s8084_s11 + $0x98] sm:$0xff] %vm4336_vm0, %v4323_v31 }
 0x55d   : > { %v3861_v37 = vpop.permute.xlu1 %3860  ;;  %v3867_v4 = vpop.permute.xlu0 %3866 }
 0x55e   : > { %v3938_v25 = vadd.f32 %v3861_v37, %v3458_v22 }
 0x560   : > { %v4322_v10 = vadd.f32 %v4245_v14, %v3938_v25  ;;  %v8818_v14 = vld [vmem:[#allocation61_spill] sm:$0xff]  ;;  %v8819_v25 = vld [vmem:[#allocation66_spill] sm:$0xff] }
 0x561   : > { %v3387_v62 = vpop.permute.xlu1 %3386  ;;  %v3385_v49 = vpop.permute.xlu0 %3384  ;;  %v2987_v28 = vmul.f32 %v8818_v14, %v8165_v7 }
 0x562   : > { %4355 = vst.msk [vmem:[%s8084_s11 + $0x90] sm:$0xff] %vm4336_vm0, %v4322_v10  ;;  %v3461_v38 = vadd.f32 %v3387_v62, %v2981_v51  ;;  %v3460_v44 = vadd.f32 %v3385_v49, %v2980_v32  ;;  %v2986_v10 = vmul.f32 %v8819_v25, %v8172_v29 }
 0x564   : > { %v3941_v50 = vadd.f32 %v3867_v4, %v3461_v38 }
 0x565   : > { %v4251_v13 = vpop.permute.xlu1 %4250  ;;  %v4249_v12 = vpop.permute.xlu0 %4248 }
 0x566   : > { %v4325_v26 = vadd.f32 %v4251_v13, %v3941_v50  ;;  %v8820_v50 = vld [vmem:[#allocation67_spill] sm:$0xff] }
 0x567   : > { %v2989_v13 = vmul.f32 %v8820_v50, %v8197_v6 }
 0x568   : > { %4358 = vst.msk [vmem:[%s8084_s11 + $0xa8] sm:$0xff] %vm4336_vm0, %v4325_v26 }
 0x569   : > { %v3865_v19 = vpop.permute.xlu1 %3864  ;;  %v3871_v20 = vpop.permute.xlu0 %3870 }
 0x56a   : > { %v3940_v24 = vadd.f32 %v3865_v19, %v3460_v44  ;;  %v8821_v19 = vld [vmem:[#allocation72_spill] sm:$0xff] }
 0x56c   : > { %v4324_v5 = vadd.f32 %v4249_v12, %v3940_v24 }
 0x56d   : > { %v3391_v17 = vpop.permute.xlu1 %3390  ;;  %v3389_v21 = vpop.permute.xlu0 %3388 }
 0x56e   : > { %4357 = vst.msk [vmem:[%s8084_s11 + $0xa0] sm:$0xff] %vm4336_vm0, %v4324_v5  ;;  %v3463_v36 = vadd.f32 %v3391_v17, %v2983_v18  ;;  %v3462_v33 = vadd.f32 %v3389_v21, %v2982_v11 }
 0x570   : > { %v3943_v41 = vadd.f32 %v3871_v20, %v3463_v36  ;;  %v2988_v20 = vmul.f32 %v8821_v19, %v8204_v2 }
 0x571   : > { %v4255_v59 = vpop.permute.xlu1 %4254  ;;  %v4253_v8 = vpop.permute.xlu0 %4252 }
 0x572   : > { %v4327_v3 = vadd.f32 %v4255_v59, %v3943_v41  ;;  %v8822_v41 = vld [vmem:[#allocation73_spill] sm:$0xff] }
 0x573   : > { %v2991_v59 = vmul.f32 %v8822_v41, %v8229_v40 }
 0x574   : > { %4360 = vst.msk [vmem:[%s8084_s11 + $0xb8] sm:$0xff] %vm4336_vm0, %v4327_v3 }
 0x575   : > { %v3869_v55 = vpop.permute.xlu1 %3868  ;;  %v3875_v60 = vpop.permute.xlu0 %3874 }
 0x576   : > { %v3942_v30 = vadd.f32 %v3869_v55, %v3462_v33 }
 0x578   : > { %v4326_v34 = vadd.f32 %v4253_v8, %v3942_v30  ;;  %v8823_v8 = vld [vmem:[#allocation74_spill] sm:$0xff] }
 0x579   : > { %v3395_v27 = vpop.permute.xlu1 %3394  ;;  %v3393_v1 = vpop.permute.xlu0 %3392  ;;  %v2990_v2 = vmul.f32 %v8823_v8, %v8236_v43 }
 0x57a   : > { %4359 = vst.msk [vmem:[%s8084_s11 + $0xb0] sm:$0xff] %vm4336_vm0, %v4326_v34  ;;  %v3465_v48 = vadd.f32 %v3395_v27, %v2985_v61  ;;  %v3464_v63 = vadd.f32 %v3393_v1, %v2984_v0 }
 0x57c   : > { %v3945_v53 = vadd.f32 %v3875_v60, %v3465_v48 }
 0x57d   : > { %v4259_v47 = vpop.permute.xlu1 %4258  ;;  %v4257_v42 = vpop.permute.xlu0 %4256 }
 0x57e   : > { %v4329_v23 = vadd.f32 %v4259_v47, %v3945_v53 }
 0x580   : > { %4362 = vst.msk [vmem:[%s8084_s11 + $0xc8] sm:$0xff] %vm4336_vm0, %v4329_v23 }
 0x581   : > { %v3873_v15 = vpop.permute.xlu1 %3872  ;;  %v3879_v54 = vpop.permute.xlu0 %3878 }
 0x582   : > { %v3944_v16 = vadd.f32 %v3873_v15, %v3464_v63 }
 0x584   : > { %v4328_v45 = vadd.f32 %v4257_v42, %v3944_v16 }
 0x585   : > { %v3399_v56 = vpop.permute.xlu1 %3398  ;;  %v3397_v31 = vpop.permute.xlu0 %3396 }
 0x586   : > { %4361 = vst.msk [vmem:[%s8084_s11 + $0xc0] sm:$0xff] %vm4336_vm0, %v4328_v45  ;;  %v3467_v22 = vadd.f32 %v3399_v56, %v2987_v28  ;;  %v3466_v51 = vadd.f32 %v3397_v31, %v2986_v10 }
 0x588   : > { %v3947_v37 = vadd.f32 %v3879_v54, %v3467_v22 }
 0x589   : > { %v4263_v52 = vpop.permute.xlu1 %4262  ;;  %v4261_v4 = vpop.permute.xlu0 %4260 }
 0x58a   : > { %v4331_v39 = vadd.f32 %v4263_v52, %v3947_v37 }
 0x58c   : > { %4364 = vst.msk [vmem:[%s8084_s11 + $0xd8] sm:$0xff] %vm4336_vm0, %v4331_v39 }
 0x58d   : > { %v3877_v62 = vpop.permute.xlu1 %3876  ;;  %v3883_v49 = vpop.permute.xlu0 %3882 }
 0x58e   : > { %v3946_v7 = vadd.f32 %v3877_v62, %v3466_v51 }
 0x590   : > { %v4330_v38 = vadd.f32 %v4261_v4, %v3946_v7 }
 0x591   : > { %v3403_v12 = vpop.permute.xlu1 %3402  ;;  %v3401_v46 = vpop.permute.xlu0 %3400 }
 0x592   : > { %4363 = vst.msk [vmem:[%s8084_s11 + $0xd0] sm:$0xff] %vm4336_vm0, %v4330_v38  ;;  %v3469_v32 = vadd.f32 %v3403_v12, %v2989_v13  ;;  %v3468_v5 = vadd.f32 %v3401_v46, %v2988_v20 }
 0x594   : > { %v3949_v26 = vadd.f32 %v3883_v49, %v3469_v32 }
 0x595   : > { %v4267_v29 = vpop.permute.xlu1 %4266  ;;  %v4265_v44 = vpop.permute.xlu0 %4264 }
 0x596   : > { %v4333_v24 = vadd.f32 %v4267_v29, %v3949_v26 }
 0x598   : > { %4366 = vst.msk [vmem:[%s8084_s11 + $0xe8] sm:$0xff] %vm4336_vm0, %v4333_v24 }
 0x599   : > { %v3881_v57 = vpop.permute.xlu1 %3880  ;;  %v3887_v18 = vpop.permute.xlu0 %3886 }
 0x59a   : > { %v3948_v6 = vadd.f32 %v3881_v57, %v3468_v5 }
 0x59c   : > { %v4332_v17 = vadd.f32 %v4265_v44, %v3948_v6 }
 0x59d   : > { %v3407_v21 = vpop.permute.xlu1 %3406  ;;  %v3405_v36 = vpop.permute.xlu0 %3404 }
 0x59e   : > { %4365 = vst.msk [vmem:[%s8084_s11 + $0xe0] sm:$0xff] %vm4336_vm0, %v4332_v17  ;;  %v3471_v9 = vadd.f32 %v3407_v21, %v2991_v59  ;;  %v3470_v11 = vadd.f32 %v3405_v36, %v2990_v2 }
 0x5a0   : > { %v3951_v30 = vadd.f32 %v3887_v18, %v3471_v9 }
 0x5a1   : > { %v3885_v3 = vpop.permute.xlu1 %3884  ;;  %v4269_v55 = vpop.permute.xlu0 %4268 }
 0x5a2   : > { %v3950_v33 = vadd.f32 %v3885_v3, %v3470_v11 }
 0x5a4   : > { %v4334_v60 = vadd.f32 %v4269_v55, %v3950_v33 }
 0x5a5   : > { %v4271_v34 = vpop.permute.xlu1 %4270 }
 0x5a6   : > { %4367 = vst.msk [vmem:[%s8084_s11 + $0xf0] sm:$0xff] %vm4336_vm0, %v4334_v60  ;;  %v4335_v58 = vadd.f32 %v4271_v34, %v3951_v30 }
 0x5a8   : > { %4368 = vst.msk [vmem:[%s8084_s11 + $0xf8] sm:$0xff] %vm4336_vm0, %v4335_v58 }
 0x5a9 PF: > { %s19_s30 = sadd.s32 1, %s5183_s30  }
 0x5aa   : > { %p16_p4 = scmp.ge.s32.totalorder %s19_s30, 4  }
 0x5ac   :  { %18 = sbr.rel (!%p16_p4) target bundleno = 1 (0x1), region = 86 }

</bundles_post_ra>
